<compile_context>
chip_gen: v5e
topology: v5e:2x2
jax: 0.10.0
libtpu: 0.0.40
codegen_flags: <defaults>
</compile_context>

<pallas_src>
import math
from functools import partial

import jax
import jax.numpy as jnp
from jax.experimental import pallas as pl
from jax.experimental.pallas import tpu as pltpu


# ----------------------------------------------------------------------------
# Packed-weight layout (shared by prepare_params and the kernel)
# ----------------------------------------------------------------------------
def _pack_layout(input_size, hidden_size, num_layers):
    """Row offsets of each concatenated [W_ih^T; W_hh^T] block inside w_pack."""
    H = hidden_size
    segs = [("enc0_cat", input_size + H)]
    for l in range(1, num_layers):
        segs.append((f"enc{l}_cat", 2 * H))
    segs.append(("dec0_cat", 2 * H))          # rows 0:H = fc_w^T @ W_ih_dec0^T, rows H:2H = W_hh_dec0^T
    for l in range(1, num_layers):
        segs.append((f"dec{l}_cat", 2 * H))
    offs, o = {}, 0
    for name, rows in segs:
        offs[name] = (o, rows)
        o += rows
    return offs, o


# ----------------------------------------------------------------------------
# Fused Pallas kernel: encoder LSTM + autoregressive decoder LSTM + fc head
# ----------------------------------------------------------------------------
def _lstm_autoregressive_kernel(x_ref, w_ref, b_ref, fcw_ref, fcb_ref, out_ref, *,
                                num_layers, hidden_size, seq_len, n_ahead, offs):
    L, H, S = num_layers, hidden_size, seq_len
    G = 4 * H
    bb = x_ref.shape[0]
    f32 = jnp.float32

    def wseg(name):
        o, r = offs[name]
        return w_ref[o:o + r, :]

    # Weights loaded once, resident for the whole kernel (VMEM reloads are cheap if spilled).
    w_enc = [wseg(f"enc{l}_cat") for l in range(L)]
    w_dec0 = wseg("dec0_cat")
    w_dec = [None] + [wseg(f"dec{l}_cat") for l in range(1, L)]

    # Bias broadcasts hoisted once (avoid N redundant broadcast_in_dim in the unrolled loops).
    b_all = b_ref[...]                                   # (2L+1, 4H)

    def bias(row):
        return jnp.broadcast_to(b_all[row:row + 1, :], (bb, G))

    b_enc = [bias(l) for l in range(L)]
    b_dec0_step0 = bias(L)                               # step 0: decoder input is literally zero
    b_dec0_ar = bias(L + 1)                              # steps >= 1: includes fc_b @ W_ih_dec0^T
    b_dec = [None] + [bias(L + 1 + l) for l in range(1, L)]

    def gate_act(z, c):
        # PyTorch gate order i, f, g, o.  g columns were pre-scaled by 2 in prepare_params,
        # so ONE full-width (bb, 4H) sigmoid covers all gates: tanh(z) = 2*sigmoid(2z) - 1.
        s = jax.nn.sigmoid(z)
        i = s[:, 0 * H:1 * H]
        f = s[:, 1 * H:2 * H]
        g = 2.0 * s[:, 2 * H:3 * H] - 1.0
        o = s[:, 3 * H:4 * H]
        c_new = f * c + i * g
        return o * jnp.tanh(c_new), c_new

    def fused_cell(inp, h, c, w_cat, b):
        # Single (bb, K+H) @ (K+H, 4H) matmul replaces the W_ih / W_hh matmul pair.
        z = jnp.dot(jnp.concatenate([inp, h], axis=1), w_cat,
                    preferred_element_type=f32) + b
        return gate_act(z, c)

    hs = [jnp.zeros((bb, H), f32) for _ in range(L)]
    cs = [jnp.zeros((bb, H), f32) for _ in range(L)]

    # ---- encoder: full input sequence, keep only the final (h, c) per layer ----
    for t in range(S):
        inp = x_ref[:, t, :]                              # (bb, input_size), static index
        for l in range(L):
            hs[l], cs[l] = fused_cell(inp, hs[l], cs[l], w_enc[l], b_enc[l])
            inp = hs[l]

    # ---- decoder: autoregressive; fc folded into the layer-0 input path ----
    w_hh_d0 = w_dec0[H:2 * H, :]                          # (H, 4H), sublane-aligned slice
    h_tops = []
    for t in range(n_ahead):
        if t == 0:
            # decoder_input_0 = zeros -> only the hh path contributes.
            z = jnp.dot(hs[0], w_hh_d0, preferred_element_type=f32) + b_dec0_step0
            hs[0], cs[0] = gate_act(z, cs[0])
        else:
            # dec_in_t = fc(h_top_{t-1}) folded into w_dec0 rows 0:H and b_dec0_ar.
            hs[0], cs[0] = fused_cell(h_tops[-1], hs[0], cs[0], w_dec0, b_dec0_ar)
        for l in range(1, L):
            hs[l], cs[l] = fused_cell(hs[l - 1], hs[l], cs[l], w_dec[l], b_dec[l])
        h_tops.append(hs[L - 1])

    # ---- fc head: all n_ahead predictions in ONE block-diagonal matmul + ONE store ----
    h_cat = jnp.concatenate(h_tops, axis=1)               # (bb, n_ahead*H) -> lane-dense (128)
    preds = jnp.dot(h_cat, fcw_ref[...], preferred_element_type=f32) + fcb_ref[...]
    out_ref[...] = preds.astype(out_ref.dtype)            # (bb, n_ahead*C)


# ----------------------------------------------------------------------------
# Wrapper (static config bound via partial; only arrays are traced)
# ----------------------------------------------------------------------------
def lstm_autoregressive_forward(x, w_pack, b_pack, fc_blk, fc_b_tiled, *,
                                num_layers, hidden_size, num_classes, n_ahead,
                                batch_block=None):
    """x: (B, S, input_size) f32 -> (B, n_ahead, num_classes)."""
    B, S, input_size = x.shape
    if batch_block is None:
        batch_block = B           # latency-bound recurrence: one grid step, full sublanes
    assert B % batch_block == 0 and (batch_block == B or batch_block % 8 == 0)
    grid = (B // batch_block,)

    offs, total_rows = _pack_layout(input_size, hidden_size, num_layers)
    assert w_pack.shape == (total_rows, 4 * hidden_size), w_pack.shape

    kernel = partial(_lstm_autoregressive_kernel, num_layers=num_layers,
                     hidden_size=hidden_size, seq_len=S, n_ahead=n_ahead, offs=offs)

    def whole(a):
        nd = a.ndim
        return pl.BlockSpec(a.shape, lambda b, _nd=nd: (0,) * _nd)

    out2d = pl.pallas_call(
        kernel,
        grid=grid,
        out_shape=jax.ShapeDtypeStruct((B, n_ahead * num_classes), jnp.float32),
        in_specs=[pl.BlockSpec((batch_block, S, input_size), lambda b: (b, 0, 0)),
                  whole(w_pack), whole(b_pack), whole(fc_blk), whole(fc_b_tiled)],
        out_specs=pl.BlockSpec((batch_block, n_ahead * num_classes), lambda b: (b, 0)),
        compiler_params=pltpu.CompilerParams(dimension_semantics=("parallel",)),
    )(x, w_pack, b_pack, fc_blk, fc_b_tiled)
    return out2d.reshape(B, n_ahead, num_classes)


# ----------------------------------------------------------------------------
# Parameters: PyTorch nn.LSTM / nn.Linear layout, then a one-time prep pass
# (transpose, ih/hh stacking, bias combine, fc fold, g-gate pre-scale, packing).
# ----------------------------------------------------------------------------
def init_params_torch_layout(key, *, input_size, hidden_size, num_layers, num_classes):
    keys = iter(jax.random.split(key, 8 * num_layers + 8))
    k = 1.0 / math.sqrt(hidden_size)

    def u(shape):
        return jax.random.uniform(next(keys), shape, jnp.float32, minval=-k, maxval=k)

    def lstm_layers(first_in):
        layers = []
        for l in range(num_layers):
            in_l = first_in if l == 0 else hidden_size
            layers.append({
                "weight_ih": u((4 * hidden_size, in_l)),
                "weight_hh": u((4 * hidden_size, hidden_size)),
                "bias_ih": u((4 * hidden_size,)),
                "bias_hh": u((4 * hidden_size,)),
            })
        return layers

    return {
        "encoder": lstm_layers(input_size),
        "decoder": lstm_layers(num_classes),
        "fc_w": u((num_classes, hidden_size)),
        "fc_b": u((num_classes,)),
    }


def prepare_params(raw, *, input_size, hidden_size, num_layers, num_classes, n_ahead):
    H, C, L = hidden_size, num_classes, num_layers
    G = 4 * H
    offs, total_rows = _pack_layout(input_size, H, L)

    def t(a):
        return jnp.transpose(a)

    def comb_b(p):
        return (p["bias_ih"] + p["bias_hh"]).reshape(1, G)

    enc, dec = raw["encoder"], raw["decoder"]
    fc_w_t = t(raw["fc_w"])                              # (H, C)
    fc_b = raw["fc_b"].reshape(1, C)

    w_pack = jnp.zeros((total_rows, G), jnp.float32)

    def put(w, name, val):
        o, r = offs[name]
        assert val.shape == (r, G), (name, val.shape)
        return w.at[o:o + r, :].set(val)

    b_rows = []
    # encoder layers: [W_ih^T; W_hh^T]
    for l in range(L):
        w_pack = put(w_pack, f"enc{l}_cat",
                     jnp.concatenate([t(enc[l]["weight_ih"]), t(enc[l]["weight_hh"])], axis=0))
        b_rows.append(comb_b(enc[l]))
    # decoder layer 0: fold fc into the input path -> recurrence never runs fc
    w_ih_d0_t = t(dec[0]["weight_ih"])                   # (C, 4H)
    w_hh_d0_t = t(dec[0]["weight_hh"])                   # (H, 4H)
    b_d0 = comb_b(dec[0])
    w_pack = put(w_pack, "dec0_cat",
                 jnp.concatenate([fc_w_t @ w_ih_d0_t, w_hh_d0_t], axis=0))
    b_rows.append(b_d0)                                  # step 0 (true zero decoder input)
    b_rows.append(b_d0 + fc_b @ w_ih_d0_t)               # steps >= 1 (input = fc(h_top_prev))
    for l in range(1, L):
        w_pack = put(w_pack, f"dec{l}_cat",
                     jnp.concatenate([t(dec[l]["weight_ih"]), t(dec[l]["weight_hh"])], axis=0))
        b_rows.append(comb_b(dec[l]))
    b_pack = jnp.concatenate(b_rows, axis=0)             # (2L+1, 4H)

    # Pre-scale g-gate columns by 2 so the kernel uses one full-vreg sigmoid per cell.
    w_pack = w_pack.at[:, 2 * H:3 * H].multiply(2.0)
    b_pack = b_pack.at[:, 2 * H:3 * H].multiply(2.0)

    # Block-diagonal fc head: one (bb, n_ahead*H) @ (n_ahead*H, n_ahead*C) matmul at the end.
    fc_blk = jnp.zeros((n_ahead * H, n_ahead * C), jnp.float32)
    for k in range(n_ahead):
        fc_blk = fc_blk.at[k * H:(k + 1) * H, k * C:(k + 1) * C].set(fc_w_t)
    fc_b_tiled = jnp.tile(fc_b, (1, n_ahead))            # (1, n_ahead*C)

    return {"w_pack": w_pack, "b_pack": b_pack, "fc_blk": fc_blk, "fc_b_tiled": fc_b_tiled}


# ----------------------------------------------------------------------------
# Pure-JAX reference in the ORIGINAL (unfused) PyTorch formulation
# ----------------------------------------------------------------------------
def reference_forward(x, raw, *, num_layers, hidden_size, num_classes, n_ahead):
    L, H, C = num_layers, hidden_size, num_classes
    B, S, _ = x.shape

    def cell(x_t, h, c, p):
        gates = (x_t @ p["weight_ih"].T + h @ p["weight_hh"].T
                 + p["bias_ih"] + p["bias_hh"])
        i = jax.nn.sigmoid(gates[:, 0 * H:1 * H])
        f = jax.nn.sigmoid(gates[:, 1 * H:2 * H])
        g = jnp.tanh(gates[:, 2 * H:3 * H])
        o = jax.nn.sigmoid(gates[:, 3 * H:4 * H])
        c_new = f * c + i * g
        return o * jnp.tanh(c_new), c_new

    hs = [jnp.zeros((B, H), jnp.float32) for _ in range(L)]
    cs = [jnp.zeros((B, H), jnp.float32) for _ in range(L)]
    for t in range(S):
        inp = x[:, t, :]
        for l in range(L):
            hs[l], cs[l] = cell(inp, hs[l], cs[l], raw["encoder"][l])
            inp = hs[l]

    dec_in = jnp.zeros((B, C), jnp.float32)
    outs = []
    for t in range(n_ahead):
        inp = dec_in
        for l in range(L):
            hs[l], cs[l] = cell(inp, hs[l], cs[l], raw["decoder"][l])
            inp = hs[l]
        pred = inp @ raw["fc_w"].T + raw["fc_b"]
        outs.append(pred[:, None, :])
        dec_in = pred
    return jnp.concatenate(outs, axis=1)


# ----------------------------------------------------------------------------
# Main
# ----------------------------------------------------------------------------
if __name__ == "__main__":
    # Small shapes consistent with the module's forward.
    batch, seq_len, input_size = 8, 8, 8           # batch=8 -> full f32 sublane occupancy
    hidden_size, num_layers = 32, 2                # 4*hidden = 128 -> lane-dense gate matmuls
    num_classes, n_ahead = 4, 4                    # n_ahead*hidden = 128 -> lane-dense head input

    key = jax.random.PRNGKey(0)
    kparams, kdata = jax.random.split(key)

    raw = init_params_torch_layout(kparams, input_size=input_size, hidden_size=hidden_size,
                                   num_layers=num_layers, num_classes=num_classes)
    packed = prepare_params(raw, input_size=input_size, hidden_size=hidden_size,
                            num_layers=num_layers, num_classes=num_classes, n_ahead=n_ahead)

    x = jax.random.normal(kdata, (batch, seq_len, input_size), jnp.float32)

    fwd = jax.jit(partial(lstm_autoregressive_forward,
                          num_layers=num_layers, hidden_size=hidden_size,
                          num_classes=num_classes, n_ahead=n_ahead))
    out = jax.block_until_ready(fwd(x, packed["w_pack"], packed["b_pack"],
                                    packed["fc_blk"], packed["fc_b_tiled"]))

    assert out.shape == (batch, n_ahead, num_classes), out.shape
    assert bool(jnp.all(jnp.isfinite(out)))

    ref = reference_forward(x, raw, num_layers=num_layers, hidden_size=hidden_size,
                            num_classes=num_classes, n_ahead=n_ahead)
    max_err = float(jnp.max(jnp.abs(out - ref)))
    # Tolerance covers fp32 reassociation from the ih/hh fusion, fc fold and tanh-via-sigmoid.
    assert bool(jnp.allclose(out, ref, rtol=1e-3, atol=1e-4)), max_err

    print("KERNEL_OK")
</pallas_src>

<mosaic_0001>
module attributes {stable_mosaic.version = 11 : i64} {
  func.func @_lstm_autoregressive_kernel(%arg0: i32, %arg1: memref<8x8x8xf32, #tpu.memory_space<vmem>>, %arg2: memref<232x128xf32, #tpu.memory_space<vmem>>, %arg3: memref<5x128xf32, #tpu.memory_space<vmem>>, %arg4: memref<128x16xf32, #tpu.memory_space<vmem>>, %arg5: memref<1x16xf32, #tpu.memory_space<vmem>>, %arg6: memref<8x16xf32, #tpu.memory_space<vmem>>) attributes {dimension_semantics = [#tpu.dimension_semantics<parallel>], iteration_bounds = array<i64: 1>, scalar_prefetch = 0 : i64, scratch_operands = 0 : i64, tpu.core_type = #tpu.core_type<tc>, window_params = [{transform_indices = @transform_0, window_bounds = array<i64: 8, 8, 8>}, {pipeline_mode = #tpu.pipeline_mode<synchronous>, transform_indices = @transform_1, window_bounds = array<i64: 232, 128>}, {pipeline_mode = #tpu.pipeline_mode<synchronous>, transform_indices = @transform_2, window_bounds = array<i64: 5, 128>}, {pipeline_mode = #tpu.pipeline_mode<synchronous>, transform_indices = @transform_3, window_bounds = array<i64: 128, 16>}, {pipeline_mode = #tpu.pipeline_mode<synchronous>, transform_indices = @transform_4, window_bounds = array<i64: 1, 16>}, {transform_indices = @transform_5, window_bounds = array<i64: 8, 16>}]} {
    %c0 = arith.constant 0 : index
    %c0_0 = arith.constant 0 : index
    %0 = vector.load %arg2[%c0, %c0_0] : memref<232x128xf32, #tpu.memory_space<vmem>>, vector<40x128xf32>
    %c40 = arith.constant 40 : index
    %c0_1 = arith.constant 0 : index
    %1 = vector.load %arg2[%c40, %c0_1] : memref<232x128xf32, #tpu.memory_space<vmem>>, vector<64x128xf32>
    %c104 = arith.constant 104 : index
    %c0_2 = arith.constant 0 : index
    %2 = vector.load %arg2[%c104, %c0_2] : memref<232x128xf32, #tpu.memory_space<vmem>>, vector<64x128xf32>
    %c168 = arith.constant 168 : index
    %c0_3 = arith.constant 0 : index
    %3 = vector.load %arg2[%c168, %c0_3] : memref<232x128xf32, #tpu.memory_space<vmem>>, vector<64x128xf32>
    %c0_4 = arith.constant 0 : index
    %c0_5 = arith.constant 0 : index
    %4 = vector.load %arg3[%c0_4, %c0_5] : memref<5x128xf32, #tpu.memory_space<vmem>>, vector<5x128xf32>
    %5 = vector.extract_strided_slice %4 {offsets = [0, 0], sizes = [1, 128], strides = [1, 1]} : vector<5x128xf32> to vector<1x128xf32>
    %6 = vector.shape_cast %5 : vector<1x128xf32> to vector<1x128xf32>
    %7 = vector.broadcast %6 : vector<1x128xf32> to vector<8x128xf32>
    %8 = vector.extract_strided_slice %4 {offsets = [1, 0], sizes = [1, 128], strides = [1, 1]} : vector<5x128xf32> to vector<1x128xf32>
    %9 = vector.shape_cast %8 : vector<1x128xf32> to vector<1x128xf32>
    %10 = vector.broadcast %9 : vector<1x128xf32> to vector<8x128xf32>
    %11 = vector.extract_strided_slice %4 {offsets = [2, 0], sizes = [1, 128], strides = [1, 1]} : vector<5x128xf32> to vector<1x128xf32>
    %12 = vector.shape_cast %11 : vector<1x128xf32> to vector<1x128xf32>
    %13 = vector.broadcast %12 : vector<1x128xf32> to vector<8x128xf32>
    %14 = vector.extract_strided_slice %4 {offsets = [3, 0], sizes = [1, 128], strides = [1, 1]} : vector<5x128xf32> to vector<1x128xf32>
    %15 = vector.shape_cast %14 : vector<1x128xf32> to vector<1x128xf32>
    %16 = vector.broadcast %15 : vector<1x128xf32> to vector<8x128xf32>
    %17 = vector.extract_strided_slice %4 {offsets = [4, 0], sizes = [1, 128], strides = [1, 1]} : vector<5x128xf32> to vector<1x128xf32>
    %18 = vector.shape_cast %17 : vector<1x128xf32> to vector<1x128xf32>
    %19 = vector.broadcast %18 : vector<1x128xf32> to vector<8x128xf32>
    %cst = arith.constant 0.000000e+00 : f32
    %20 = vector.broadcast %cst : f32 to vector<8x32xf32>
    %cst_6 = arith.constant 0.000000e+00 : f32
    %21 = vector.broadcast %cst_6 : f32 to vector<8x32xf32>
    %cst_7 = arith.constant 0.000000e+00 : f32
    %22 = vector.broadcast %cst_7 : f32 to vector<8x32xf32>
    %cst_8 = arith.constant 0.000000e+00 : f32
    %23 = vector.broadcast %cst_8 : f32 to vector<8x32xf32>
    %c0_9 = arith.constant 0 : index
    %c0_10 = arith.constant 0 : index
    %c0_11 = arith.constant 0 : index
    %24 = vector.load %arg1[%c0_9, %c0_10, %c0_11] : memref<8x8x8xf32, #tpu.memory_space<vmem>>, vector<8x1x8xf32>
    %25 = vector.shape_cast %24 : vector<8x1x8xf32> to vector<8x8xf32>
    %26 = tpu.concatenate %25, %20 in 1 : vector<8x8xf32>, vector<8x32xf32> -> vector<8x40xf32>
    %cst_12 = arith.constant dense<0.000000e+00> : vector<8x128xf32>
    %27 = tpu.matmul %26, %0, %cst_12 {dimension_numbers = #tpu.dot_dimension_numbers<[1], [0], [0], [1], [0, 0, 1, 1], [], []>} : vector<8x40xf32>, vector<40x128xf32>, vector<8x128xf32> -> vector<8x128xf32>
    %28 = arith.addf %27, %7 : vector<8x128xf32>
    %29 = arith.negf %28 : vector<8x128xf32>
    %30 = math.exp %29 : vector<8x128xf32>
    %cst_13 = arith.constant 1.000000e+00 : f32
    %31 = vector.broadcast %cst_13 : f32 to vector<8x128xf32>
    %32 = arith.addf %31, %30 : vector<8x128xf32>
    %33 = arith.divf %31, %32 : vector<8x128xf32>
    %34 = vector.extract_strided_slice %33 {offsets = [0, 0], sizes = [8, 32], strides = [1, 1]} : vector<8x128xf32> to vector<8x32xf32>
    %35 = vector.extract_strided_slice %33 {offsets = [0, 32], sizes = [8, 32], strides = [1, 1]} : vector<8x128xf32> to vector<8x32xf32>
    %36 = vector.extract_strided_slice %33 {offsets = [0, 64], sizes = [8, 32], strides = [1, 1]} : vector<8x128xf32> to vector<8x32xf32>
    %cst_14 = arith.constant 2.000000e+00 : f32
    %37 = vector.broadcast %cst_14 : f32 to vector<8x32xf32>
    %38 = arith.mulf %37, %36 : vector<8x32xf32>
    %cst_15 = arith.constant 1.000000e+00 : f32
    %39 = vector.broadcast %cst_15 : f32 to vector<8x32xf32>
    %40 = arith.subf %38, %39 : vector<8x32xf32>
    %41 = vector.extract_strided_slice %33 {offsets = [0, 96], sizes = [8, 32], strides = [1, 1]} : vector<8x128xf32> to vector<8x32xf32>
    %42 = arith.mulf %35, %22 : vector<8x32xf32>
    %43 = arith.mulf %34, %40 : vector<8x32xf32>
    %44 = arith.addf %42, %43 : vector<8x32xf32>
    %45 = math.tanh %44 : vector<8x32xf32>
    %46 = arith.mulf %41, %45 : vector<8x32xf32>
    %47 = tpu.concatenate %46, %21 in 1 : vector<8x32xf32>, vector<8x32xf32> -> vector<8x64xf32>
    %cst_16 = arith.constant dense<0.000000e+00> : vector<8x128xf32>
    %48 = tpu.matmul %47, %1, %cst_16 {dimension_numbers = #tpu.dot_dimension_numbers<[1], [0], [0], [1], [0, 0, 1, 1], [], []>} : vector<8x64xf32>, vector<64x128xf32>, vector<8x128xf32> -> vector<8x128xf32>
    %49 = arith.addf %48, %10 : vector<8x128xf32>
    %50 = arith.negf %49 : vector<8x128xf32>
    %51 = math.exp %50 : vector<8x128xf32>
    %cst_17 = arith.constant 1.000000e+00 : f32
    %52 = vector.broadcast %cst_17 : f32 to vector<8x128xf32>
    %53 = arith.addf %52, %51 : vector<8x128xf32>
    %54 = arith.divf %52, %53 : vector<8x128xf32>
    %55 = vector.extract_strided_slice %54 {offsets = [0, 0], sizes = [8, 32], strides = [1, 1]} : vector<8x128xf32> to vector<8x32xf32>
    %56 = vector.extract_strided_slice %54 {offsets = [0, 32], sizes = [8, 32], strides = [1, 1]} : vector<8x128xf32> to vector<8x32xf32>
    %57 = vector.extract_strided_slice %54 {offsets = [0, 64], sizes = [8, 32], strides = [1, 1]} : vector<8x128xf32> to vector<8x32xf32>
    %cst_18 = arith.constant 2.000000e+00 : f32
    %58 = vector.broadcast %cst_18 : f32 to vector<8x32xf32>
    %59 = arith.mulf %58, %57 : vector<8x32xf32>
    %cst_19 = arith.constant 1.000000e+00 : f32
    %60 = vector.broadcast %cst_19 : f32 to vector<8x32xf32>
    %61 = arith.subf %59, %60 : vector<8x32xf32>
    %62 = vector.extract_strided_slice %54 {offsets = [0, 96], sizes = [8, 32], strides = [1, 1]} : vector<8x128xf32> to vector<8x32xf32>
    %63 = arith.mulf %56, %23 : vector<8x32xf32>
    %64 = arith.mulf %55, %61 : vector<8x32xf32>
    %65 = arith.addf %63, %64 : vector<8x32xf32>
    %66 = math.tanh %65 : vector<8x32xf32>
    %67 = arith.mulf %62, %66 : vector<8x32xf32>
    %c0_20 = arith.constant 0 : index
    %c1 = arith.constant 1 : index
    %c0_21 = arith.constant 0 : index
    %68 = vector.load %arg1[%c0_20, %c1, %c0_21] : memref<8x8x8xf32, #tpu.memory_space<vmem>>, vector<8x1x8xf32>
    %69 = vector.shape_cast %68 : vector<8x1x8xf32> to vector<8x8xf32>
    %70 = tpu.concatenate %69, %46 in 1 : vector<8x8xf32>, vector<8x32xf32> -> vector<8x40xf32>
    %cst_22 = arith.constant dense<0.000000e+00> : vector<8x128xf32>
    %71 = tpu.matmul %70, %0, %cst_22 {dimension_numbers = #tpu.dot_dimension_numbers<[1], [0], [0], [1], [0, 0, 1, 1], [], []>} : vector<8x40xf32>, vector<40x128xf32>, vector<8x128xf32> -> vector<8x128xf32>
    %72 = arith.addf %71, %7 : vector<8x128xf32>
    %73 = arith.negf %72 : vector<8x128xf32>
    %74 = math.exp %73 : vector<8x128xf32>
    %cst_23 = arith.constant 1.000000e+00 : f32
    %75 = vector.broadcast %cst_23 : f32 to vector<8x128xf32>
    %76 = arith.addf %75, %74 : vector<8x128xf32>
    %77 = arith.divf %75, %76 : vector<8x128xf32>
    %78 = vector.extract_strided_slice %77 {offsets = [0, 0], sizes = [8, 32], strides = [1, 1]} : vector<8x128xf32> to vector<8x32xf32>
    %79 = vector.extract_strided_slice %77 {offsets = [0, 32], sizes = [8, 32], strides = [1, 1]} : vector<8x128xf32> to vector<8x32xf32>
    %80 = vector.extract_strided_slice %77 {offsets = [0, 64], sizes = [8, 32], strides = [1, 1]} : vector<8x128xf32> to vector<8x32xf32>
    %cst_24 = arith.constant 2.000000e+00 : f32
    %81 = vector.broadcast %cst_24 : f32 to vector<8x32xf32>
    %82 = arith.mulf %81, %80 : vector<8x32xf32>
    %cst_25 = arith.constant 1.000000e+00 : f32
    %83 = vector.broadcast %cst_25 : f32 to vector<8x32xf32>
    %84 = arith.subf %82, %83 : vector<8x32xf32>
    %85 = vector.extract_strided_slice %77 {offsets = [0, 96], sizes = [8, 32], strides = [1, 1]} : vector<8x128xf32> to vector<8x32xf32>
    %86 = arith.mulf %79, %44 : vector<8x32xf32>
    %87 = arith.mulf %78, %84 : vector<8x32xf32>
    %88 = arith.addf %86, %87 : vector<8x32xf32>
    %89 = math.tanh %88 : vector<8x32xf32>
    %90 = arith.mulf %85, %89 : vector<8x32xf32>
    %91 = tpu.concatenate %90, %67 in 1 : vector<8x32xf32>, vector<8x32xf32> -> vector<8x64xf32>
    %cst_26 = arith.constant dense<0.000000e+00> : vector<8x128xf32>
    %92 = tpu.matmul %91, %1, %cst_26 {dimension_numbers = #tpu.dot_dimension_numbers<[1], [0], [0], [1], [0, 0, 1, 1], [], []>} : vector<8x64xf32>, vector<64x128xf32>, vector<8x128xf32> -> vector<8x128xf32>
    %93 = arith.addf %92, %10 : vector<8x128xf32>
    %94 = arith.negf %93 : vector<8x128xf32>
    %95 = math.exp %94 : vector<8x128xf32>
    %cst_27 = arith.constant 1.000000e+00 : f32
    %96 = vector.broadcast %cst_27 : f32 to vector<8x128xf32>
    %97 = arith.addf %96, %95 : vector<8x128xf32>
    %98 = arith.divf %96, %97 : vector<8x128xf32>
    %99 = vector.extract_strided_slice %98 {offsets = [0, 0], sizes = [8, 32], strides = [1, 1]} : vector<8x128xf32> to vector<8x32xf32>
    %100 = vector.extract_strided_slice %98 {offsets = [0, 32], sizes = [8, 32], strides = [1, 1]} : vector<8x128xf32> to vector<8x32xf32>
    %101 = vector.extract_strided_slice %98 {offsets = [0, 64], sizes = [8, 32], strides = [1, 1]} : vector<8x128xf32> to vector<8x32xf32>
    %cst_28 = arith.constant 2.000000e+00 : f32
    %102 = vector.broadcast %cst_28 : f32 to vector<8x32xf32>
    %103 = arith.mulf %102, %101 : vector<8x32xf32>
    %cst_29 = arith.constant 1.000000e+00 : f32
    %104 = vector.broadcast %cst_29 : f32 to vector<8x32xf32>
    %105 = arith.subf %103, %104 : vector<8x32xf32>
    %106 = vector.extract_strided_slice %98 {offsets = [0, 96], sizes = [8, 32], strides = [1, 1]} : vector<8x128xf32> to vector<8x32xf32>
    %107 = arith.mulf %100, %65 : vector<8x32xf32>
    %108 = arith.mulf %99, %105 : vector<8x32xf32>
    %109 = arith.addf %107, %108 : vector<8x32xf32>
    %110 = math.tanh %109 : vector<8x32xf32>
    %111 = arith.mulf %106, %110 : vector<8x32xf32>
    %c0_30 = arith.constant 0 : index
    %c2 = arith.constant 2 : index
    %c0_31 = arith.constant 0 : index
    %112 = vector.load %arg1[%c0_30, %c2, %c0_31] : memref<8x8x8xf32, #tpu.memory_space<vmem>>, vector<8x1x8xf32>
    %113 = vector.shape_cast %112 : vector<8x1x8xf32> to vector<8x8xf32>
    %114 = tpu.concatenate %113, %90 in 1 : vector<8x8xf32>, vector<8x32xf32> -> vector<8x40xf32>
    %cst_32 = arith.constant dense<0.000000e+00> : vector<8x128xf32>
    %115 = tpu.matmul %114, %0, %cst_32 {dimension_numbers = #tpu.dot_dimension_numbers<[1], [0], [0], [1], [0, 0, 1, 1], [], []>} : vector<8x40xf32>, vector<40x128xf32>, vector<8x128xf32> -> vector<8x128xf32>
    %116 = arith.addf %115, %7 : vector<8x128xf32>
    %117 = arith.negf %116 : vector<8x128xf32>
    %118 = math.exp %117 : vector<8x128xf32>
    %cst_33 = arith.constant 1.000000e+00 : f32
    %119 = vector.broadcast %cst_33 : f32 to vector<8x128xf32>
    %120 = arith.addf %119, %118 : vector<8x128xf32>
    %121 = arith.divf %119, %120 : vector<8x128xf32>
    %122 = vector.extract_strided_slice %121 {offsets = [0, 0], sizes = [8, 32], strides = [1, 1]} : vector<8x128xf32> to vector<8x32xf32>
    %123 = vector.extract_strided_slice %121 {offsets = [0, 32], sizes = [8, 32], strides = [1, 1]} : vector<8x128xf32> to vector<8x32xf32>
    %124 = vector.extract_strided_slice %121 {offsets = [0, 64], sizes = [8, 32], strides = [1, 1]} : vector<8x128xf32> to vector<8x32xf32>
    %cst_34 = arith.constant 2.000000e+00 : f32
    %125 = vector.broadcast %cst_34 : f32 to vector<8x32xf32>
    %126 = arith.mulf %125, %124 : vector<8x32xf32>
    %cst_35 = arith.constant 1.000000e+00 : f32
    %127 = vector.broadcast %cst_35 : f32 to vector<8x32xf32>
    %128 = arith.subf %126, %127 : vector<8x32xf32>
    %129 = vector.extract_strided_slice %121 {offsets = [0, 96], sizes = [8, 32], strides = [1, 1]} : vector<8x128xf32> to vector<8x32xf32>
    %130 = arith.mulf %123, %88 : vector<8x32xf32>
    %131 = arith.mulf %122, %128 : vector<8x32xf32>
    %132 = arith.addf %130, %131 : vector<8x32xf32>
    %133 = math.tanh %132 : vector<8x32xf32>
    %134 = arith.mulf %129, %133 : vector<8x32xf32>
    %135 = tpu.concatenate %134, %111 in 1 : vector<8x32xf32>, vector<8x32xf32> -> vector<8x64xf32>
    %cst_36 = arith.constant dense<0.000000e+00> : vector<8x128xf32>
    %136 = tpu.matmul %135, %1, %cst_36 {dimension_numbers = #tpu.dot_dimension_numbers<[1], [0], [0], [1], [0, 0, 1, 1], [], []>} : vector<8x64xf32>, vector<64x128xf32>, vector<8x128xf32> -> vector<8x128xf32>
    %137 = arith.addf %136, %10 : vector<8x128xf32>
    %138 = arith.negf %137 : vector<8x128xf32>
    %139 = math.exp %138 : vector<8x128xf32>
    %cst_37 = arith.constant 1.000000e+00 : f32
    %140 = vector.broadcast %cst_37 : f32 to vector<8x128xf32>
    %141 = arith.addf %140, %139 : vector<8x128xf32>
    %142 = arith.divf %140, %141 : vector<8x128xf32>
    %143 = vector.extract_strided_slice %142 {offsets = [0, 0], sizes = [8, 32], strides = [1, 1]} : vector<8x128xf32> to vector<8x32xf32>
    %144 = vector.extract_strided_slice %142 {offsets = [0, 32], sizes = [8, 32], strides = [1, 1]} : vector<8x128xf32> to vector<8x32xf32>
    %145 = vector.extract_strided_slice %142 {offsets = [0, 64], sizes = [8, 32], strides = [1, 1]} : vector<8x128xf32> to vector<8x32xf32>
    %cst_38 = arith.constant 2.000000e+00 : f32
    %146 = vector.broadcast %cst_38 : f32 to vector<8x32xf32>
    %147 = arith.mulf %146, %145 : vector<8x32xf32>
    %cst_39 = arith.constant 1.000000e+00 : f32
    %148 = vector.broadcast %cst_39 : f32 to vector<8x32xf32>
    %149 = arith.subf %147, %148 : vector<8x32xf32>
    %150 = vector.extract_strided_slice %142 {offsets = [0, 96], sizes = [8, 32], strides = [1, 1]} : vector<8x128xf32> to vector<8x32xf32>
    %151 = arith.mulf %144, %109 : vector<8x32xf32>
    %152 = arith.mulf %143, %149 : vector<8x32xf32>
    %153 = arith.addf %151, %152 : vector<8x32xf32>
    %154 = math.tanh %153 : vector<8x32xf32>
    %155 = arith.mulf %150, %154 : vector<8x32xf32>
    %c0_40 = arith.constant 0 : index
    %c3 = arith.constant 3 : index
    %c0_41 = arith.constant 0 : index
    %156 = vector.load %arg1[%c0_40, %c3, %c0_41] : memref<8x8x8xf32, #tpu.memory_space<vmem>>, vector<8x1x8xf32>
    %157 = vector.shape_cast %156 : vector<8x1x8xf32> to vector<8x8xf32>
    %158 = tpu.concatenate %157, %134 in 1 : vector<8x8xf32>, vector<8x32xf32> -> vector<8x40xf32>
    %cst_42 = arith.constant dense<0.000000e+00> : vector<8x128xf32>
    %159 = tpu.matmul %158, %0, %cst_42 {dimension_numbers = #tpu.dot_dimension_numbers<[1], [0], [0], [1], [0, 0, 1, 1], [], []>} : vector<8x40xf32>, vector<40x128xf32>, vector<8x128xf32> -> vector<8x128xf32>
    %160 = arith.addf %159, %7 : vector<8x128xf32>
    %161 = arith.negf %160 : vector<8x128xf32>
    %162 = math.exp %161 : vector<8x128xf32>
    %cst_43 = arith.constant 1.000000e+00 : f32
    %163 = vector.broadcast %cst_43 : f32 to vector<8x128xf32>
    %164 = arith.addf %163, %162 : vector<8x128xf32>
    %165 = arith.divf %163, %164 : vector<8x128xf32>
    %166 = vector.extract_strided_slice %165 {offsets = [0, 0], sizes = [8, 32], strides = [1, 1]} : vector<8x128xf32> to vector<8x32xf32>
    %167 = vector.extract_strided_slice %165 {offsets = [0, 32], sizes = [8, 32], strides = [1, 1]} : vector<8x128xf32> to vector<8x32xf32>
    %168 = vector.extract_strided_slice %165 {offsets = [0, 64], sizes = [8, 32], strides = [1, 1]} : vector<8x128xf32> to vector<8x32xf32>
    %cst_44 = arith.constant 2.000000e+00 : f32
    %169 = vector.broadcast %cst_44 : f32 to vector<8x32xf32>
    %170 = arith.mulf %169, %168 : vector<8x32xf32>
    %cst_45 = arith.constant 1.000000e+00 : f32
    %171 = vector.broadcast %cst_45 : f32 to vector<8x32xf32>
    %172 = arith.subf %170, %171 : vector<8x32xf32>
    %173 = vector.extract_strided_slice %165 {offsets = [0, 96], sizes = [8, 32], strides = [1, 1]} : vector<8x128xf32> to vector<8x32xf32>
    %174 = arith.mulf %167, %132 : vector<8x32xf32>
    %175 = arith.mulf %166, %172 : vector<8x32xf32>
    %176 = arith.addf %174, %175 : vector<8x32xf32>
    %177 = math.tanh %176 : vector<8x32xf32>
    %178 = arith.mulf %173, %177 : vector<8x32xf32>
    %179 = tpu.concatenate %178, %155 in 1 : vector<8x32xf32>, vector<8x32xf32> -> vector<8x64xf32>
    %cst_46 = arith.constant dense<0.000000e+00> : vector<8x128xf32>
    %180 = tpu.matmul %179, %1, %cst_46 {dimension_numbers = #tpu.dot_dimension_numbers<[1], [0], [0], [1], [0, 0, 1, 1], [], []>} : vector<8x64xf32>, vector<64x128xf32>, vector<8x128xf32> -> vector<8x128xf32>
    %181 = arith.addf %180, %10 : vector<8x128xf32>
    %182 = arith.negf %181 : vector<8x128xf32>
    %183 = math.exp %182 : vector<8x128xf32>
    %cst_47 = arith.constant 1.000000e+00 : f32
    %184 = vector.broadcast %cst_47 : f32 to vector<8x128xf32>
    %185 = arith.addf %184, %183 : vector<8x128xf32>
    %186 = arith.divf %184, %185 : vector<8x128xf32>
    %187 = vector.extract_strided_slice %186 {offsets = [0, 0], sizes = [8, 32], strides = [1, 1]} : vector<8x128xf32> to vector<8x32xf32>
    %188 = vector.extract_strided_slice %186 {offsets = [0, 32], sizes = [8, 32], strides = [1, 1]} : vector<8x128xf32> to vector<8x32xf32>
    %189 = vector.extract_strided_slice %186 {offsets = [0, 64], sizes = [8, 32], strides = [1, 1]} : vector<8x128xf32> to vector<8x32xf32>
    %cst_48 = arith.constant 2.000000e+00 : f32
    %190 = vector.broadcast %cst_48 : f32 to vector<8x32xf32>
    %191 = arith.mulf %190, %189 : vector<8x32xf32>
    %cst_49 = arith.constant 1.000000e+00 : f32
    %192 = vector.broadcast %cst_49 : f32 to vector<8x32xf32>
    %193 = arith.subf %191, %192 : vector<8x32xf32>
    %194 = vector.extract_strided_slice %186 {offsets = [0, 96], sizes = [8, 32], strides = [1, 1]} : vector<8x128xf32> to vector<8x32xf32>
    %195 = arith.mulf %188, %153 : vector<8x32xf32>
    %196 = arith.mulf %187, %193 : vector<8x32xf32>
    %197 = arith.addf %195, %196 : vector<8x32xf32>
    %198 = math.tanh %197 : vector<8x32xf32>
    %199 = arith.mulf %194, %198 : vector<8x32xf32>
    %c0_50 = arith.constant 0 : index
    %c4 = arith.constant 4 : index
    %c0_51 = arith.constant 0 : index
    %200 = vector.load %arg1[%c0_50, %c4, %c0_51] : memref<8x8x8xf32, #tpu.memory_space<vmem>>, vector<8x1x8xf32>
    %201 = vector.shape_cast %200 : vector<8x1x8xf32> to vector<8x8xf32>
    %202 = tpu.concatenate %201, %178 in 1 : vector<8x8xf32>, vector<8x32xf32> -> vector<8x40xf32>
    %cst_52 = arith.constant dense<0.000000e+00> : vector<8x128xf32>
    %203 = tpu.matmul %202, %0, %cst_52 {dimension_numbers = #tpu.dot_dimension_numbers<[1], [0], [0], [1], [0, 0, 1, 1], [], []>} : vector<8x40xf32>, vector<40x128xf32>, vector<8x128xf32> -> vector<8x128xf32>
    %204 = arith.addf %203, %7 : vector<8x128xf32>
    %205 = arith.negf %204 : vector<8x128xf32>
    %206 = math.exp %205 : vector<8x128xf32>
    %cst_53 = arith.constant 1.000000e+00 : f32
    %207 = vector.broadcast %cst_53 : f32 to vector<8x128xf32>
    %208 = arith.addf %207, %206 : vector<8x128xf32>
    %209 = arith.divf %207, %208 : vector<8x128xf32>
    %210 = vector.extract_strided_slice %209 {offsets = [0, 0], sizes = [8, 32], strides = [1, 1]} : vector<8x128xf32> to vector<8x32xf32>
    %211 = vector.extract_strided_slice %209 {offsets = [0, 32], sizes = [8, 32], strides = [1, 1]} : vector<8x128xf32> to vector<8x32xf32>
    %212 = vector.extract_strided_slice %209 {offsets = [0, 64], sizes = [8, 32], strides = [1, 1]} : vector<8x128xf32> to vector<8x32xf32>
    %cst_54 = arith.constant 2.000000e+00 : f32
    %213 = vector.broadcast %cst_54 : f32 to vector<8x32xf32>
    %214 = arith.mulf %213, %212 : vector<8x32xf32>
    %cst_55 = arith.constant 1.000000e+00 : f32
    %215 = vector.broadcast %cst_55 : f32 to vector<8x32xf32>
    %216 = arith.subf %214, %215 : vector<8x32xf32>
    %217 = vector.extract_strided_slice %209 {offsets = [0, 96], sizes = [8, 32], strides = [1, 1]} : vector<8x128xf32> to vector<8x32xf32>
    %218 = arith.mulf %211, %176 : vector<8x32xf32>
    %219 = arith.mulf %210, %216 : vector<8x32xf32>
    %220 = arith.addf %218, %219 : vector<8x32xf32>
    %221 = math.tanh %220 : vector<8x32xf32>
    %222 = arith.mulf %217, %221 : vector<8x32xf32>
    %223 = tpu.concatenate %222, %199 in 1 : vector<8x32xf32>, vector<8x32xf32> -> vector<8x64xf32>
    %cst_56 = arith.constant dense<0.000000e+00> : vector<8x128xf32>
    %224 = tpu.matmul %223, %1, %cst_56 {dimension_numbers = #tpu.dot_dimension_numbers<[1], [0], [0], [1], [0, 0, 1, 1], [], []>} : vector<8x64xf32>, vector<64x128xf32>, vector<8x128xf32> -> vector<8x128xf32>
    %225 = arith.addf %224, %10 : vector<8x128xf32>
    %226 = arith.negf %225 : vector<8x128xf32>
    %227 = math.exp %226 : vector<8x128xf32>
    %cst_57 = arith.constant 1.000000e+00 : f32
    %228 = vector.broadcast %cst_57 : f32 to vector<8x128xf32>
    %229 = arith.addf %228, %227 : vector<8x128xf32>
    %230 = arith.divf %228, %229 : vector<8x128xf32>
    %231 = vector.extract_strided_slice %230 {offsets = [0, 0], sizes = [8, 32], strides = [1, 1]} : vector<8x128xf32> to vector<8x32xf32>
    %232 = vector.extract_strided_slice %230 {offsets = [0, 32], sizes = [8, 32], strides = [1, 1]} : vector<8x128xf32> to vector<8x32xf32>
    %233 = vector.extract_strided_slice %230 {offsets = [0, 64], sizes = [8, 32], strides = [1, 1]} : vector<8x128xf32> to vector<8x32xf32>
    %cst_58 = arith.constant 2.000000e+00 : f32
    %234 = vector.broadcast %cst_58 : f32 to vector<8x32xf32>
    %235 = arith.mulf %234, %233 : vector<8x32xf32>
    %cst_59 = arith.constant 1.000000e+00 : f32
    %236 = vector.broadcast %cst_59 : f32 to vector<8x32xf32>
    %237 = arith.subf %235, %236 : vector<8x32xf32>
    %238 = vector.extract_strided_slice %230 {offsets = [0, 96], sizes = [8, 32], strides = [1, 1]} : vector<8x128xf32> to vector<8x32xf32>
    %239 = arith.mulf %232, %197 : vector<8x32xf32>
    %240 = arith.mulf %231, %237 : vector<8x32xf32>
    %241 = arith.addf %239, %240 : vector<8x32xf32>
    %242 = math.tanh %241 : vector<8x32xf32>
    %243 = arith.mulf %238, %242 : vector<8x32xf32>
    %c0_60 = arith.constant 0 : index
    %c5 = arith.constant 5 : index
    %c0_61 = arith.constant 0 : index
    %244 = vector.load %arg1[%c0_60, %c5, %c0_61] : memref<8x8x8xf32, #tpu.memory_space<vmem>>, vector<8x1x8xf32>
    %245 = vector.shape_cast %244 : vector<8x1x8xf32> to vector<8x8xf32>
    %246 = tpu.concatenate %245, %222 in 1 : vector<8x8xf32>, vector<8x32xf32> -> vector<8x40xf32>
    %cst_62 = arith.constant dense<0.000000e+00> : vector<8x128xf32>
    %247 = tpu.matmul %246, %0, %cst_62 {dimension_numbers = #tpu.dot_dimension_numbers<[1], [0], [0], [1], [0, 0, 1, 1], [], []>} : vector<8x40xf32>, vector<40x128xf32>, vector<8x128xf32> -> vector<8x128xf32>
    %248 = arith.addf %247, %7 : vector<8x128xf32>
    %249 = arith.negf %248 : vector<8x128xf32>
    %250 = math.exp %249 : vector<8x128xf32>
    %cst_63 = arith.constant 1.000000e+00 : f32
    %251 = vector.broadcast %cst_63 : f32 to vector<8x128xf32>
    %252 = arith.addf %251, %250 : vector<8x128xf32>
    %253 = arith.divf %251, %252 : vector<8x128xf32>
    %254 = vector.extract_strided_slice %253 {offsets = [0, 0], sizes = [8, 32], strides = [1, 1]} : vector<8x128xf32> to vector<8x32xf32>
    %255 = vector.extract_strided_slice %253 {offsets = [0, 32], sizes = [8, 32], strides = [1, 1]} : vector<8x128xf32> to vector<8x32xf32>
    %256 = vector.extract_strided_slice %253 {offsets = [0, 64], sizes = [8, 32], strides = [1, 1]} : vector<8x128xf32> to vector<8x32xf32>
    %cst_64 = arith.constant 2.000000e+00 : f32
    %257 = vector.broadcast %cst_64 : f32 to vector<8x32xf32>
    %258 = arith.mulf %257, %256 : vector<8x32xf32>
    %cst_65 = arith.constant 1.000000e+00 : f32
    %259 = vector.broadcast %cst_65 : f32 to vector<8x32xf32>
    %260 = arith.subf %258, %259 : vector<8x32xf32>
    %261 = vector.extract_strided_slice %253 {offsets = [0, 96], sizes = [8, 32], strides = [1, 1]} : vector<8x128xf32> to vector<8x32xf32>
    %262 = arith.mulf %255, %220 : vector<8x32xf32>
    %263 = arith.mulf %254, %260 : vector<8x32xf32>
    %264 = arith.addf %262, %263 : vector<8x32xf32>
    %265 = math.tanh %264 : vector<8x32xf32>
    %266 = arith.mulf %261, %265 : vector<8x32xf32>
    %267 = tpu.concatenate %266, %243 in 1 : vector<8x32xf32>, vector<8x32xf32> -> vector<8x64xf32>
    %cst_66 = arith.constant dense<0.000000e+00> : vector<8x128xf32>
    %268 = tpu.matmul %267, %1, %cst_66 {dimension_numbers = #tpu.dot_dimension_numbers<[1], [0], [0], [1], [0, 0, 1, 1], [], []>} : vector<8x64xf32>, vector<64x128xf32>, vector<8x128xf32> -> vector<8x128xf32>
    %269 = arith.addf %268, %10 : vector<8x128xf32>
    %270 = arith.negf %269 : vector<8x128xf32>
    %271 = math.exp %270 : vector<8x128xf32>
    %cst_67 = arith.constant 1.000000e+00 : f32
    %272 = vector.broadcast %cst_67 : f32 to vector<8x128xf32>
    %273 = arith.addf %272, %271 : vector<8x128xf32>
    %274 = arith.divf %272, %273 : vector<8x128xf32>
    %275 = vector.extract_strided_slice %274 {offsets = [0, 0], sizes = [8, 32], strides = [1, 1]} : vector<8x128xf32> to vector<8x32xf32>
    %276 = vector.extract_strided_slice %274 {offsets = [0, 32], sizes = [8, 32], strides = [1, 1]} : vector<8x128xf32> to vector<8x32xf32>
    %277 = vector.extract_strided_slice %274 {offsets = [0, 64], sizes = [8, 32], strides = [1, 1]} : vector<8x128xf32> to vector<8x32xf32>
    %cst_68 = arith.constant 2.000000e+00 : f32
    %278 = vector.broadcast %cst_68 : f32 to vector<8x32xf32>
    %279 = arith.mulf %278, %277 : vector<8x32xf32>
    %cst_69 = arith.constant 1.000000e+00 : f32
    %280 = vector.broadcast %cst_69 : f32 to vector<8x32xf32>
    %281 = arith.subf %279, %280 : vector<8x32xf32>
    %282 = vector.extract_strided_slice %274 {offsets = [0, 96], sizes = [8, 32], strides = [1, 1]} : vector<8x128xf32> to vector<8x32xf32>
    %283 = arith.mulf %276, %241 : vector<8x32xf32>
    %284 = arith.mulf %275, %281 : vector<8x32xf32>
    %285 = arith.addf %283, %284 : vector<8x32xf32>
    %286 = math.tanh %285 : vector<8x32xf32>
    %287 = arith.mulf %282, %286 : vector<8x32xf32>
    %c0_70 = arith.constant 0 : index
    %c6 = arith.constant 6 : index
    %c0_71 = arith.constant 0 : index
    %288 = vector.load %arg1[%c0_70, %c6, %c0_71] : memref<8x8x8xf32, #tpu.memory_space<vmem>>, vector<8x1x8xf32>
    %289 = vector.shape_cast %288 : vector<8x1x8xf32> to vector<8x8xf32>
    %290 = tpu.concatenate %289, %266 in 1 : vector<8x8xf32>, vector<8x32xf32> -> vector<8x40xf32>
    %cst_72 = arith.constant dense<0.000000e+00> : vector<8x128xf32>
    %291 = tpu.matmul %290, %0, %cst_72 {dimension_numbers = #tpu.dot_dimension_numbers<[1], [0], [0], [1], [0, 0, 1, 1], [], []>} : vector<8x40xf32>, vector<40x128xf32>, vector<8x128xf32> -> vector<8x128xf32>
    %292 = arith.addf %291, %7 : vector<8x128xf32>
    %293 = arith.negf %292 : vector<8x128xf32>
    %294 = math.exp %293 : vector<8x128xf32>
    %cst_73 = arith.constant 1.000000e+00 : f32
    %295 = vector.broadcast %cst_73 : f32 to vector<8x128xf32>
    %296 = arith.addf %295, %294 : vector<8x128xf32>
    %297 = arith.divf %295, %296 : vector<8x128xf32>
    %298 = vector.extract_strided_slice %297 {offsets = [0, 0], sizes = [8, 32], strides = [1, 1]} : vector<8x128xf32> to vector<8x32xf32>
    %299 = vector.extract_strided_slice %297 {offsets = [0, 32], sizes = [8, 32], strides = [1, 1]} : vector<8x128xf32> to vector<8x32xf32>
    %300 = vector.extract_strided_slice %297 {offsets = [0, 64], sizes = [8, 32], strides = [1, 1]} : vector<8x128xf32> to vector<8x32xf32>
    %cst_74 = arith.constant 2.000000e+00 : f32
    %301 = vector.broadcast %cst_74 : f32 to vector<8x32xf32>
    %302 = arith.mulf %301, %300 : vector<8x32xf32>
    %cst_75 = arith.constant 1.000000e+00 : f32
    %303 = vector.broadcast %cst_75 : f32 to vector<8x32xf32>
    %304 = arith.subf %302, %303 : vector<8x32xf32>
    %305 = vector.extract_strided_slice %297 {offsets = [0, 96], sizes = [8, 32], strides = [1, 1]} : vector<8x128xf32> to vector<8x32xf32>
    %306 = arith.mulf %299, %264 : vector<8x32xf32>
    %307 = arith.mulf %298, %304 : vector<8x32xf32>
    %308 = arith.addf %306, %307 : vector<8x32xf32>
    %309 = math.tanh %308 : vector<8x32xf32>
    %310 = arith.mulf %305, %309 : vector<8x32xf32>
    %311 = tpu.concatenate %310, %287 in 1 : vector<8x32xf32>, vector<8x32xf32> -> vector<8x64xf32>
    %cst_76 = arith.constant dense<0.000000e+00> : vector<8x128xf32>
    %312 = tpu.matmul %311, %1, %cst_76 {dimension_numbers = #tpu.dot_dimension_numbers<[1], [0], [0], [1], [0, 0, 1, 1], [], []>} : vector<8x64xf32>, vector<64x128xf32>, vector<8x128xf32> -> vector<8x128xf32>
    %313 = arith.addf %312, %10 : vector<8x128xf32>
    %314 = arith.negf %313 : vector<8x128xf32>
    %315 = math.exp %314 : vector<8x128xf32>
    %cst_77 = arith.constant 1.000000e+00 : f32
    %316 = vector.broadcast %cst_77 : f32 to vector<8x128xf32>
    %317 = arith.addf %316, %315 : vector<8x128xf32>
    %318 = arith.divf %316, %317 : vector<8x128xf32>
    %319 = vector.extract_strided_slice %318 {offsets = [0, 0], sizes = [8, 32], strides = [1, 1]} : vector<8x128xf32> to vector<8x32xf32>
    %320 = vector.extract_strided_slice %318 {offsets = [0, 32], sizes = [8, 32], strides = [1, 1]} : vector<8x128xf32> to vector<8x32xf32>
    %321 = vector.extract_strided_slice %318 {offsets = [0, 64], sizes = [8, 32], strides = [1, 1]} : vector<8x128xf32> to vector<8x32xf32>
    %cst_78 = arith.constant 2.000000e+00 : f32
    %322 = vector.broadcast %cst_78 : f32 to vector<8x32xf32>
    %323 = arith.mulf %322, %321 : vector<8x32xf32>
    %cst_79 = arith.constant 1.000000e+00 : f32
    %324 = vector.broadcast %cst_79 : f32 to vector<8x32xf32>
    %325 = arith.subf %323, %324 : vector<8x32xf32>
    %326 = vector.extract_strided_slice %318 {offsets = [0, 96], sizes = [8, 32], strides = [1, 1]} : vector<8x128xf32> to vector<8x32xf32>
    %327 = arith.mulf %320, %285 : vector<8x32xf32>
    %328 = arith.mulf %319, %325 : vector<8x32xf32>
    %329 = arith.addf %327, %328 : vector<8x32xf32>
    %330 = math.tanh %329 : vector<8x32xf32>
    %331 = arith.mulf %326, %330 : vector<8x32xf32>
    %c0_80 = arith.constant 0 : index
    %c7 = arith.constant 7 : index
    %c0_81 = arith.constant 0 : index
    %332 = vector.load %arg1[%c0_80, %c7, %c0_81] : memref<8x8x8xf32, #tpu.memory_space<vmem>>, vector<8x1x8xf32>
    %333 = vector.shape_cast %332 : vector<8x1x8xf32> to vector<8x8xf32>
    %334 = tpu.concatenate %333, %310 in 1 : vector<8x8xf32>, vector<8x32xf32> -> vector<8x40xf32>
    %cst_82 = arith.constant dense<0.000000e+00> : vector<8x128xf32>
    %335 = tpu.matmul %334, %0, %cst_82 {dimension_numbers = #tpu.dot_dimension_numbers<[1], [0], [0], [1], [0, 0, 1, 1], [], []>} : vector<8x40xf32>, vector<40x128xf32>, vector<8x128xf32> -> vector<8x128xf32>
    %336 = arith.addf %335, %7 : vector<8x128xf32>
    %337 = arith.negf %336 : vector<8x128xf32>
    %338 = math.exp %337 : vector<8x128xf32>
    %cst_83 = arith.constant 1.000000e+00 : f32
    %339 = vector.broadcast %cst_83 : f32 to vector<8x128xf32>
    %340 = arith.addf %339, %338 : vector<8x128xf32>
    %341 = arith.divf %339, %340 : vector<8x128xf32>
    %342 = vector.extract_strided_slice %341 {offsets = [0, 0], sizes = [8, 32], strides = [1, 1]} : vector<8x128xf32> to vector<8x32xf32>
    %343 = vector.extract_strided_slice %341 {offsets = [0, 32], sizes = [8, 32], strides = [1, 1]} : vector<8x128xf32> to vector<8x32xf32>
    %344 = vector.extract_strided_slice %341 {offsets = [0, 64], sizes = [8, 32], strides = [1, 1]} : vector<8x128xf32> to vector<8x32xf32>
    %cst_84 = arith.constant 2.000000e+00 : f32
    %345 = vector.broadcast %cst_84 : f32 to vector<8x32xf32>
    %346 = arith.mulf %345, %344 : vector<8x32xf32>
    %cst_85 = arith.constant 1.000000e+00 : f32
    %347 = vector.broadcast %cst_85 : f32 to vector<8x32xf32>
    %348 = arith.subf %346, %347 : vector<8x32xf32>
    %349 = vector.extract_strided_slice %341 {offsets = [0, 96], sizes = [8, 32], strides = [1, 1]} : vector<8x128xf32> to vector<8x32xf32>
    %350 = arith.mulf %343, %308 : vector<8x32xf32>
    %351 = arith.mulf %342, %348 : vector<8x32xf32>
    %352 = arith.addf %350, %351 : vector<8x32xf32>
    %353 = math.tanh %352 : vector<8x32xf32>
    %354 = arith.mulf %349, %353 : vector<8x32xf32>
    %355 = tpu.concatenate %354, %331 in 1 : vector<8x32xf32>, vector<8x32xf32> -> vector<8x64xf32>
    %cst_86 = arith.constant dense<0.000000e+00> : vector<8x128xf32>
    %356 = tpu.matmul %355, %1, %cst_86 {dimension_numbers = #tpu.dot_dimension_numbers<[1], [0], [0], [1], [0, 0, 1, 1], [], []>} : vector<8x64xf32>, vector<64x128xf32>, vector<8x128xf32> -> vector<8x128xf32>
    %357 = arith.addf %356, %10 : vector<8x128xf32>
    %358 = arith.negf %357 : vector<8x128xf32>
    %359 = math.exp %358 : vector<8x128xf32>
    %cst_87 = arith.constant 1.000000e+00 : f32
    %360 = vector.broadcast %cst_87 : f32 to vector<8x128xf32>
    %361 = arith.addf %360, %359 : vector<8x128xf32>
    %362 = arith.divf %360, %361 : vector<8x128xf32>
    %363 = vector.extract_strided_slice %362 {offsets = [0, 0], sizes = [8, 32], strides = [1, 1]} : vector<8x128xf32> to vector<8x32xf32>
    %364 = vector.extract_strided_slice %362 {offsets = [0, 32], sizes = [8, 32], strides = [1, 1]} : vector<8x128xf32> to vector<8x32xf32>
    %365 = vector.extract_strided_slice %362 {offsets = [0, 64], sizes = [8, 32], strides = [1, 1]} : vector<8x128xf32> to vector<8x32xf32>
    %cst_88 = arith.constant 2.000000e+00 : f32
    %366 = vector.broadcast %cst_88 : f32 to vector<8x32xf32>
    %367 = arith.mulf %366, %365 : vector<8x32xf32>
    %cst_89 = arith.constant 1.000000e+00 : f32
    %368 = vector.broadcast %cst_89 : f32 to vector<8x32xf32>
    %369 = arith.subf %367, %368 : vector<8x32xf32>
    %370 = vector.extract_strided_slice %362 {offsets = [0, 96], sizes = [8, 32], strides = [1, 1]} : vector<8x128xf32> to vector<8x32xf32>
    %371 = arith.mulf %364, %329 : vector<8x32xf32>
    %372 = arith.mulf %363, %369 : vector<8x32xf32>
    %373 = arith.addf %371, %372 : vector<8x32xf32>
    %374 = math.tanh %373 : vector<8x32xf32>
    %375 = arith.mulf %370, %374 : vector<8x32xf32>
    %376 = vector.extract_strided_slice %2 {offsets = [32, 0], sizes = [32, 128], strides = [1, 1]} : vector<64x128xf32> to vector<32x128xf32>
    %cst_90 = arith.constant dense<0.000000e+00> : vector<8x128xf32>
    %377 = tpu.matmul %354, %376, %cst_90 {dimension_numbers = #tpu.dot_dimension_numbers<[1], [0], [0], [1], [0, 0, 1, 1], [], []>} : vector<8x32xf32>, vector<32x128xf32>, vector<8x128xf32> -> vector<8x128xf32>
    %378 = arith.addf %377, %13 : vector<8x128xf32>
    %379 = arith.negf %378 : vector<8x128xf32>
    %380 = math.exp %379 : vector<8x128xf32>
    %cst_91 = arith.constant 1.000000e+00 : f32
    %381 = vector.broadcast %cst_91 : f32 to vector<8x128xf32>
    %382 = arith.addf %381, %380 : vector<8x128xf32>
    %383 = arith.divf %381, %382 : vector<8x128xf32>
    %384 = vector.extract_strided_slice %383 {offsets = [0, 0], sizes = [8, 32], strides = [1, 1]} : vector<8x128xf32> to vector<8x32xf32>
    %385 = vector.extract_strided_slice %383 {offsets = [0, 32], sizes = [8, 32], strides = [1, 1]} : vector<8x128xf32> to vector<8x32xf32>
    %386 = vector.extract_strided_slice %383 {offsets = [0, 64], sizes = [8, 32], strides = [1, 1]} : vector<8x128xf32> to vector<8x32xf32>
    %cst_92 = arith.constant 2.000000e+00 : f32
    %387 = vector.broadcast %cst_92 : f32 to vector<8x32xf32>
    %388 = arith.mulf %387, %386 : vector<8x32xf32>
    %cst_93 = arith.constant 1.000000e+00 : f32
    %389 = vector.broadcast %cst_93 : f32 to vector<8x32xf32>
    %390 = arith.subf %388, %389 : vector<8x32xf32>
    %391 = vector.extract_strided_slice %383 {offsets = [0, 96], sizes = [8, 32], strides = [1, 1]} : vector<8x128xf32> to vector<8x32xf32>
    %392 = arith.mulf %385, %352 : vector<8x32xf32>
    %393 = arith.mulf %384, %390 : vector<8x32xf32>
    %394 = arith.addf %392, %393 : vector<8x32xf32>
    %395 = math.tanh %394 : vector<8x32xf32>
    %396 = arith.mulf %391, %395 : vector<8x32xf32>
    %397 = tpu.concatenate %396, %375 in 1 : vector<8x32xf32>, vector<8x32xf32> -> vector<8x64xf32>
    %cst_94 = arith.constant dense<0.000000e+00> : vector<8x128xf32>
    %398 = tpu.matmul %397, %3, %cst_94 {dimension_numbers = #tpu.dot_dimension_numbers<[1], [0], [0], [1], [0, 0, 1, 1], [], []>} : vector<8x64xf32>, vector<64x128xf32>, vector<8x128xf32> -> vector<8x128xf32>
    %399 = arith.addf %398, %19 : vector<8x128xf32>
    %400 = arith.negf %399 : vector<8x128xf32>
    %401 = math.exp %400 : vector<8x128xf32>
    %cst_95 = arith.constant 1.000000e+00 : f32
    %402 = vector.broadcast %cst_95 : f32 to vector<8x128xf32>
    %403 = arith.addf %402, %401 : vector<8x128xf32>
    %404 = arith.divf %402, %403 : vector<8x128xf32>
    %405 = vector.extract_strided_slice %404 {offsets = [0, 0], sizes = [8, 32], strides = [1, 1]} : vector<8x128xf32> to vector<8x32xf32>
    %406 = vector.extract_strided_slice %404 {offsets = [0, 32], sizes = [8, 32], strides = [1, 1]} : vector<8x128xf32> to vector<8x32xf32>
    %407 = vector.extract_strided_slice %404 {offsets = [0, 64], sizes = [8, 32], strides = [1, 1]} : vector<8x128xf32> to vector<8x32xf32>
    %cst_96 = arith.constant 2.000000e+00 : f32
    %408 = vector.broadcast %cst_96 : f32 to vector<8x32xf32>
    %409 = arith.mulf %408, %407 : vector<8x32xf32>
    %cst_97 = arith.constant 1.000000e+00 : f32
    %410 = vector.broadcast %cst_97 : f32 to vector<8x32xf32>
    %411 = arith.subf %409, %410 : vector<8x32xf32>
    %412 = vector.extract_strided_slice %404 {offsets = [0, 96], sizes = [8, 32], strides = [1, 1]} : vector<8x128xf32> to vector<8x32xf32>
    %413 = arith.mulf %406, %373 : vector<8x32xf32>
    %414 = arith.mulf %405, %411 : vector<8x32xf32>
    %415 = arith.addf %413, %414 : vector<8x32xf32>
    %416 = math.tanh %415 : vector<8x32xf32>
    %417 = arith.mulf %412, %416 : vector<8x32xf32>
    %418 = tpu.concatenate %417, %396 in 1 : vector<8x32xf32>, vector<8x32xf32> -> vector<8x64xf32>
    %cst_98 = arith.constant dense<0.000000e+00> : vector<8x128xf32>
    %419 = tpu.matmul %418, %2, %cst_98 {dimension_numbers = #tpu.dot_dimension_numbers<[1], [0], [0], [1], [0, 0, 1, 1], [], []>} : vector<8x64xf32>, vector<64x128xf32>, vector<8x128xf32> -> vector<8x128xf32>
    %420 = arith.addf %419, %16 : vector<8x128xf32>
    %421 = arith.negf %420 : vector<8x128xf32>
    %422 = math.exp %421 : vector<8x128xf32>
    %cst_99 = arith.constant 1.000000e+00 : f32
    %423 = vector.broadcast %cst_99 : f32 to vector<8x128xf32>
    %424 = arith.addf %423, %422 : vector<8x128xf32>
    %425 = arith.divf %423, %424 : vector<8x128xf32>
    %426 = vector.extract_strided_slice %425 {offsets = [0, 0], sizes = [8, 32], strides = [1, 1]} : vector<8x128xf32> to vector<8x32xf32>
    %427 = vector.extract_strided_slice %425 {offsets = [0, 32], sizes = [8, 32], strides = [1, 1]} : vector<8x128xf32> to vector<8x32xf32>
    %428 = vector.extract_strided_slice %425 {offsets = [0, 64], sizes = [8, 32], strides = [1, 1]} : vector<8x128xf32> to vector<8x32xf32>
    %cst_100 = arith.constant 2.000000e+00 : f32
    %429 = vector.broadcast %cst_100 : f32 to vector<8x32xf32>
    %430 = arith.mulf %429, %428 : vector<8x32xf32>
    %cst_101 = arith.constant 1.000000e+00 : f32
    %431 = vector.broadcast %cst_101 : f32 to vector<8x32xf32>
    %432 = arith.subf %430, %431 : vector<8x32xf32>
    %433 = vector.extract_strided_slice %425 {offsets = [0, 96], sizes = [8, 32], strides = [1, 1]} : vector<8x128xf32> to vector<8x32xf32>
    %434 = arith.mulf %427, %394 : vector<8x32xf32>
    %435 = arith.mulf %426, %432 : vector<8x32xf32>
    %436 = arith.addf %434, %435 : vector<8x32xf32>
    %437 = math.tanh %436 : vector<8x32xf32>
    %438 = arith.mulf %433, %437 : vector<8x32xf32>
    %439 = tpu.concatenate %438, %417 in 1 : vector<8x32xf32>, vector<8x32xf32> -> vector<8x64xf32>
    %cst_102 = arith.constant dense<0.000000e+00> : vector<8x128xf32>
    %440 = tpu.matmul %439, %3, %cst_102 {dimension_numbers = #tpu.dot_dimension_numbers<[1], [0], [0], [1], [0, 0, 1, 1], [], []>} : vector<8x64xf32>, vector<64x128xf32>, vector<8x128xf32> -> vector<8x128xf32>
    %441 = arith.addf %440, %19 : vector<8x128xf32>
    %442 = arith.negf %441 : vector<8x128xf32>
    %443 = math.exp %442 : vector<8x128xf32>
    %cst_103 = arith.constant 1.000000e+00 : f32
    %444 = vector.broadcast %cst_103 : f32 to vector<8x128xf32>
    %445 = arith.addf %444, %443 : vector<8x128xf32>
    %446 = arith.divf %444, %445 : vector<8x128xf32>
    %447 = vector.extract_strided_slice %446 {offsets = [0, 0], sizes = [8, 32], strides = [1, 1]} : vector<8x128xf32> to vector<8x32xf32>
    %448 = vector.extract_strided_slice %446 {offsets = [0, 32], sizes = [8, 32], strides = [1, 1]} : vector<8x128xf32> to vector<8x32xf32>
    %449 = vector.extract_strided_slice %446 {offsets = [0, 64], sizes = [8, 32], strides = [1, 1]} : vector<8x128xf32> to vector<8x32xf32>
    %cst_104 = arith.constant 2.000000e+00 : f32
    %450 = vector.broadcast %cst_104 : f32 to vector<8x32xf32>
    %451 = arith.mulf %450, %449 : vector<8x32xf32>
    %cst_105 = arith.constant 1.000000e+00 : f32
    %452 = vector.broadcast %cst_105 : f32 to vector<8x32xf32>
    %453 = arith.subf %451, %452 : vector<8x32xf32>
    %454 = vector.extract_strided_slice %446 {offsets = [0, 96], sizes = [8, 32], strides = [1, 1]} : vector<8x128xf32> to vector<8x32xf32>
    %455 = arith.mulf %448, %415 : vector<8x32xf32>
    %456 = arith.mulf %447, %453 : vector<8x32xf32>
    %457 = arith.addf %455, %456 : vector<8x32xf32>
    %458 = math.tanh %457 : vector<8x32xf32>
    %459 = arith.mulf %454, %458 : vector<8x32xf32>
    %460 = tpu.concatenate %459, %438 in 1 : vector<8x32xf32>, vector<8x32xf32> -> vector<8x64xf32>
    %cst_106 = arith.constant dense<0.000000e+00> : vector<8x128xf32>
    %461 = tpu.matmul %460, %2, %cst_106 {dimension_numbers = #tpu.dot_dimension_numbers<[1], [0], [0], [1], [0, 0, 1, 1], [], []>} : vector<8x64xf32>, vector<64x128xf32>, vector<8x128xf32> -> vector<8x128xf32>
    %462 = arith.addf %461, %16 : vector<8x128xf32>
    %463 = arith.negf %462 : vector<8x128xf32>
    %464 = math.exp %463 : vector<8x128xf32>
    %cst_107 = arith.constant 1.000000e+00 : f32
    %465 = vector.broadcast %cst_107 : f32 to vector<8x128xf32>
    %466 = arith.addf %465, %464 : vector<8x128xf32>
    %467 = arith.divf %465, %466 : vector<8x128xf32>
    %468 = vector.extract_strided_slice %467 {offsets = [0, 0], sizes = [8, 32], strides = [1, 1]} : vector<8x128xf32> to vector<8x32xf32>
    %469 = vector.extract_strided_slice %467 {offsets = [0, 32], sizes = [8, 32], strides = [1, 1]} : vector<8x128xf32> to vector<8x32xf32>
    %470 = vector.extract_strided_slice %467 {offsets = [0, 64], sizes = [8, 32], strides = [1, 1]} : vector<8x128xf32> to vector<8x32xf32>
    %cst_108 = arith.constant 2.000000e+00 : f32
    %471 = vector.broadcast %cst_108 : f32 to vector<8x32xf32>
    %472 = arith.mulf %471, %470 : vector<8x32xf32>
    %cst_109 = arith.constant 1.000000e+00 : f32
    %473 = vector.broadcast %cst_109 : f32 to vector<8x32xf32>
    %474 = arith.subf %472, %473 : vector<8x32xf32>
    %475 = vector.extract_strided_slice %467 {offsets = [0, 96], sizes = [8, 32], strides = [1, 1]} : vector<8x128xf32> to vector<8x32xf32>
    %476 = arith.mulf %469, %436 : vector<8x32xf32>
    %477 = arith.mulf %468, %474 : vector<8x32xf32>
    %478 = arith.addf %476, %477 : vector<8x32xf32>
    %479 = math.tanh %478 : vector<8x32xf32>
    %480 = arith.mulf %475, %479 : vector<8x32xf32>
    %481 = tpu.concatenate %480, %459 in 1 : vector<8x32xf32>, vector<8x32xf32> -> vector<8x64xf32>
    %cst_110 = arith.constant dense<0.000000e+00> : vector<8x128xf32>
    %482 = tpu.matmul %481, %3, %cst_110 {dimension_numbers = #tpu.dot_dimension_numbers<[1], [0], [0], [1], [0, 0, 1, 1], [], []>} : vector<8x64xf32>, vector<64x128xf32>, vector<8x128xf32> -> vector<8x128xf32>
    %483 = arith.addf %482, %19 : vector<8x128xf32>
    %484 = arith.negf %483 : vector<8x128xf32>
    %485 = math.exp %484 : vector<8x128xf32>
    %cst_111 = arith.constant 1.000000e+00 : f32
    %486 = vector.broadcast %cst_111 : f32 to vector<8x128xf32>
    %487 = arith.addf %486, %485 : vector<8x128xf32>
    %488 = arith.divf %486, %487 : vector<8x128xf32>
    %489 = vector.extract_strided_slice %488 {offsets = [0, 0], sizes = [8, 32], strides = [1, 1]} : vector<8x128xf32> to vector<8x32xf32>
    %490 = vector.extract_strided_slice %488 {offsets = [0, 32], sizes = [8, 32], strides = [1, 1]} : vector<8x128xf32> to vector<8x32xf32>
    %491 = vector.extract_strided_slice %488 {offsets = [0, 64], sizes = [8, 32], strides = [1, 1]} : vector<8x128xf32> to vector<8x32xf32>
    %cst_112 = arith.constant 2.000000e+00 : f32
    %492 = vector.broadcast %cst_112 : f32 to vector<8x32xf32>
    %493 = arith.mulf %492, %491 : vector<8x32xf32>
    %cst_113 = arith.constant 1.000000e+00 : f32
    %494 = vector.broadcast %cst_113 : f32 to vector<8x32xf32>
    %495 = arith.subf %493, %494 : vector<8x32xf32>
    %496 = vector.extract_strided_slice %488 {offsets = [0, 96], sizes = [8, 32], strides = [1, 1]} : vector<8x128xf32> to vector<8x32xf32>
    %497 = arith.mulf %490, %457 : vector<8x32xf32>
    %498 = arith.mulf %489, %495 : vector<8x32xf32>
    %499 = arith.addf %497, %498 : vector<8x32xf32>
    %500 = math.tanh %499 : vector<8x32xf32>
    %501 = arith.mulf %496, %500 : vector<8x32xf32>
    %502 = tpu.concatenate %501, %480 in 1 : vector<8x32xf32>, vector<8x32xf32> -> vector<8x64xf32>
    %cst_114 = arith.constant dense<0.000000e+00> : vector<8x128xf32>
    %503 = tpu.matmul %502, %2, %cst_114 {dimension_numbers = #tpu.dot_dimension_numbers<[1], [0], [0], [1], [0, 0, 1, 1], [], []>} : vector<8x64xf32>, vector<64x128xf32>, vector<8x128xf32> -> vector<8x128xf32>
    %504 = arith.addf %503, %16 : vector<8x128xf32>
    %505 = arith.negf %504 : vector<8x128xf32>
    %506 = math.exp %505 : vector<8x128xf32>
    %cst_115 = arith.constant 1.000000e+00 : f32
    %507 = vector.broadcast %cst_115 : f32 to vector<8x128xf32>
    %508 = arith.addf %507, %506 : vector<8x128xf32>
    %509 = arith.divf %507, %508 : vector<8x128xf32>
    %510 = vector.extract_strided_slice %509 {offsets = [0, 0], sizes = [8, 32], strides = [1, 1]} : vector<8x128xf32> to vector<8x32xf32>
    %511 = vector.extract_strided_slice %509 {offsets = [0, 32], sizes = [8, 32], strides = [1, 1]} : vector<8x128xf32> to vector<8x32xf32>
    %512 = vector.extract_strided_slice %509 {offsets = [0, 64], sizes = [8, 32], strides = [1, 1]} : vector<8x128xf32> to vector<8x32xf32>
    %cst_116 = arith.constant 2.000000e+00 : f32
    %513 = vector.broadcast %cst_116 : f32 to vector<8x32xf32>
    %514 = arith.mulf %513, %512 : vector<8x32xf32>
    %cst_117 = arith.constant 1.000000e+00 : f32
    %515 = vector.broadcast %cst_117 : f32 to vector<8x32xf32>
    %516 = arith.subf %514, %515 : vector<8x32xf32>
    %517 = vector.extract_strided_slice %509 {offsets = [0, 96], sizes = [8, 32], strides = [1, 1]} : vector<8x128xf32> to vector<8x32xf32>
    %518 = arith.mulf %511, %478 : vector<8x32xf32>
    %519 = arith.mulf %510, %516 : vector<8x32xf32>
    %520 = arith.addf %518, %519 : vector<8x32xf32>
    %521 = math.tanh %520 : vector<8x32xf32>
    %522 = arith.mulf %517, %521 : vector<8x32xf32>
    %523 = tpu.concatenate %522, %501 in 1 : vector<8x32xf32>, vector<8x32xf32> -> vector<8x64xf32>
    %cst_118 = arith.constant dense<0.000000e+00> : vector<8x128xf32>
    %524 = tpu.matmul %523, %3, %cst_118 {dimension_numbers = #tpu.dot_dimension_numbers<[1], [0], [0], [1], [0, 0, 1, 1], [], []>} : vector<8x64xf32>, vector<64x128xf32>, vector<8x128xf32> -> vector<8x128xf32>
    %525 = arith.addf %524, %19 : vector<8x128xf32>
    %526 = arith.negf %525 : vector<8x128xf32>
    %527 = math.exp %526 : vector<8x128xf32>
    %cst_119 = arith.constant 1.000000e+00 : f32
    %528 = vector.broadcast %cst_119 : f32 to vector<8x128xf32>
    %529 = arith.addf %528, %527 : vector<8x128xf32>
    %530 = arith.divf %528, %529 : vector<8x128xf32>
    %531 = vector.extract_strided_slice %530 {offsets = [0, 0], sizes = [8, 32], strides = [1, 1]} : vector<8x128xf32> to vector<8x32xf32>
    %532 = vector.extract_strided_slice %530 {offsets = [0, 32], sizes = [8, 32], strides = [1, 1]} : vector<8x128xf32> to vector<8x32xf32>
    %533 = vector.extract_strided_slice %530 {offsets = [0, 64], sizes = [8, 32], strides = [1, 1]} : vector<8x128xf32> to vector<8x32xf32>
    %cst_120 = arith.constant 2.000000e+00 : f32
    %534 = vector.broadcast %cst_120 : f32 to vector<8x32xf32>
    %535 = arith.mulf %534, %533 : vector<8x32xf32>
    %cst_121 = arith.constant 1.000000e+00 : f32
    %536 = vector.broadcast %cst_121 : f32 to vector<8x32xf32>
    %537 = arith.subf %535, %536 : vector<8x32xf32>
    %538 = vector.extract_strided_slice %530 {offsets = [0, 96], sizes = [8, 32], strides = [1, 1]} : vector<8x128xf32> to vector<8x32xf32>
    %539 = arith.mulf %532, %499 : vector<8x32xf32>
    %540 = arith.mulf %531, %537 : vector<8x32xf32>
    %541 = arith.addf %539, %540 : vector<8x32xf32>
    %542 = math.tanh %541 : vector<8x32xf32>
    %543 = arith.mulf %538, %542 : vector<8x32xf32>
    %544 = tpu.concatenate %417, %459, %501, %543 in 1 : vector<8x32xf32>, vector<8x32xf32>, vector<8x32xf32>, vector<8x32xf32> -> vector<8x128xf32>
    %c0_122 = arith.constant 0 : index
    %c0_123 = arith.constant 0 : index
    %545 = vector.load %arg4[%c0_122, %c0_123] : memref<128x16xf32, #tpu.memory_space<vmem>>, vector<128x16xf32>
    %cst_124 = arith.constant dense<0.000000e+00> : vector<8x16xf32>
    %546 = tpu.matmul %544, %545, %cst_124 {dimension_numbers = #tpu.dot_dimension_numbers<[1], [0], [0], [1], [0, 0, 1, 1], [], []>} : vector<8x128xf32>, vector<128x16xf32>, vector<8x16xf32> -> vector<8x16xf32>
    %c0_125 = arith.constant 0 : index
    %c0_126 = arith.constant 0 : index
    %547 = vector.load %arg5[%c0_125, %c0_126] : memref<1x16xf32, #tpu.memory_space<vmem>>, vector<1x16xf32>
    %548 = vector.broadcast %547 : vector<1x16xf32> to vector<8x16xf32>
    %549 = arith.addf %546, %548 : vector<8x16xf32>
    %c0_127 = arith.constant 0 : index
    %c0_128 = arith.constant 0 : index
    %550 = vector.load %arg6[%c0_127, %c0_128] : memref<8x16xf32, #tpu.memory_space<vmem>>, vector<8x16xf32>
    tpu.vector_store %arg6[%c0_127, %c0_128], %549 {strides = array<i32>} : memref<8x16xf32, #tpu.memory_space<vmem>>, vector<8x16xf32>,
    return
  }
  func.func @transform_0(%arg0: i32) -> (i32, i32, i32) {
    %c0_i32 = arith.constant 0 : i32
    %c0_i32_0 = arith.constant 0 : i32
    %c0_i32_1 = arith.constant 0 : i32
    return %arg0, %c0_i32, %c0_i32_0 : i32, i32, i32
  }
  func.func @transform_1(%arg0: i32) -> (i32, i32) {
    %c0_i32 = arith.constant 0 : i32
    %c0_i32_0 = arith.constant 0 : i32
    %c0_i32_1 = arith.constant 0 : i32
    return %c0_i32, %c0_i32_0 : i32, i32
  }
  func.func @transform_2(%arg0: i32) -> (i32, i32) {
    %c0_i32 = arith.constant 0 : i32
    %c0_i32_0 = arith.constant 0 : i32
    %c0_i32_1 = arith.constant 0 : i32
    return %c0_i32, %c0_i32_0 : i32, i32
  }
  func.func @transform_3(%arg0: i32) -> (i32, i32) {
    %c0_i32 = arith.constant 0 : i32
    %c0_i32_0 = arith.constant 0 : i32
    %c0_i32_1 = arith.constant 0 : i32
    return %c0_i32, %c0_i32_0 : i32, i32
  }
  func.func @transform_4(%arg0: i32) -> (i32, i32) {
    %c0_i32 = arith.constant 0 : i32
    %c0_i32_0 = arith.constant 0 : i32
    %c0_i32_1 = arith.constant 0 : i32
    return %c0_i32, %c0_i32_0 : i32, i32
  }
  func.func @transform_5(%arg0: i32) -> (i32, i32) {
    %c0_i32 = arith.constant 0 : i32
    %c0_i32_0 = arith.constant 0 : i32
    return %arg0, %c0_i32 : i32, i32
  }
}

</mosaic_0001>

<bundles_post_ra>
// kernel: lstm_autoregressive_forward.1
= control target key start
LH: loop header
LB: loop body
LE: loop exit
PB: predicated region body
PF: predicated region fallthrough
CT: control target
= control target key end

     0   :  { %10 = vsyncpa [#allocation3], 0  ;;  %s2257_s21 = smov [#allocation2]   ;;  %s2258_s23 = smov 128   ;;  %s3056_s0 = inlined_call_operand.vmem [shape: f32[8,8,8], index: 0, kind: input, shape index: {}]   ;;  %s3057_s1 = inlined_call_operand.hbm [shape: f32[232,128], index: 1, kind: input, shape index: {}]   ;;  %s3058_s2 = inlined_call_operand.vmem [shape: f32[5,128], index: 2, kind: input, shape index: {}]   ;;  %s3059_s3 = inlined_call_operand.vmem [shape: f32[128,16], index: 3, kind: input, shape index: {}]   ;;  %s3060_s4 = inlined_call_operand.vmem [shape: f32[1,16], index: 4, kind: input, shape index: {}]   ;;  %s3061_s5 = inlined_call_operand.vmem [shape: f32[8,16], index: 5, kind: output, shape index: {}]  }
   0x1   :  { %s17_s20 = sshll.u32 %s3057_s1, 4  ;;  %s19_s22 = sshll.u32 %s2257_s21, 4  ;;  %s18_s20 = int_to_ptr.hbm [resolvable:$true] %s17_s20  ;;  %s20_s22 = int_to_ptr.vmem [resolvable:$true] %s19_s22 }
   0x2   :  { %s2259_s24 = smov 8  }
   0x3   :  { %25 = dma.hbm_to_vmem [thread:$0]  %s18_s20, 3712, %s20_s22, [#allocation3], %s2258_s23, %s2258_s23, %s2259_s24  }
   0x4   :  { %2255 = dma.done.wait [#allocation3], 3712  }
   0x5   :  { %2256 = vsyncadd [#allocation3], 4294963584  ;;  %v2297_v0 = vld [vmem:[#allocation2 + $0x20] sm:$0xff]  ;;  %v2299_v1 = vld [vmem:[#allocation2 + $0x18] sm:$0xff]  ;;  %vm88_vm0 = vcmask 1041409   ;;  %vm91_vm1 = vcmask 1042434  }
   0x6   :  { %126 = vmatpush.msra.mxu0 %v2297_v0  ;;  %v2302_v2 = vld [vmem:[#allocation2 + $0x10] sm:$0xff]  ;;  %290 = vmatpush.msra.mxu2 %v2297_v0  ;;  %v72_v3 = vld [vmem:[%s3056_s0 + $0x8] sm:$0x1]  ;;  %v74_v5 = vld [vmem:[%s3056_s0 + $0x18] sm:$0x1]  ;;  %vm94_vm2 = vcmask 1043459  }
   0x7   :  { %v73_v4 = vld [vmem:[%s3056_s0 + $0x10] sm:$0x1]  ;;  %v71_v6 = vld [vmem:[%s3056_s0] sm:$0x1]  ;;  %v76_v8 = vld [vmem:[%s3056_s0 + $0x28] sm:$0x1] }
   0x8   :  { %127 = vmatpush.msra.mxu0 %v2299_v1  ;;  %v75_v7 = vld [vmem:[%s3056_s0 + $0x20] sm:$0x1]  ;;  %291 = vmatpush.msra.mxu2 %v2299_v1  ;;  %v2325_v9 = vld [vmem:[#allocation2 + $0x8] sm:$0xff]  ;;  %v77_v10 = vld [vmem:[%s3056_s0 + $0x30] sm:$0x1]  ;;  %v87_v11 = vrot.slane %v72_v3, 7 }
   0x9   :  { %v90_v12 = vrot.slane %v73_v4, 6  ;;  %v93_v13 = vrot.slane %v74_v5, 5  ;;  %v78_v14 = vld [vmem:[%s3056_s0 + $0x38] sm:$0x1]  ;;  %v96_v15 = vrot.slane %v75_v7, 4  ;;  %v2335_v16 = vld [vmem:[#allocation2] sm:$0xff] }
   0xa   :  { %128 = vmatpush.msra.mxu0 %v2302_v2  ;;  %292 = vmatpush.msra.mxu2 %v2302_v2  ;;  %v89_v17 = vsel %vm88_vm0, %v87_v11, %v71_v6  ;;  %vm97_vm3 = vcmask 1044484   ;;  %v99_v18 = vrot.slane %v76_v8, 3  ;;  %vm100_vm4 = vcmask 1045509   ;;  %v2363_v28 = vld [vmem:[%s3058_s2] sm:$0x1f]  ;;  %s2260_s17 = smov 64  }
   0xb   :  { %v92_v19 = vsel %vm91_vm1, %v90_v12, %v89_v17  ;;  %v102_v20 = vrot.slane %v77_v10, 2  ;;  %vm103_vm5 = vcmask 1046534   ;;  %v105_v22 = vrot.slane %v78_v14, 1  ;;  %s2261_s18 = smov 32   ;;  %v2375_v53 = vld [vmem:[#allocation2 + $0x60] sm:$0xff]  ;;  %v2377_v54 = vld [vmem:[#allocation2 + $0x58] sm:$0xff] }
   0xc   :  { %129 = vmatpush.msra.mxu0 %v2325_v9  ;;  %293 = vmatpush.msra.mxu2 %v2325_v9  ;;  %v95_v21 = vsel %vm94_vm2, %v93_v13, %v92_v19  ;;  %vm106_vm6 = vcmask 1047559   ;;  %vm3063_vm7 = vcmask 64512   ;;  %vm3062_vm8 = vcmask 326656   ;;  %v2381_v55 = vld [vmem:[#allocation2 + $0x50] sm:$0xff]  ;;  %v2386_v56 = vld [vmem:[#allocation2 + $0x48] sm:$0xff]  ;;  %v2391_v57 = vld [vmem:[#allocation2 + $0x40] sm:$0xff] }
   0xd   :  { %v98_v23 = vsel %vm97_vm3, %v96_v15, %v95_v21  ;;  %v2366_v29 = vperm.slane %v2363_v28, 0  ;;  %191 = vmatpush.msra.mxu1 %v2375_v53  ;;  %357 = vmatpush.msra.mxu3 %v2375_v53  ;;  %v2396_v58 = vld [vmem:[#allocation2 + $0x38] sm:$0xff]  ;;  %v2401_v59 = vld [vmem:[#allocation2 + $0x30] sm:$0xff]  ;;  %s2262_s19 = smov 40   ;;  %v2412_v62 = vld [vmem:[#allocation2 + $0x28] sm:$0xff]  ;;  %vm177_vm13 = vcmask 261120  }
   0xe   :  { %130 = vmatpush.msra.mxu0 %v2335_v16  ;;  %294 = vmatpush.msra.mxu2 %v2335_v16  ;;  %v101_v24 = vsel %vm100_vm4, %v99_v18, %v98_v23  ;;  %v242_v63 = vld [vmem:[%s3056_s0 + $0x9] sm:$0x1]  ;;  %vm3064_vm14 = vcmask 523264   ;;  %v243_v4 = vld [vmem:[%s3056_s0 + $0x11] sm:$0x1] }
   0xf   :  { %v104_v25 = vsel %vm103_vm5, %v102_v20, %v101_v24  ;;  %192 = vmatpush.msra.mxu1 %v2377_v54  ;;  %358 = vmatpush.msra.mxu3 %v2377_v54  ;;  %v257_v5 = vrot.slane %v242_v63, 7  ;;  %v241_v7 = vld [vmem:[%s3056_s0 + $0x1] sm:$0x1]  ;;  %v244_v8 = vld [vmem:[%s3056_s0 + $0x19] sm:$0x1]  ;;  %v259_v10 = vrot.slane %v243_v4, 6 }
  0x10   :  { %456 = vmatpush.msrb.mxu0 %v2297_v0  ;;  %v107_v26 = vsel %vm106_vm6, %v105_v22, %v104_v25  ;;  %523 = vmatpush.msrb.mxu2 %v2375_v53  ;;  %v245_v12 = vld [vmem:[%s3056_s0 + $0x21] sm:$0x1]  ;;  %v261_v13 = vrot.slane %v244_v8, 5  ;;  %v246_v15 = vld [vmem:[%s3056_s0 + $0x29] sm:$0x1] }
  0x11   :  { %v110_v27 = vsel %vm3063_vm7, %v107_v26, 0.0  ;;  %193 = vmatpush.msra.mxu1 %v2381_v55  ;;  %359 = vmatpush.msra.mxu3 %v2381_v55  ;;  %v258_v11 = vsel %vm88_vm0, %v257_v5, %v241_v7  ;;  %v263_v17 = vrot.slane %v245_v12, 4  ;;  %v247_v19 = vld [vmem:[%s3056_s0 + $0x31] sm:$0x1]  ;;  %v265_v20 = vrot.slane %v246_v15, 3 }
  0x12   :  { %457 = vmatpush.msrb.mxu0 %v2299_v1  ;;  %524 = vmatpush.msrb.mxu2 %v2377_v54  ;;  %v260_v14 = vsel %vm91_vm1, %v259_v10, %v258_v11  ;;  %v248_v22 = vld [vmem:[%s3056_s0 + $0x39] sm:$0x1]  ;;  %v267_v23 = vrot.slane %v247_v19, 2 }
  0x13   :  { %2001 = vmatmul.msk.f32.vlgmr.msra.gmra.mxu0 %vm3062_vm8, %v110_v27  ;;  %194 = vmatpush.msra.mxu1 %v2386_v56  ;;  %v262_v18 = vsel %vm94_vm2, %v261_v13, %v260_v14  ;;  %v269_v25 = vrot.slane %v248_v22, 1 }
  0x14   :  { %458 = vmatpush.msrb.mxu0 %v2302_v2  ;;  %525 = vmatpush.msrb.mxu2 %v2381_v55  ;;  %v264_v21 = vsel %vm97_vm3, %v263_v17, %v262_v18 }
  0x15   :  { %360 = vmatpush.msra.mxu3 %v2386_v56  ;;  %195 = vmatpush.msra.mxu1 %v2391_v57  ;;  %v266_v24 = vsel %vm100_vm4, %v265_v20, %v264_v21 }
  0x16   :  { %459 = vmatpush.msrb.mxu0 %v2325_v9  ;;  %526 = vmatpush.msrb.mxu2 %v2386_v56  ;;  %v268_v26 = vsel %vm103_vm5, %v267_v23, %v266_v24 }
  0x17   :  { %361 = vmatpush.msra.mxu3 %v2391_v57  ;;  %196 = vmatpush.msra.mxu1 %v2396_v58  ;;  %v270_v27 = vsel %vm106_vm6, %v269_v25, %v268_v26 }
  0x18   :  { %460 = vmatpush.msrb.mxu0 %v2335_v16  ;;  %527 = vmatpush.msrb.mxu2 %v2391_v57 }
  0x19   :  { %362 = vmatpush.msra.mxu3 %v2396_v58  ;;  %197 = vmatpush.msra.mxu1 %v2401_v59 }
  0x1a   :  { %788 = vmatpush.msra.mxu0 %v2297_v0  ;;  %528 = vmatpush.msrb.mxu2 %v2396_v58 }
  0x1b   :  { %363 = vmatpush.msra.mxu3 %v2401_v59  ;;  %198 = vmatpush.msra.mxu1 %v2412_v62 }
  0x1c   :  { %789 = vmatpush.msra.mxu0 %v2299_v1  ;;  %529 = vmatpush.msrb.mxu2 %v2401_v59 }
  0x1d   :  { %364 = vmatpush.msra.mxu3 %v2412_v62  ;;  %622 = vmatpush.msrb.mxu1 %v2297_v0 }
  0x1e   :  { %790 = vmatpush.msra.mxu0 %v2302_v2  ;;  %530 = vmatpush.msrb.mxu2 %v2412_v62 }
  0x1f   :  { %689 = vmatpush.msrb.mxu3 %v2375_v53  ;;  %623 = vmatpush.msrb.mxu1 %v2299_v1 }
  0x20   :  { %791 = vmatpush.msra.mxu0 %v2325_v9 }
  0x21   :  { %690 = vmatpush.msrb.mxu3 %v2377_v54  ;;  %624 = vmatpush.msrb.mxu1 %v2302_v2 }
  0x22   :  { %792 = vmatpush.msra.mxu0 %v2335_v16 }
  0x23   :  { %691 = vmatpush.msrb.mxu3 %v2381_v55  ;;  %625 = vmatpush.msrb.mxu1 %v2325_v9 }
  0x25   :  { %692 = vmatpush.msrb.mxu3 %v2386_v56  ;;  %626 = vmatpush.msrb.mxu1 %v2335_v16 }
  0x27   :  { %693 = vmatpush.msrb.mxu3 %v2391_v57 }
  0x29   :  { %694 = vmatpush.msrb.mxu3 %v2396_v58 }
  0x2b   :  { %695 = vmatpush.msrb.mxu3 %v2401_v59 }
  0x2d   :  { %696 = vmatpush.msrb.mxu3 %v2412_v62 }
  0x90   :  { %v132_v30 = vpop.f32.mrf.mxu0 }
  0x91   :  { %v133_v31 = vadd.f32 %v132_v30, %v2366_v29 }
  0x93   :  { %v2002_v32 = vmul.f32 -1.442695, %v133_v31 }
  0x95   :  { %2081 = vpow2.f32 %v2002_v32  ;;  %v2479_v32 = vperm.slane %v2363_v28, 1 }
  0x9b   :  { %v2082_v33 = vpop.eup %2081 }
  0x9c   :  { %v138_v34 = vadd.f32 1.0, %v2082_v33 }
  0x9e   :  { %2083 = vrcp.f32 %v138_v34  ;;  %v150_v38 = vand.u32 2147483648, %v138_v34  ;;  %v148_v40 = vand.u32 2147483647, %v138_v34  ;;  %vm144_vm10 = vweird.f32 %v138_v34 }
  0xa0   :  { %v151_v42 = vor.u32 1.1754944e-38, %v150_v38  ;;  %vm149_vm12 = vcmp.eq.f32.partialorder %v148_v40, 8.507059e+37 }
  0xa4   :  { %v2084_v35 = vpop.eup %2083 }
  0xa5   :  { %v140_v36 = vmul.f32 %v2084_v35, %v138_v34  ;;  %vm145_vm9 = vweird.f32 %v2084_v35 }
  0xa6   :  { %vm146_vm11 = vmor %vm144_vm10, %vm145_vm9 }
  0xa7   :  { %v141_v37 = vsub.f32 1.0, %v140_v36 }
  0xa9   :  { %v142_v39 = vmul.f32 %v2084_v35, %v141_v37 }
  0xab   :  { %v143_v41 = vadd.f32 %v2084_v35, %v142_v39 }
  0xad   :  { %v147_v43 = vsel %vm146_vm11, %v2084_v35, %v143_v41 }
  0xae   :  { %v152_v44 = vsel %vm149_vm12, %v151_v42, %v147_v43 }
  0xaf   :  { %v154_v45 = vmul.f32 2.0, %v152_v44  ;;  %v156_v49 = vmul.f32 0.0, %v152_v44 }
  0xb1   :  { %v2003_v46 = vadd.f32 -1.0, %v154_v45 }
  0xb3   :  { %158 = vrot.lane.b32.xlu0 %v2003_v46, %s2260_s17 }
 0x125   :  { %v159_v47 = vpop.permute.xlu0 %158 }
 0x126   :  { %v161_v48 = vmul.f32 %v159_v47, %v152_v44 }
 0x128   :  { %163 = vrot.lane.b32.xlu0 %v161_v48, %s2261_s18 }
 0x19a   :  { %v164_v50 = vpop.permute.xlu0 %163 }
 0x19b   :  { %v2371_v51 = vadd.f32 %v164_v50, %v156_v49 }
 0x19d   :  { %2085 = vtanh.f32 %v2371_v51 }
 0x1a3   :  { %v2086_v52 = vpop.eup %2085 }
 0x1a4   :  { %169 = vrot.lane.b32.xlu1 %v2086_v52, %s2260_s17 }
 0x216   :  { %v170_v60 = vpop.permute.xlu1 %169 }
 0x217   :  { %v172_v61 = vmul.f32 %v170_v60, %v152_v44 }
 0x219   :  { %174 = vrot.lane.b32.xlu2 %v172_v61, %s2261_s18  ;;  %272 = vrot.lane.b32.xlu1 %v172_v61, %s2262_s19 }
 0x273   :  { %v175_v3 = vpop.permute.xlu2 %174 }
 0x274   :  { %v178_v6 = vsel %vm177_vm13, %v175_v3, 0.0 }
 0x275   :  { %2004 = vmatmul.msk.f32.vlgmr.msra.gmra.mxu1 %vm3064_vm14, %v178_v6 }
 0x276   :  { %855 = vmatpush.msra.mxu1 %v2375_v53 }
 0x278   :  { %856 = vmatpush.msra.mxu1 %v2377_v54 }
 0x27a   :  { %857 = vmatpush.msra.mxu1 %v2381_v55 }
 0x27c   :  { %858 = vmatpush.msra.mxu1 %v2386_v56 }
 0x27e   :  { %859 = vmatpush.msra.mxu1 %v2391_v57 }
 0x280   :  { %860 = vmatpush.msra.mxu1 %v2396_v58 }
 0x282   :  { %861 = vmatpush.msra.mxu1 %v2401_v59 }
 0x284   :  { %862 = vmatpush.msra.mxu1 %v2412_v62 }
 0x28b   :  { %v273_v30 = vpop.permute.xlu1 %272 }
 0x28c   :  { %v275_v31 = vsel %vm3063_vm7, %v270_v27, %v273_v30 }
 0x28d   :  { %2007 = vmatmul.msk.f32.vlgmr.msra.gmra.mxu2 %vm3062_vm8, %v275_v31 }
 0x28e   :  { %954 = vmatpush.msra.mxu2 %v2297_v0 }
 0x290   :  { %955 = vmatpush.msra.mxu2 %v2299_v1 }
 0x292   :  { %956 = vmatpush.msra.mxu2 %v2302_v2 }
 0x294   :  { %957 = vmatpush.msra.mxu2 %v2325_v9 }
 0x296   :  { %958 = vmatpush.msra.mxu2 %v2335_v16 }
 0x2f2   :  { %v200_v33 = vpop.f32.mrf.mxu1 }
 0x2f3   :  { %v201_v34 = vadd.f32 %v200_v33, %v2479_v32 }
 0x2f5   :  { %v2005_v35 = vmul.f32 -1.442695, %v201_v34 }
 0x2f7   :  { %2087 = vpow2.f32 %v2005_v35 }
 0x2fd   :  { %v2088_v36 = vpop.eup %2087 }
 0x2fe   :  { %v206_v37 = vadd.f32 1.0, %v2088_v36 }
 0x300   :  { %2089 = vrcp.f32 %v206_v37  ;;  %v218_v41 = vand.u32 2147483648, %v206_v37  ;;  %v216_v43 = vand.u32 2147483647, %v206_v37  ;;  %vm212_vm9 = vweird.f32 %v206_v37 }
 0x302   :  { %v219_v28 = vor.u32 1.1754944e-38, %v218_v41  ;;  %vm217_vm11 = vcmp.eq.f32.partialorder %v216_v43, 8.507059e+37  ;;  %v410_v41 = vld [vmem:[%s3056_s0 + $0x1a] sm:$0x1] }
 0x306   :  { %v2090_v38 = vpop.eup %2089 }
 0x307   :  { %v208_v39 = vmul.f32 %v2090_v38, %v206_v37  ;;  %vm213_vm15 = vweird.f32 %v2090_v38  ;;  %v409_v37 = vld [vmem:[%s3056_s0 + $0x12] sm:$0x1] }
 0x308   :  { %vm214_vm10 = vmor %vm212_vm9, %vm213_vm15 }
 0x309   :  { %v209_v40 = vsub.f32 1.0, %v208_v39 }
 0x30b   :  { %v210_v42 = vmul.f32 %v2090_v38, %v209_v40  ;;  %v407_v40 = vld [vmem:[%s3056_s0 + $0x2] sm:$0x1] }
 0x30d   :  { %v211_v44 = vadd.f32 %v2090_v38, %v210_v42  ;;  %v425_v42 = vrot.slane %v409_v37, 6 }
 0x30f   :  { %v215_v45 = vsel %vm214_vm10, %v2090_v38, %v211_v44  ;;  %v411_v44 = vld [vmem:[%s3056_s0 + $0x22] sm:$0x1] }
 0x310   :  { %v296_v46 = vpop.f32.mrf.mxu2  ;;  %v220_v47 = vsel %vm217_vm11, %v219_v28, %v215_v45  ;;  %v427_v28 = vrot.slane %v410_v41, 5 }
 0x311   :  { %v297_v48 = vadd.f32 %v296_v46, %v2366_v29  ;;  %v222_v49 = vmul.f32 2.0, %v220_v47  ;;  %v224_v20 = vmul.f32 0.0, %v220_v47  ;;  %v412_v46 = vld [vmem:[%s3056_s0 + $0x2a] sm:$0x1] }
 0x313   :  { %v2008_v50 = vmul.f32 -1.442695, %v297_v48  ;;  %v2006_v52 = vadd.f32 -1.0, %v222_v49  ;;  %v413_v49 = vld [vmem:[%s3056_s0 + $0x32] sm:$0x1] }
 0x315   :  { %2091 = vpow2.f32 %v2008_v50  ;;  %226 = vrot.lane.b32.xlu2 %v2006_v52, %s2260_s17  ;;  %v431_v50 = vrot.slane %v412_v46, 3 }
 0x31b   :  { %v2092_v60 = vpop.eup %2091 }
 0x31c   :  { %v302_v61 = vadd.f32 1.0, %v2092_v60  ;;  %v414_v60 = vld [vmem:[%s3056_s0 + $0x3a] sm:$0x1] }
 0x31e   :  { %2093 = vrcp.f32 %v302_v61  ;;  %v314_v5 = vand.u32 2147483648, %v302_v61  ;;  %v312_v7 = vand.u32 2147483647, %v302_v61  ;;  %vm308_vm15 = vweird.f32 %v302_v61 }
 0x320   :  { %v315_v10 = vor.u32 1.1754944e-38, %v314_v5  ;;  %vm313_vm10 = vcmp.eq.f32.partialorder %v312_v7, 8.507059e+37 }
 0x324   :  { %v2094_v63 = vpop.eup %2093 }
 0x325   :  { %v304_v3 = vmul.f32 %v2094_v63, %v302_v61  ;;  %vm309_vm12 = vweird.f32 %v2094_v63  ;;  %v433_v61 = vrot.slane %v413_v49, 2 }
 0x326   :  { %vm310_vm9 = vmor %vm308_vm15, %vm309_vm12 }
 0x327   :  { %v305_v4 = vsub.f32 1.0, %v304_v3  ;;  %v435_v3 = vrot.slane %v414_v60, 1 }
 0x329   :  { %v306_v6 = vmul.f32 %v2094_v63, %v305_v4 }
 0x32b   :  { %v307_v8 = vadd.f32 %v2094_v63, %v306_v6 }
 0x32d   :  { %v311_v11 = vsel %vm310_vm9, %v2094_v63, %v307_v8 }
 0x32e   :  { %v316_v12 = vsel %vm313_vm10, %v315_v10, %v311_v11 }
 0x32f   :  { %v318_v13 = vmul.f32 2.0, %v316_v12  ;;  %v320_v24 = vmul.f32 %v316_v12, %v2371_v51  ;;  %v408_v51 = vld [vmem:[%s3056_s0 + $0xa] sm:$0x1] }
 0x330   :  { %v423_v38 = vrot.slane %v408_v51, 7 }
 0x331   :  { %v2009_v14 = vadd.f32 -1.0, %v318_v13 }
 0x332   :  { %v424_v43 = vsel %vm88_vm0, %v423_v38, %v407_v40 }
 0x333   :  { %322 = vrot.lane.b32.xlu0 %v2009_v14, %s2260_s17  ;;  %v426_v45 = vsel %vm91_vm1, %v425_v42, %v424_v43 }
 0x334   :  { %v428_v48 = vsel %vm94_vm2, %v427_v28, %v426_v45 }
 0x36f   :  { %v227_v15 = vpop.permute.xlu2 %226 }
 0x370   :  { %v229_v17 = vmul.f32 %v227_v15, %v220_v47 }
 0x372   :  { %231 = vrot.lane.b32.xlu1 %v229_v17, %s2261_s18 }
 0x3a5   :  { %v323_v18 = vpop.permute.xlu0 %322 }
 0x3a6   :  { %v325_v19 = vmul.f32 %v323_v18, %v316_v12 }
 0x3a8   :  { %327 = vrot.lane.b32.xlu2 %v325_v19, %s2261_s18 }
 0x3e4   :  { %v232_v21 = vpop.permute.xlu1 %231 }
 0x3e5   :  { %v2487_v22 = vadd.f32 %v232_v21, %v224_v20 }
 0x3e7   :  { %2095 = vtanh.f32 %v2487_v22 }
 0x3ed   :  { %v2096_v23 = vpop.eup %2095 }
 0x3ee   :  { %237 = vrot.lane.b32.xlu0 %v2096_v23, %s2260_s17 }
 0x402   :  { %v328_v25 = vpop.permute.xlu2 %327 }
 0x403   :  { %v2492_v26 = vadd.f32 %v328_v25, %v320_v24 }
 0x405   :  { %2097 = vtanh.f32 %v2492_v26 }
 0x40b   :  { %v2098_v27 = vpop.eup %2097 }
 0x40c   :  { %333 = vrot.lane.b32.xlu1 %v2098_v27, %s2260_s17 }
 0x460   :  { %v238_v30 = vpop.permute.xlu0 %237 }
 0x461   :  { %v240_v31 = vmul.f32 %v238_v30, %v220_v47  ;;  %v429_v47 = vrot.slane %v411_v44, 4 }
 0x463   :  { %342 = vrot.lane.b32.xlu0 %v240_v31, %s2260_s17  ;;  %v430_v52 = vsel %vm97_vm3, %v429_v47, %v428_v48 }
 0x464   :  { %v432_v63 = vsel %vm100_vm4, %v431_v50, %v430_v52 }
 0x465   :  { %v434_v4 = vsel %vm103_vm5, %v433_v61, %v432_v63 }
 0x466   :  { %v436_v5 = vsel %vm106_vm6, %v435_v3, %v434_v4 }
 0x47e   :  { %v334_v33 = vpop.permute.xlu1 %333 }
 0x47f   :  { %v336_v34 = vmul.f32 %v334_v33, %v316_v12 }
 0x481   :  { %438 = vrot.lane.b32.xlu1 %v336_v34, %s2262_s19  ;;  %338 = vrot.lane.b32.xlu2 %v336_v34, %s2261_s18 }
 0x4d5   :  { %v343_v35 = vpop.permute.xlu0 %342 }
 0x4db   :  { %v339_v36 = vpop.permute.xlu2 %338 }
 0x4dc   :  { %v345_v39 = vsel %vm177_vm13, %v339_v36, %v343_v35 }
 0x4dd   :  { %2010 = vmatmul.msk.f32.vlgmr.msra.gmra.mxu3 %vm3064_vm14, %v345_v39 }
 0x4de   :  { %1353 = vmatpush.msra.mxu3 %v2375_v53 }
 0x4e0   :  { %1354 = vmatpush.msra.mxu3 %v2377_v54 }
 0x4e2   :  { %1355 = vmatpush.msra.mxu3 %v2381_v55 }
 0x4e4   :  { %1356 = vmatpush.msra.mxu3 %v2386_v56 }
 0x4e6   :  { %1357 = vmatpush.msra.mxu3 %v2391_v57 }
 0x4e8   :  { %1358 = vmatpush.msra.mxu3 %v2396_v58 }
 0x4ea   :  { %1359 = vmatpush.msra.mxu3 %v2401_v59 }
 0x4ec   :  { %1360 = vmatpush.msra.mxu3 %v2412_v62 }
 0x4f3   :  { %v439_v6 = vpop.permute.xlu1 %438 }
 0x4f4   :  { %v441_v7 = vsel %vm3063_vm7, %v436_v5, %v439_v6 }
 0x4f5   :  { %2013 = vmatmul.msk.f32.vlgmr.msrb.gmra.mxu0 %vm3062_vm8, %v441_v7 }
 0x4f6   :  { %1021 = vmatpush.msrb.mxu0 %v2375_v53 }
 0x4f8   :  { %1022 = vmatpush.msrb.mxu0 %v2377_v54 }
 0x4fa   :  { %1023 = vmatpush.msrb.mxu0 %v2381_v55 }
 0x4fc   :  { %1024 = vmatpush.msrb.mxu0 %v2386_v56 }
 0x4fe   :  { %1025 = vmatpush.msrb.mxu0 %v2391_v57 }
 0x500   :  { %1026 = vmatpush.msrb.mxu0 %v2396_v58 }
 0x502   :  { %1027 = vmatpush.msrb.mxu0 %v2401_v59 }
 0x504   :  { %1028 = vmatpush.msrb.mxu0 %v2412_v62 }
 0x560   :  { %v366_v8 = vpop.f32.mrf.mxu3 }
 0x561   :  { %v367_v10 = vadd.f32 %v366_v8, %v2479_v32 }
 0x563   :  { %v2011_v11 = vmul.f32 -1.442695, %v367_v10 }
 0x565   :  { %2099 = vpow2.f32 %v2011_v11  ;;  %v575_v11 = vld [vmem:[%s3056_s0 + $0x13] sm:$0x1] }
 0x56b   :  { %v2100_v12 = vpop.eup %2099 }
 0x56c   :  { %v372_v13 = vadd.f32 1.0, %v2100_v12 }
 0x56e   :  { %2101 = vrcp.f32 %v372_v13  ;;  %v384_v21 = vand.u32 2147483648, %v372_v13  ;;  %v382_v24 = vand.u32 2147483647, %v372_v13  ;;  %vm378_vm12 = vweird.f32 %v372_v13 }
 0x570   :  { %v385_v27 = vor.u32 1.1754944e-38, %v384_v21  ;;  %vm383_vm9 = vcmp.eq.f32.partialorder %v382_v24, 8.507059e+37 }
 0x572   :  { %v462_v14 = vpop.f32.mrf.mxu0 }
 0x573   :  { %v463_v15 = vadd.f32 %v462_v14, %v2366_v29  ;;  %v576_v14 = vld [vmem:[%s3056_s0 + $0x1b] sm:$0x1] }
 0x574   :  { %v2102_v17 = vpop.eup %2101  ;;  %v593_v21 = vrot.slane %v576_v14, 5 }
 0x575   :  { %v374_v18 = vmul.f32 %v2102_v17, %v372_v13  ;;  %v2014_v19 = vmul.f32 -1.442695, %v463_v15  ;;  %vm379_vm11 = vweird.f32 %v2102_v17  ;;  %v573_v13 = vld [vmem:[%s3056_s0 + $0x3] sm:$0x1]  ;;  %v591_v15 = vrot.slane %v575_v11, 6 }
 0x576   :  { %vm380_vm15 = vmor %vm378_vm12, %vm379_vm11 }
 0x577   :  { %v375_v20 = vsub.f32 1.0, %v374_v18  ;;  %2103 = vpow2.f32 %v2014_v19 }
 0x579   :  { %v376_v23 = vmul.f32 %v2102_v17, %v375_v20  ;;  %v577_v20 = vld [vmem:[%s3056_s0 + $0x23] sm:$0x1] }
 0x57b   :  { %v377_v25 = vadd.f32 %v2102_v17, %v376_v23 }
 0x57d   :  { %v2104_v30 = vpop.eup %2103  ;;  %v381_v31 = vsel %vm380_vm15, %v2102_v17, %v377_v25  ;;  %v578_v25 = vld [vmem:[%s3056_s0 + $0x2b] sm:$0x1] }
 0x57e   :  { %v468_v33 = vadd.f32 1.0, %v2104_v30  ;;  %v386_v34 = vsel %vm383_vm9, %v385_v27, %v381_v31  ;;  %v595_v27 = vrot.slane %v577_v20, 4  ;;  %v579_v31 = vld [vmem:[%s3056_s0 + $0x33] sm:$0x1] }
 0x57f   :  { %v388_v51 = vmul.f32 2.0, %v386_v34  ;;  %v390_v52 = vmul.f32 %v386_v34, %v2487_v22 }
 0x580   :  { %2105 = vrcp.f32 %v468_v33  ;;  %v480_v39 = vand.u32 2147483648, %v468_v33  ;;  %v478_v41 = vand.u32 2147483647, %v468_v33  ;;  %vm474_vm11 = vweird.f32 %v468_v33 }
 0x581   :  { %v2012_v35 = vadd.f32 -1.0, %v388_v51  ;;  %v580_v51 = vld [vmem:[%s3056_s0 + $0x3b] sm:$0x1] }
 0x582   :  { %v481_v43 = vor.u32 1.1754944e-38, %v480_v39  ;;  %vm479_vm15 = vcmp.eq.f32.partialorder %v478_v41, 8.507059e+37 }
 0x583   :  { %392 = vrot.lane.b32.xlu2 %v2012_v35, %s2260_s17  ;;  %v599_v35 = vrot.slane %v579_v31, 2  ;;  %v741_v31 = vld [vmem:[%s3056_s0 + $0x14] sm:$0x1] }
 0x586   :  { %v2106_v36 = vpop.eup %2105 }
 0x587   :  { %v470_v37 = vmul.f32 %v2106_v36, %v468_v33  ;;  %vm475_vm10 = vweird.f32 %v2106_v36  ;;  %v597_v33 = vrot.slane %v578_v25, 3 }
 0x588   :  { %vm476_vm12 = vmor %vm474_vm11, %vm475_vm10 }
 0x589   :  { %v471_v38 = vsub.f32 1.0, %v470_v37 }
 0x58b   :  { %v472_v40 = vmul.f32 %v2106_v36, %v471_v38 }
 0x58d   :  { %v473_v42 = vadd.f32 %v2106_v36, %v472_v40 }
 0x58f   :  { %v477_v44 = vsel %vm476_vm12, %v2106_v36, %v473_v42 }
 0x590   :  { %v482_v28 = vsel %vm479_vm15, %v481_v43, %v477_v44 }
 0x591   :  { %v484_v45 = vmul.f32 2.0, %v482_v28  ;;  %v486_v3 = vmul.f32 %v482_v28, %v2492_v26  ;;  %v574_v26 = vld [vmem:[%s3056_s0 + $0xb] sm:$0x1] }
 0x592   :  { %v589_v12 = vrot.slane %v574_v26, 7 }
 0x593   :  { %v2015_v46 = vadd.f32 -1.0, %v484_v45 }
 0x594   :  { %v590_v17 = vsel %vm88_vm0, %v589_v12, %v573_v13 }
 0x595   :  { %488 = vrot.lane.b32.xlu0 %v2015_v46, %s2260_s17  ;;  %v592_v24 = vsel %vm91_vm1, %v591_v15, %v590_v17 }
 0x596   :  { %v594_v30 = vsel %vm94_vm2, %v593_v21, %v592_v24 }
 0x5dd   :  { %v393_v47 = vpop.permute.xlu2 %392 }
 0x5de   :  { %v395_v48 = vmul.f32 %v393_v47, %v386_v34 }
 0x5e0   :  { %397 = vrot.lane.b32.xlu1 %v395_v48, %s2261_s18 }
 0x607   :  { %v489_v49 = vpop.permute.xlu0 %488 }
 0x608   :  { %v491_v50 = vmul.f32 %v489_v49, %v482_v28 }
 0x60a   :  { %493 = vrot.lane.b32.xlu2 %v491_v50, %s2261_s18 }
 0x652   :  { %v398_v60 = vpop.permute.xlu1 %397 }
 0x653   :  { %v2557_v61 = vadd.f32 %v398_v60, %v390_v52 }
 0x655   :  { %2107 = vtanh.f32 %v2557_v61 }
 0x65b   :  { %v2108_v63 = vpop.eup %2107 }
 0x65c   :  { %403 = vrot.lane.b32.xlu0 %v2108_v63, %s2260_s17 }
 0x664   :  { %v494_v4 = vpop.permute.xlu2 %493 }
 0x665   :  { %v2562_v5 = vadd.f32 %v494_v4, %v486_v3 }
 0x667   :  { %2109 = vtanh.f32 %v2562_v5 }
 0x66d   :  { %v2110_v6 = vpop.eup %2109 }
 0x66e   :  { %499 = vrot.lane.b32.xlu1 %v2110_v6, %s2260_s17 }
 0x6ce   :  { %v404_v7 = vpop.permute.xlu0 %403 }
 0x6cf   :  { %v406_v22 = vmul.f32 %v404_v7, %v386_v34  ;;  %v596_v34 = vsel %vm97_vm3, %v595_v27, %v594_v30 }
 0x6d1   :  { %508 = vrot.lane.b32.xlu0 %v406_v22, %s2260_s17 }
 0x6e0   :  { %v500_v8 = vpop.permute.xlu1 %499 }
 0x6e1   :  { %v502_v10 = vmul.f32 %v500_v8, %v482_v28 }
 0x6e3   :  { %604 = vrot.lane.b32.xlu1 %v502_v10, %s2262_s19  ;;  %504 = vrot.lane.b32.xlu2 %v502_v10, %s2261_s18 }
 0x73d   :  { %v505_v18 = vpop.permute.xlu2 %504 }
 0x743   :  { %v509_v19 = vpop.permute.xlu0 %508 }
 0x744   :  { %v511_v23 = vsel %vm177_vm13, %v505_v18, %v509_v19 }
 0x745   :  { %2016 = vmatmul.msk.f32.vlgmr.msrb.gmra.mxu2 %vm3064_vm14, %v511_v23 }
 0x746   :  { %1187 = vmatpush.msrb.mxu2 %v2375_v53  ;;  %v598_v53 = vsel %vm100_vm4, %v597_v33, %v596_v34  ;;  %v739_v34 = vld [vmem:[%s3056_s0 + $0x4] sm:$0x1] }
 0x747   :  { %v600_v36 = vsel %vm103_vm5, %v599_v35, %v598_v53  ;;  %v757_v35 = vrot.slane %v741_v31, 6 }
 0x748   :  { %1188 = vmatpush.msrb.mxu2 %v2377_v54  ;;  %v601_v54 = vrot.slane %v580_v51, 1  ;;  %v742_v51 = vld [vmem:[%s3056_s0 + $0x1c] sm:$0x1] }
 0x74a   :  { %1189 = vmatpush.msrb.mxu2 %v2381_v55  ;;  %v602_v55 = vsel %vm106_vm6, %v601_v54, %v600_v36  ;;  %v743_v54 = vld [vmem:[%s3056_s0 + $0x24] sm:$0x1]  ;;  %v759_v36 = vrot.slane %v742_v51, 5 }
 0x74c   :  { %1190 = vmatpush.msrb.mxu2 %v2386_v56 }
 0x74e   :  { %1191 = vmatpush.msrb.mxu2 %v2391_v57 }
 0x750   :  { %1192 = vmatpush.msrb.mxu2 %v2396_v58 }
 0x752   :  { %1193 = vmatpush.msrb.mxu2 %v2401_v59 }
 0x754   :  { %1194 = vmatpush.msrb.mxu2 %v2412_v62 }
 0x755   :  { %v605_v37 = vpop.permute.xlu1 %604 }
 0x756   :  { %v607_v38 = vsel %vm3063_vm7, %v602_v55, %v605_v37  ;;  %v744_v37 = vld [vmem:[%s3056_s0 + $0x2c] sm:$0x1] }
 0x757   :  { %2019 = vmatmul.msk.f32.vlgmr.msrb.gmra.mxu1 %vm3062_vm8, %v607_v38  ;;  %v761_v38 = vrot.slane %v743_v54, 4 }
 0x758   :  { %1120 = vmatpush.msrb.mxu1 %v2297_v0 }
 0x75a   :  { %1121 = vmatpush.msrb.mxu1 %v2299_v1 }
 0x75c   :  { %1122 = vmatpush.msrb.mxu1 %v2302_v2 }
 0x75e   :  { %1123 = vmatpush.msrb.mxu1 %v2325_v9 }
 0x760   :  { %1124 = vmatpush.msrb.mxu1 %v2335_v16 }
 0x7c8   :  { %v532_v56 = vpop.f32.mrf.mxu2 }
 0x7c9   :  { %v533_v57 = vadd.f32 %v532_v56, %v2479_v32 }
 0x7cb   :  { %v2017_v58 = vmul.f32 -1.442695, %v533_v57 }
 0x7cd   :  { %2111 = vpow2.f32 %v2017_v58 }
 0x7d3   :  { %v2112_v59 = vpop.eup %2111 }
 0x7d4   :  { %v538_v62 = vadd.f32 1.0, %v2112_v59  ;;  %v628_v39 = vpop.f32.mrf.mxu1  ;;  %v745_v59 = vld [vmem:[%s3056_s0 + $0x34] sm:$0x1] }
 0x7d5   :  { %v629_v40 = vadd.f32 %v628_v39, %v2366_v29 }
 0x7d6   :  { %2113 = vrcp.f32 %v538_v62  ;;  %v550_v43 = vand.u32 2147483648, %v538_v62  ;;  %v548_v44 = vand.u32 2147483647, %v538_v62  ;;  %vm544_vm10 = vweird.f32 %v538_v62 }
 0x7d7   :  { %v2020_v0 = vmul.f32 -1.442695, %v629_v40 }
 0x7d8   :  { %v551_v45 = vor.u32 1.1754944e-38, %v550_v43  ;;  %vm549_vm12 = vcmp.eq.f32.partialorder %v548_v44, 8.507059e+37 }
 0x7d9   :  { %2115 = vpow2.f32 %v2020_v0  ;;  %v746_v0 = vld [vmem:[%s3056_s0 + $0x3c] sm:$0x1] }
 0x7dc   :  { %v2114_v1 = vpop.eup %2113 }
 0x7dd   :  { %v540_v41 = vmul.f32 %v2114_v1, %v538_v62  ;;  %vm545_vm9 = vweird.f32 %v2114_v1  ;;  %v763_v62 = vrot.slane %v744_v37, 3 }
 0x7de   :  { %vm546_vm11 = vmor %vm544_vm10, %vm545_vm9 }
 0x7df   :  { %v2116_v2 = vpop.eup %2115  ;;  %v541_v42 = vsub.f32 1.0, %v540_v41 }
 0x7e0   :  { %v634_v9 = vadd.f32 1.0, %v2116_v2  ;;  %v767_v2 = vrot.slane %v746_v0, 1  ;;  %v908_v0 = vld [vmem:[%s3056_s0 + $0x1d] sm:$0x1] }
 0x7e1   :  { %v542_v16 = vmul.f32 %v2114_v1, %v541_v42 }
 0x7e2   :  { %2117 = vrcp.f32 %v634_v9  ;;  %v646_v63 = vand.u32 2147483648, %v634_v9  ;;  %v644_v4 = vand.u32 2147483647, %v634_v9  ;;  %vm640_vm8 = vweird.f32 %v634_v9 }
 0x7e3   :  { %v543_v28 = vadd.f32 %v2114_v1, %v542_v16 }
 0x7e4   :  { %v647_v7 = vor.u32 1.1754944e-38, %v646_v63  ;;  %vm645_vm9 = vcmp.eq.f32.partialorder %v644_v4, 8.507059e+37 }
 0x7e5   :  { %v547_v46 = vsel %vm546_vm11, %v2114_v1, %v543_v28  ;;  %v765_v1 = vrot.slane %v745_v59, 2 }
 0x7e6   :  { %v552_v47 = vsel %vm549_vm12, %v551_v45, %v547_v46 }
 0x7e7   :  { %v554_v48 = vmul.f32 2.0, %v552_v47  ;;  %v556_v15 = vmul.f32 %v552_v47, %v2557_v61 }
 0x7e8   :  { %v2118_v49 = vpop.eup %2117 }
 0x7e9   :  { %v636_v50 = vmul.f32 %v2118_v49, %v634_v9  ;;  %v2018_v52 = vadd.f32 -1.0, %v554_v48  ;;  %vm641_vm15 = vweird.f32 %v2118_v49 }
 0x7ea   :  { %vm642_vm7 = vmor %vm640_vm8, %vm641_vm15  ;;  %vm3066_vm8 = vcmask 326656  }
 0x7eb   :  { %v637_v60 = vsub.f32 1.0, %v636_v50  ;;  %558 = vrot.lane.b32.xlu2 %v2018_v52, %s2260_s17 }
 0x7ed   :  { %v638_v3 = vmul.f32 %v2118_v49, %v637_v60 }
 0x7ef   :  { %v639_v6 = vadd.f32 %v2118_v49, %v638_v3 }
 0x7f1   :  { %v643_v22 = vsel %vm642_vm7, %v2118_v49, %v639_v6  ;;  %vm3065_vm7 = vcmask 64512  }
 0x7f2   :  { %v648_v8 = vsel %vm645_vm9, %v647_v7, %v643_v22 }
 0x7f3   :  { %v650_v10 = vmul.f32 2.0, %v648_v8  ;;  %v652_v20 = vmul.f32 %v648_v8, %v2562_v5  ;;  %v740_v5 = vld [vmem:[%s3056_s0 + $0xc] sm:$0x1] }
 0x7f4   :  { %v755_v33 = vrot.slane %v740_v5, 7 }
 0x7f5   :  { %v2021_v26 = vadd.f32 -1.0, %v650_v10 }
 0x7f6   :  { %v756_v53 = vsel %vm88_vm0, %v755_v33, %v739_v34 }
 0x7f7   :  { %654 = vrot.lane.b32.xlu0 %v2021_v26, %s2260_s17  ;;  %v758_v55 = vsel %vm91_vm1, %v757_v35, %v756_v53 }
 0x7f8   :  { %v760_v56 = vsel %vm94_vm2, %v759_v36, %v758_v55 }
 0x7f9   :  { %v762_v40 = vsel %vm97_vm3, %v761_v38, %v760_v56 }
 0x7fa   :  { %v764_v41 = vsel %vm100_vm4, %v763_v62, %v762_v40  ;;  %v907_v62 = vld [vmem:[%s3056_s0 + $0x15] sm:$0x1]  ;;  %v905_v40 = vld [vmem:[%s3056_s0 + $0x5] sm:$0x1] }
 0x7fb   :  { %v766_v42 = vsel %vm103_vm5, %v765_v1, %v764_v41  ;;  %v923_v1 = vrot.slane %v907_v62, 6 }
 0x7fc   :  { %v768_v9 = vsel %vm106_vm6, %v767_v2, %v766_v42  ;;  %v909_v2 = vld [vmem:[%s3056_s0 + $0x25] sm:$0x1]  ;;  %v925_v42 = vrot.slane %v908_v0, 5 }
 0x845   :  { %v559_v11 = vpop.permute.xlu2 %558 }
 0x846   :  { %v561_v12 = vmul.f32 %v559_v11, %v552_v47 }
 0x848   :  { %563 = vrot.lane.b32.xlu1 %v561_v12, %s2261_s18 }
 0x869   :  { %v655_v13 = vpop.permute.xlu0 %654 }
 0x86a   :  { %v657_v14 = vmul.f32 %v655_v13, %v648_v8 }
 0x86c   :  { %659 = vrot.lane.b32.xlu2 %v657_v14, %s2261_s18 }
 0x8ba   :  { %v564_v17 = vpop.permute.xlu1 %563 }
 0x8bb   :  { %v2624_v18 = vadd.f32 %v564_v17, %v556_v15 }
 0x8bd   :  { %2119 = vtanh.f32 %v2624_v18 }
 0x8c3   :  { %v2120_v19 = vpop.eup %2119 }
 0x8c4   :  { %569 = vrot.lane.b32.xlu0 %v2120_v19, %s2260_s17 }
 0x8c6   :  { %v660_v21 = vpop.permute.xlu2 %659 }
 0x8c7   :  { %v2629_v23 = vadd.f32 %v660_v21, %v652_v20 }
 0x8c9   :  { %2121 = vtanh.f32 %v2629_v23 }
 0x8cf   :  { %v2122_v24 = vpop.eup %2121 }
 0x8d0   :  { %665 = vrot.lane.b32.xlu1 %v2122_v24, %s2260_s17 }
 0x936   :  { %v570_v25 = vpop.permute.xlu0 %569 }
 0x937   :  { %v572_v61 = vmul.f32 %v570_v25, %v552_v47 }
 0x939   :  { %674 = vrot.lane.b32.xlu0 %v572_v61, %s2260_s17 }
 0x942   :  { %v666_v27 = vpop.permute.xlu1 %665 }
 0x943   :  { %v668_v30 = vmul.f32 %v666_v27, %v648_v8 }
 0x945   :  { %770 = vrot.lane.b32.xlu1 %v668_v30, %s2262_s19  ;;  %670 = vrot.lane.b32.xlu2 %v668_v30, %s2261_s18 }
 0x99f   :  { %v671_v57 = vpop.permute.xlu2 %670 }
 0x9ab   :  { %v675_v58 = vpop.permute.xlu0 %674 }
 0x9ac   :  { %v677_v39 = vsel %vm177_vm13, %v671_v57, %v675_v58 }
 0x9ad   :  { %2022 = vmatmul.msk.f32.vlgmr.msrb.gmra.mxu3 %vm3064_vm14, %v677_v39 }
 0x9b7   :  { %v771_v43 = vpop.permute.xlu1 %770 }
 0x9b8   :  { %v773_v16 = vsel %vm3065_vm7, %v768_v9, %v771_v43  ;;  %v910_v43 = vld [vmem:[%s3056_s0 + $0x2d] sm:$0x1] }
 0x9b9   :  { %2025 = vmatmul.msk.f32.vlgmr.msra.gmra.mxu0 %vm3066_vm8, %v773_v16  ;;  %v927_v16 = vrot.slane %v909_v2, 4 }
 0xa30   :  { %v698_v44 = vpop.f32.mrf.mxu3 }
 0xa31   :  { %v699_v28 = vadd.f32 %v698_v44, %v2479_v32 }
 0xa33   :  { %v2023_v45 = vmul.f32 -1.442695, %v699_v28  ;;  %v911_v28 = vld [vmem:[%s3056_s0 + $0x35] sm:$0x1] }
 0xa35   :  { %2123 = vpow2.f32 %v2023_v45  ;;  %v929_v45 = vrot.slane %v910_v43, 3 }
 0xa36   :  { %v794_v46 = vpop.f32.mrf.mxu0 }
 0xa37   :  { %v795_v47 = vadd.f32 %v794_v46, %v2366_v29 }
 0xa39   :  { %v2026_v48 = vmul.f32 -1.442695, %v795_v47  ;;  %v912_v47 = vld [vmem:[%s3056_s0 + $0x3d] sm:$0x1] }
 0xa3b   :  { %v2124_v49 = vpop.eup %2123  ;;  %2125 = vpow2.f32 %v2026_v48  ;;  %v931_v48 = vrot.slane %v911_v28, 2 }
 0xa3c   :  { %v704_v50 = vadd.f32 1.0, %v2124_v49 }
 0xa3e   :  { %2127 = vrcp.f32 %v704_v50  ;;  %v716_v6 = vand.u32 2147483648, %v704_v50  ;;  %v714_v22 = vand.u32 2147483647, %v704_v50  ;;  %vm710_vm11 = vweird.f32 %v704_v50 }
 0xa40   :  { %v717_v11 = vor.u32 1.1754944e-38, %v716_v6  ;;  %vm715_vm15 = vcmp.eq.f32.partialorder %v714_v22, 8.507059e+37  ;;  %v2225_v22 = vld [vmem:[#allocation2 + $0x20] sm:$0xff] }
 0xa41   :  { %v2126_v52 = vpop.eup %2125 }
 0xa42   :  { %v800_v60 = vadd.f32 1.0, %v2126_v52 }
 0xa44   :  { %v2128_v63 = vpop.eup %2127  ;;  %2129 = vrcp.f32 %v800_v60  ;;  %v812_v15 = vand.u32 2147483648, %v800_v60  ;;  %v810_v20 = vand.u32 2147483647, %v800_v60  ;;  %vm806_vm7 = vweird.f32 %v800_v60 }
 0xa45   :  { %v706_v3 = vmul.f32 %v2128_v63, %v704_v50  ;;  %vm711_vm10 = vweird.f32 %v2128_v63  ;;  %v933_v50 = vrot.slane %v912_v47, 1 }
 0xa46   :  { %vm712_vm12 = vmor %vm710_vm11, %vm711_vm10  ;;  %v813_v25 = vor.u32 1.1754944e-38, %v812_v15  ;;  %vm811_vm14 = vcmp.eq.f32.partialorder %v810_v20, 8.507059e+37  ;;  %vm3068_vm10 = vcmask 326656   ;;  %vm3069_vm11 = vcmask 523264  }
 0xa47   :  { %v707_v4 = vsub.f32 1.0, %v706_v3 }
 0xa49   :  { %v708_v7 = vmul.f32 %v2128_v63, %v707_v4 }
 0xa4a   :  { %v2130_v8 = vpop.eup %2129 }
 0xa4b   :  { %v802_v10 = vmul.f32 %v2130_v8, %v800_v60  ;;  %v709_v26 = vadd.f32 %v2128_v63, %v708_v7  ;;  %vm807_vm9 = vweird.f32 %v2130_v8 }
 0xa4c   :  { %vm808_vm8 = vmor %vm806_vm7, %vm807_vm9 }
 0xa4d   :  { %v803_v12 = vsub.f32 1.0, %v802_v10  ;;  %v713_v13 = vsel %vm712_vm12, %v2128_v63, %v709_v26  ;;  %v2227_v10 = vld [vmem:[#allocation2 + $0x10] sm:$0xff]  ;;  %v2228_v26 = vld [vmem:[#allocation2 + $0x8] sm:$0xff] }
 0xa4e   :  { %v718_v14 = vsel %vm715_vm15, %v717_v11, %v713_v13  ;;  %v2229_v11 = vld [vmem:[#allocation2] sm:$0xff] }
 0xa4f   :  { %v720_v17 = vmul.f32 2.0, %v718_v14  ;;  %v804_v19 = vmul.f32 %v2130_v8, %v803_v12  ;;  %v722_v35 = vmul.f32 %v718_v14, %v2624_v18 }
 0xa51   :  { %v2024_v21 = vadd.f32 -1.0, %v720_v17  ;;  %v805_v24 = vadd.f32 %v2130_v8, %v804_v19 }
 0xa53   :  { %724 = vrot.lane.b32.xlu0 %v2024_v21, %s2260_s17  ;;  %v809_v61 = vsel %vm808_vm8, %v2130_v8, %v805_v24  ;;  %v2226_v8 = vld [vmem:[#allocation2 + $0x18] sm:$0xff] }
 0xa54   :  { %v814_v27 = vsel %vm811_vm14, %v813_v25, %v809_v61  ;;  %vm3067_vm14 = vcmask 64512  }
 0xa55   :  { %v816_v30 = vmul.f32 2.0, %v814_v27  ;;  %v818_v36 = vmul.f32 %v814_v27, %v2629_v23  ;;  %v906_v23 = vld [vmem:[%s3056_s0 + $0xd] sm:$0x1] }
 0xa56   :  { %v921_v39 = vrot.slane %v906_v23, 7 }
 0xa57   :  { %v2027_v5 = vadd.f32 -1.0, %v816_v30 }
 0xa58   :  { %v922_v41 = vsel %vm88_vm0, %v921_v39, %v905_v40 }
 0xa59   :  { %820 = vrot.lane.b32.xlu2 %v2027_v5, %s2260_s17  ;;  %v924_v9 = vsel %vm91_vm1, %v923_v1, %v922_v41 }
 0xa5a   :  { %v926_v44 = vsel %vm94_vm2, %v925_v42, %v924_v9 }
 0xa5b   :  { %v928_v46 = vsel %vm97_vm3, %v927_v16, %v926_v44 }
 0xa5c   :  { %v930_v49 = vsel %vm100_vm4, %v929_v45, %v928_v46 }
 0xa5d   :  { %v932_v52 = vsel %vm103_vm5, %v931_v48, %v930_v49 }
 0xa5e   :  { %v934_v60 = vsel %vm106_vm6, %v933_v50, %v932_v52 }
 0xab3   :  { %v821_v31 = vpop.permute.xlu2 %820 }
 0xab4   :  { %v823_v33 = vmul.f32 %v821_v31, %v814_v27 }
 0xab6   :  { %825 = vrot.lane.b32.xlu1 %v823_v33, %s2261_s18 }
 0xac5   :  { %v725_v34 = vpop.permute.xlu0 %724 }
 0xac6   :  { %v727_v51 = vmul.f32 %v725_v34, %v718_v14 }
 0xac8   :  { %729 = vrot.lane.b32.xlu2 %v727_v51, %s2261_s18 }
 0xb22   :  { %v730_v53 = vpop.permute.xlu2 %729 }
 0xb23   :  { %v2678_v54 = vadd.f32 %v730_v53, %v722_v35 }
 0xb25   :  { %2131 = vtanh.f32 %v2678_v54 }
 0xb28   :  { %v826_v55 = vpop.permute.xlu1 %825 }
 0xb29   :  { %v2682_v37 = vadd.f32 %v826_v55, %v818_v36 }
 0xb2b   :  { %v2132_v38 = vpop.eup %2131  ;;  %2133 = vtanh.f32 %v2682_v37 }
 0xb2c   :  { %735 = vrot.lane.b32.xlu1 %v2132_v38, %s2260_s17 }
 0xb31   :  { %v2134_v56 = vpop.eup %2133 }
 0xb32   :  { %831 = vrot.lane.b32.xlu0 %v2134_v56, %s2260_s17 }
 0xb9e   :  { %v736_v57 = vpop.permute.xlu1 %735 }
 0xb9f   :  { %v738_v18 = vmul.f32 %v736_v57, %v718_v14 }
 0xba1   :  { %840 = vrot.lane.b32.xlu1 %v738_v18, %s2260_s17 }
 0xba4   :  { %v832_v58 = vpop.permute.xlu0 %831 }
 0xba5   :  { %v834_v59 = vmul.f32 %v832_v58, %v814_v27 }
 0xba7   :  { %836 = vrot.lane.b32.xlu0 %v834_v59, %s2261_s18  ;;  %936 = vrot.lane.b32.xlu2 %v834_v59, %s2262_s19 }
 0xc01   :  { %v937_v63 = vpop.permute.xlu2 %936 }
 0xc02   :  { %v939_v3 = vsel %vm3067_vm14, %v934_v60, %v937_v63  ;;  %v1073_v60 = vld [vmem:[%s3056_s0 + $0x16] sm:$0x1] }
 0xc03   :  { %2031 = vmatmul.msk.f32.vlgmr.msra.gmra.mxu2 %vm3068_vm10, %v939_v3  ;;  %v1071_v3 = vld [vmem:[%s3056_s0 + $0x6] sm:$0x1] }
 0xc13   :  { %v841_v4 = vpop.permute.xlu1 %840 }
 0xc19   :  { %v837_v6 = vpop.permute.xlu0 %836 }
 0xc1a   :  { %v843_v7 = vsel %vm177_vm13, %v837_v6, %v841_v4  ;;  %v1074_v4 = vld [vmem:[%s3056_s0 + $0x1e] sm:$0x1]  ;;  %v1089_v6 = vrot.slane %v1073_v60, 6 }
 0xc1b   :  { %2028 = vmatmul.msk.f32.vlgmr.msra.gmra.mxu1 %vm3069_vm11, %v843_v7 }
 0xc1c   :  { %1286 = vmatpush.msra.mxu1 %v2225_v22  ;;  %v1075_v22 = vld [vmem:[%s3056_s0 + $0x26] sm:$0x1] }
 0xc1e   :  { %1287 = vmatpush.msra.mxu1 %v2226_v8  ;;  %v1091_v8 = vrot.slane %v1074_v4, 5 }
 0xc20   :  { %1288 = vmatpush.msra.mxu1 %v2227_v10 }
 0xc22   :  { %1289 = vmatpush.msra.mxu1 %v2228_v26  ;;  %v1076_v26 = vld [vmem:[%s3056_s0 + $0x2e] sm:$0x1] }
 0xc24   :  { %1290 = vmatpush.msra.mxu1 %v2229_v11  ;;  %v1093_v11 = vrot.slane %v1075_v22, 4 }
 0xc86   :  { %v960_v12 = vpop.f32.mrf.mxu2 }
 0xc87   :  { %v961_v13 = vadd.f32 %v960_v12, %v2366_v29 }
 0xc89   :  { %v2032_v14 = vmul.f32 -1.442695, %v961_v13  ;;  %v1077_v13 = vld [vmem:[%s3056_s0 + $0x36] sm:$0x1] }
 0xc8b   :  { %2135 = vpow2.f32 %v2032_v14  ;;  %v1095_v14 = vrot.slane %v1076_v26, 3 }
 0xc91   :  { %v2136_v15 = vpop.eup %2135 }
 0xc92   :  { %v966_v17 = vadd.f32 1.0, %v2136_v15 }
 0xc94   :  { %2137 = vrcp.f32 %v966_v17  ;;  %v978_v27 = vand.u32 2147483648, %v966_v17  ;;  %v976_v5 = vand.u32 2147483647, %v966_v17  ;;  %vm972_vm15 = vweird.f32 %v966_v17 }
 0xc96   :  { %v979_v33 = vor.u32 1.1754944e-38, %v978_v27  ;;  %vm977_vm7 = vcmp.eq.f32.partialorder %v976_v5, 8.507059e+37 }
 0xc98   :  { %v864_v19 = vpop.f32.mrf.mxu1 }
 0xc99   :  { %v865_v20 = vadd.f32 %v864_v19, %v2479_v32  ;;  %v1097_v19 = vrot.slane %v1077_v13, 2 }
 0xc9a   :  { %v2138_v21 = vpop.eup %2137 }
 0xc9b   :  { %v968_v24 = vmul.f32 %v2138_v21, %v966_v17  ;;  %v2029_v25 = vmul.f32 -1.442695, %v865_v20  ;;  %vm973_vm12 = vweird.f32 %v2138_v21  ;;  %v1078_v17 = vld [vmem:[%s3056_s0 + $0x3e] sm:$0x1] }
 0xc9c   :  { %vm974_vm9 = vmor %vm972_vm15, %vm973_vm12  ;;  %vm3070_vm12 = vcmask 64512   ;;  %vm3071_vm15 = vcmask 326656  }
 0xc9d   :  { %v969_v61 = vsub.f32 1.0, %v968_v24  ;;  %2139 = vpow2.f32 %v2029_v25 }
 0xc9f   :  { %v970_v30 = vmul.f32 %v2138_v21, %v969_v61 }
 0xca1   :  { %v971_v31 = vadd.f32 %v2138_v21, %v970_v30 }
 0xca3   :  { %v2140_v34 = vpop.eup %2139  ;;  %v975_v51 = vsel %vm974_vm9, %v2138_v21, %v971_v31  ;;  %v1099_v21 = vrot.slane %v1078_v17, 1  ;;  %vm3072_vm9 = vcmask 523264   ;;  %v1239_v17 = vld [vmem:[%s3056_s0 + $0x17] sm:$0x1] }
 0xca4   :  { %v870_v35 = vadd.f32 1.0, %v2140_v34  ;;  %v980_v53 = vsel %vm977_vm7, %v979_v33, %v975_v51 }
 0xca5   :  { %v982_v36 = vmul.f32 2.0, %v980_v53  ;;  %v984_v43 = vmul.f32 %v980_v53, %v2682_v37 }
 0xca6   :  { %2141 = vrcp.f32 %v870_v35  ;;  %v882_v18 = vand.u32 2147483648, %v870_v35  ;;  %v880_v59 = vand.u32 2147483647, %v870_v35  ;;  %vm876_vm14 = vweird.f32 %v870_v35 }
 0xca7   :  { %v2033_v55 = vadd.f32 -1.0, %v982_v36 }
 0xca8   :  { %v883_v62 = vor.u32 1.1754944e-38, %v882_v18  ;;  %vm881_vm11 = vcmp.eq.f32.partialorder %v880_v59, 8.507059e+37 }
 0xca9   :  { %986 = vrot.lane.b32.xlu0 %v2033_v55, %s2260_s17 }
 0xcac   :  { %v2142_v38 = vpop.eup %2141 }
 0xcad   :  { %v872_v56 = vmul.f32 %v2142_v38, %v870_v35  ;;  %vm877_vm8 = vweird.f32 %v2142_v38 }
 0xcae   :  { %vm878_vm10 = vmor %vm876_vm14, %vm877_vm8 }
 0xcaf   :  { %v873_v57 = vsub.f32 1.0, %v872_v56 }
 0xcb1   :  { %v874_v58 = vmul.f32 %v2142_v38, %v873_v57 }
 0xcb3   :  { %v875_v23 = vadd.f32 %v2142_v38, %v874_v58 }
 0xcb5   :  { %v879_v39 = vsel %vm878_vm10, %v2142_v38, %v875_v23 }
 0xcb6   :  { %v884_v40 = vsel %vm881_vm11, %v883_v62, %v879_v39 }
 0xcb7   :  { %v886_v0 = vmul.f32 2.0, %v884_v40  ;;  %v888_v45 = vmul.f32 %v884_v40, %v2678_v54  ;;  %v1072_v54 = vld [vmem:[%s3056_s0 + $0xe] sm:$0x1] }
 0xcb8   :  { %v1087_v63 = vrot.slane %v1072_v54, 7 }
 0xcb9   :  { %v2030_v1 = vadd.f32 -1.0, %v886_v0 }
 0xcba   :  { %v1088_v7 = vsel %vm88_vm0, %v1087_v63, %v1071_v3 }
 0xcbb   :  { %890 = vrot.lane.b32.xlu2 %v2030_v1, %s2260_s17  ;;  %v1090_v10 = vsel %vm91_vm1, %v1089_v6, %v1088_v7 }
 0xcbc   :  { %v1092_v12 = vsel %vm94_vm2, %v1091_v8, %v1090_v10 }
 0xcbd   :  { %v1094_v15 = vsel %vm97_vm3, %v1093_v11, %v1092_v12 }
 0xcbe   :  { %v1096_v20 = vsel %vm100_vm4, %v1095_v14, %v1094_v15 }
 0xcbf   :  { %v1098_v24 = vsel %vm103_vm5, %v1097_v19, %v1096_v20  ;;  %v1237_v20 = vld [vmem:[%s3056_s0 + $0x7] sm:$0x1] }
 0xcc0   :  { %v1100_v25 = vsel %vm106_vm6, %v1099_v21, %v1098_v24  ;;  %v1240_v21 = vld [vmem:[%s3056_s0 + $0x1f] sm:$0x1]  ;;  %v1255_v24 = vrot.slane %v1239_v17, 6 }
 0xd15   :  { %v891_v41 = vpop.permute.xlu2 %890 }
 0xd16   :  { %v893_v2 = vmul.f32 %v891_v41, %v884_v40 }
 0xd18   :  { %895 = vrot.lane.b32.xlu1 %v893_v2, %s2261_s18 }
 0xd1b   :  { %v987_v42 = vpop.permute.xlu0 %986 }
 0xd1c   :  { %v989_v9 = vmul.f32 %v987_v42, %v980_v53 }
 0xd1e   :  { %991 = vrot.lane.b32.xlu2 %v989_v9, %s2261_s18 }
 0xd78   :  { %v992_v16 = vpop.permute.xlu2 %991 }
 0xd79   :  { %v2732_v44 = vadd.f32 %v992_v16, %v984_v43 }
 0xd7b   :  { %2143 = vtanh.f32 %v2732_v44 }
 0xd81   :  { %v2144_v28 = vpop.eup %2143 }
 0xd82   :  { %997 = vrot.lane.b32.xlu1 %v2144_v28, %s2260_s17 }
 0xd8a   :  { %v896_v46 = vpop.permute.xlu1 %895 }
 0xd8b   :  { %v2737_v47 = vadd.f32 %v896_v46, %v888_v45 }
 0xd8d   :  { %2145 = vtanh.f32 %v2737_v47 }
 0xd93   :  { %v2146_v48 = vpop.eup %2145 }
 0xd94   :  { %901 = vrot.lane.b32.xlu0 %v2146_v48, %s2260_s17 }
 0xdf4   :  { %v998_v49 = vpop.permute.xlu1 %997 }
 0xdf5   :  { %v1000_v37 = vmul.f32 %v998_v49, %v980_v53 }
 0xdf7   :  { %1102 = vrot.lane.b32.xlu1 %v1000_v37, %s2262_s19  ;;  %1002 = vrot.lane.b32.xlu2 %v1000_v37, %s2261_s18 }
 0xe06   :  { %v902_v50 = vpop.permute.xlu0 %901 }
 0xe07   :  { %v904_v52 = vmul.f32 %v902_v50, %v884_v40 }
 0xe09   :  { %1006 = vrot.lane.b32.xlu0 %v904_v52, %s2260_s17 }
 0xe51   :  { %v1003_v30 = vpop.permute.xlu2 %1002 }
 0xe69   :  { %v1103_v61 = vpop.permute.xlu1 %1102 }
 0xe6a   :  { %v1105_v27 = vsel %vm3070_vm12, %v1100_v25, %v1103_v61  ;;  %v1241_v61 = vld [vmem:[%s3056_s0 + $0x27] sm:$0x1] }
 0xe6b   :  { %2037 = vmatmul.msk.f32.vlgmr.msrb.gmra.mxu1 %vm3071_vm15, %v1105_v27  ;;  %v1257_v27 = vrot.slane %v1240_v21, 5 }
 0xe7b   :  { %v1007_v5 = vpop.permute.xlu0 %1006 }
 0xe7c   :  { %v1009_v31 = vsel %vm177_vm13, %v1003_v30, %v1007_v5  ;;  %v1242_v5 = vld [vmem:[%s3056_s0 + $0x2f] sm:$0x1] }
 0xe7d   :  { %2034 = vmatmul.msk.f32.vlgmr.msrb.gmra.mxu0 %vm3072_vm9, %v1009_v31  ;;  %v1259_v31 = vrot.slane %v1241_v61, 4 }
 0xee8   :  { %v1126_v33 = vpop.f32.mrf.mxu1 }
 0xee9   :  { %v1127_v34 = vadd.f32 %v1126_v33, %v2366_v29 }
 0xeeb   :  { %v2038_v51 = vmul.f32 -1.442695, %v1127_v34  ;;  %v1243_v34 = vld [vmem:[%s3056_s0 + $0x37] sm:$0x1] }
 0xeed   :  { %2147 = vpow2.f32 %v2038_v51  ;;  %v1261_v51 = vrot.slane %v1242_v5, 3 }
 0xef3   :  { %v2148_v35 = vpop.eup %2147 }
 0xef4   :  { %v1132_v53 = vadd.f32 1.0, %v2148_v35 }
 0xef6   :  { %2149 = vrcp.f32 %v1132_v53  ;;  %v1144_v58 = vand.u32 2147483648, %v1132_v53  ;;  %v1142_v23 = vand.u32 2147483647, %v1132_v53  ;;  %vm1138_vm8 = vweird.f32 %v1132_v53 }
 0xef8   :  { %v1145_v39 = vor.u32 1.1754944e-38, %v1144_v58  ;;  %vm1143_vm10 = vcmp.eq.f32.partialorder %v1142_v23, 8.507059e+37 }
 0xefa   :  { %v1030_v36 = vpop.f32.mrf.mxu0 }
 0xefb   :  { %v1031_v55 = vadd.f32 %v1030_v36, %v2479_v32  ;;  %v1263_v36 = vrot.slane %v1243_v34, 2  ;;  %v2855_v34 = vld [vmem:[#allocation2 + $0x90] sm:$0xff] }
 0xefc   :  { %v2150_v38 = vpop.eup %2149 }
 0xefd   :  { %v1134_v56 = vmul.f32 %v2150_v38, %v1132_v53  ;;  %v2035_v57 = vmul.f32 -1.442695, %v1031_v55  ;;  %vm1139_vm7 = vweird.f32 %v2150_v38  ;;  %v1244_v53 = vld [vmem:[%s3056_s0 + $0x3f] sm:$0x1] }
 0xefe   :  { %vm1140_vm14 = vmor %vm1138_vm8, %vm1139_vm7 }
 0xeff   :  { %v1135_v18 = vsub.f32 1.0, %v1134_v56  ;;  %2151 = vpow2.f32 %v2035_v57 }
 0xf01   :  { %v1136_v59 = vmul.f32 %v2150_v38, %v1135_v18 }
 0xf03   :  { %v1137_v62 = vadd.f32 %v2150_v38, %v1136_v59 }
 0xf05   :  { %v2152_v40 = vpop.eup %2151  ;;  %v1141_v0 = vsel %vm1140_vm14, %v2150_v38, %v1137_v62  ;;  %v1265_v38 = vrot.slane %v1244_v53, 1 }
 0xf06   :  { %v1036_v1 = vadd.f32 1.0, %v2152_v40  ;;  %v1146_v41 = vsel %vm1143_vm10, %v1145_v39, %v1141_v0 }
 0xf07   :  { %v1148_v2 = vmul.f32 2.0, %v1146_v41  ;;  %v1150_v6 = vmul.f32 %v1146_v41, %v2732_v44 }
 0xf08   :  { %2153 = vrcp.f32 %v1036_v1  ;;  %v1048_v28 = vand.u32 2147483648, %v1036_v1  ;;  %v1046_v46 = vand.u32 2147483647, %v1036_v1  ;;  %vm1042_vm12 = vweird.f32 %v1036_v1 }
 0xf09   :  { %v2039_v42 = vadd.f32 -1.0, %v1148_v2 }
 0xf0a   :  { %v1049_v49 = vor.u32 1.1754944e-38, %v1048_v28  ;;  %vm1047_vm9 = vcmp.eq.f32.partialorder %v1046_v46, 8.507059e+37 }
 0xf0b   :  { %1152 = vrot.lane.b32.xlu0 %v2039_v42, %s2260_s17 }
 0xf0e   :  { %v2154_v9 = vpop.eup %2153 }
 0xf0f   :  { %v1038_v43 = vmul.f32 %v2154_v9, %v1036_v1  ;;  %vm1043_vm11 = vweird.f32 %v2154_v9 }
 0xf10   :  { %vm1044_vm15 = vmor %vm1042_vm12, %vm1043_vm11 }
 0xf11   :  { %v1039_v16 = vsub.f32 1.0, %v1038_v43 }
 0xf13   :  { %v1040_v45 = vmul.f32 %v2154_v9, %v1039_v16 }
 0xf15   :  { %v1041_v48 = vadd.f32 %v2154_v9, %v1040_v45 }
 0xf17   :  { %v1045_v37 = vsel %vm1044_vm15, %v2154_v9, %v1041_v48 }
 0xf18   :  { %v1050_v50 = vsel %vm1047_vm9, %v1049_v49, %v1045_v37 }
 0xf19   :  { %v1052_v52 = vmul.f32 2.0, %v1050_v50  ;;  %v1054_v10 = vmul.f32 %v1050_v50, %v2737_v47  ;;  %v1238_v47 = vld [vmem:[%s3056_s0 + $0xf] sm:$0x1] }
 0xf1a   :  { %v1253_v19 = vrot.slane %v1238_v47, 7 }
 0xf1b   :  { %v2036_v54 = vadd.f32 -1.0, %v1052_v52 }
 0xf1c   :  { %v1254_v25 = vsel %vm88_vm0, %v1253_v19, %v1237_v20  ;;  %vm3073_vm0 = vcmask 64512  }
 0xf1d   :  { %1056 = vrot.lane.b32.xlu2 %v2036_v54, %s2260_s17  ;;  %v1256_v30 = vsel %vm91_vm1, %v1255_v24, %v1254_v25  ;;  %vm3074_vm1 = vcmask 326656  }
 0xf1e   :  { %v1258_v33 = vsel %vm94_vm2, %v1257_v27, %v1256_v30  ;;  %vm3075_vm2 = vcmask 523264  }
 0xf1f   :  { %v1260_v35 = vsel %vm97_vm3, %v1259_v31, %v1258_v33  ;;  %v2849_v33 = vld [vmem:[#allocation2 + $0xa0] sm:$0xff]  ;;  %vm3076_vm11 = vmmov %vm3075_vm2 }
 0xf20   :  { %v1262_v55 = vsel %vm100_vm4, %v1261_v51, %v1260_v35  ;;  %1417 = vmatpush.msra.mxu0 %v2849_v33  ;;  %1552 = vmatpush.msra.mxu2 %v2849_v33 }
 0xf21   :  { %v1264_v56 = vsel %vm103_vm5, %v1263_v36, %v1262_v55  ;;  %1690 = vmatpush.msrb.mxu3 %v2849_v33 }
 0xf22   :  { %v1266_v57 = vsel %vm106_vm6, %v1265_v38, %v1264_v56 }
 0xf77   :  { %v1057_v60 = vpop.permute.xlu2 %1056 }
 0xf78   :  { %v1059_v63 = vmul.f32 %v1057_v60, %v1050_v50 }
 0xf7a   :  { %1061 = vrot.lane.b32.xlu1 %v1059_v63, %s2261_s18 }
 0xf7d   :  { %v1153_v3 = vpop.permute.xlu0 %1152 }
 0xf7e   :  { %v1155_v4 = vmul.f32 %v1153_v3, %v1146_v41 }
 0xf80   :  { %1157 = vrot.lane.b32.xlu2 %v1155_v4, %s2261_s18 }
 0xfda   :  { %v1158_v7 = vpop.permute.xlu2 %1157 }
 0xfdb   :  { %v2786_v22 = vadd.f32 %v1158_v7, %v1150_v6 }
 0xfdd   :  { %2155 = vtanh.f32 %v2786_v22 }
 0xfe3   :  { %v2156_v8 = vpop.eup %2155 }
 0xfe4   :  { %1163 = vrot.lane.b32.xlu1 %v2156_v8, %s2260_s17 }
 0xfec   :  { %v1062_v26 = vpop.permute.xlu1 %1061 }
 0xfed   :  { %v2791_v11 = vadd.f32 %v1062_v26, %v1054_v10 }
 0xfef   :  { %2157 = vtanh.f32 %v2791_v11 }
 0xff5   :  { %v2158_v12 = vpop.eup %2157 }
 0xff6   :  { %1067 = vrot.lane.b32.xlu0 %v2158_v12, %s2260_s17 }
0x1056   :  { %v1164_v13 = vpop.permute.xlu1 %1163 }
0x1057   :  { %v1166_v44 = vmul.f32 %v1164_v13, %v1146_v41 }
0x1059   :  { %1268 = vrot.lane.b32.xlu1 %v1166_v44, %s2262_s19  ;;  %1168 = vrot.lane.b32.xlu2 %v1166_v44, %s2261_s18 }
0x1068   :  { %v1068_v14 = vpop.permute.xlu0 %1067 }
0x1069   :  { %v1070_v15 = vmul.f32 %v1068_v14, %v1050_v50 }
0x106b   :  { %1172 = vrot.lane.b32.xlu0 %v1070_v15, %s2260_s17 }
0x10b3   :  { %v1169_v59 = vpop.permute.xlu2 %1168 }
0x10cb   :  { %v1269_v18 = vpop.permute.xlu1 %1268 }
0x10cc   :  { %v1271_v58 = vsel %vm3073_vm0, %v1266_v57, %v1269_v18  ;;  %v2877_v57 = vld [vmem:[%s3058_s2] sm:$0x1f]  ;;  %s2263_s2 = smov 96  }
0x10cd   :  { %2043 = vmatmul.msk.f32.vlgmr.msra.gmra.mxu1 %vm3074_vm1, %v1271_v58  ;;  %v68_v18 = vperm.slane %v2877_v57, 2 }
0x10dd   :  { %v1173_v23 = vpop.permute.xlu0 %1172 }
0x10de   :  { %v1175_v62 = vsel %vm177_vm13, %v1169_v59, %v1173_v23 }
0x10df   :  { %2040 = vmatmul.msk.f32.vlgmr.msrb.gmra.mxu2 %vm3075_vm2, %v1175_v62 }
0x114a   :  { %v1292_v39 = vpop.f32.mrf.mxu1 }
0x114b   :  { %v1293_v40 = vadd.f32 %v1292_v39, %v2366_v29 }
0x114d   :  { %v2044_v0 = vmul.f32 -1.442695, %v1293_v40 }
0x114f   :  { %2159 = vpow2.f32 %v2044_v0 }
0x1155   :  { %v2160_v1 = vpop.eup %2159 }
0x1156   :  { %v1298_v41 = vadd.f32 1.0, %v2160_v1 }
0x1158   :  { %2161 = vrcp.f32 %v1298_v41  ;;  %v1310_v16 = vand.u32 2147483648, %v1298_v41  ;;  %v1308_v46 = vand.u32 2147483647, %v1298_v41  ;;  %vm1304_vm4 = vweird.f32 %v1298_v41 }
0x115a   :  { %v1311_v29 = vor.u32 1.1754944e-38, %v1310_v16  ;;  %vm1309_vm6 = vcmp.eq.f32.partialorder %v1308_v46, 8.507059e+37 }
0x115e   :  { %v2162_v2 = vpop.eup %2161 }
0x115f   :  { %v1300_v42 = vmul.f32 %v2162_v2, %v1298_v41  ;;  %vm1305_vm3 = vweird.f32 %v2162_v2 }
0x1160   :  { %vm1306_vm5 = vmor %vm1304_vm4, %vm1305_vm3 }
0x1161   :  { %v1301_v9 = vsub.f32 1.0, %v1300_v42 }
0x1162   :  { %v1196_v43 = vpop.f32.mrf.mxu2 }
0x1163   :  { %v1197_v28 = vadd.f32 %v1196_v43, %v2479_v32  ;;  %v1302_v45 = vmul.f32 %v2162_v2, %v1301_v9 }
0x1165   :  { %v2041_v48 = vmul.f32 -1.442695, %v1197_v28  ;;  %v1303_v49 = vadd.f32 %v2162_v2, %v1302_v45 }
0x1167   :  { %2163 = vpow2.f32 %v2041_v48  ;;  %v1307_v37 = vsel %vm1306_vm5, %v2162_v2, %v1303_v49  ;;  %vm3077_vm5 = vmmov %vm3076_vm11 }
0x1168   :  { %v1312_v50 = vsel %vm1309_vm6, %v1311_v29, %v1307_v37 }
0x1169   :  { %v1314_v52 = vmul.f32 2.0, %v1312_v50  ;;  %v1316_v21 = vmul.f32 %v1312_v50, %v2786_v22  ;;  %v2851_v22 = vld [vmem:[#allocation2 + $0x98] sm:$0xff] }
0x116a   :  { %1418 = vmatpush.msra.mxu0 %v2851_v22  ;;  %1553 = vmatpush.msra.mxu2 %v2851_v22 }
0x116b   :  { %v2045_v54 = vadd.f32 -1.0, %v1314_v52  ;;  %1691 = vmatpush.msrb.mxu3 %v2851_v22 }
0x116c   :  { %1419 = vmatpush.msra.mxu0 %v2855_v34  ;;  %1554 = vmatpush.msra.mxu2 %v2855_v34 }
0x116d   :  { %v2164_v60 = vpop.eup %2163  ;;  %1318 = vrot.lane.b32.xlu0 %v2045_v54, %s2260_s17  ;;  %1692 = vmatpush.msrb.mxu3 %v2855_v34 }
0x116e   :  { %v1202_v63 = vadd.f32 1.0, %v2164_v60 }
0x1170   :  { %2165 = vrcp.f32 %v1202_v63  ;;  %v1214_v7 = vand.u32 2147483648, %v1202_v63  ;;  %v1212_v10 = vand.u32 2147483647, %v1202_v63  ;;  %vm1208_vm8 = vweird.f32 %v1202_v63 }
0x1172   :  { %v1215_v12 = vor.u32 1.1754944e-38, %v1214_v7  ;;  %vm1213_vm10 = vcmp.eq.f32.partialorder %v1212_v10, 8.507059e+37 }
0x1176   :  { %v2166_v3 = vpop.eup %2165 }
0x1177   :  { %v1204_v4 = vmul.f32 %v2166_v3, %v1202_v63  ;;  %vm1209_vm7 = vweird.f32 %v2166_v3 }
0x1178   :  { %vm1210_vm14 = vmor %vm1208_vm8, %vm1209_vm7 }
0x1179   :  { %v1205_v6 = vsub.f32 1.0, %v1204_v4 }
0x117b   :  { %v1206_v8 = vmul.f32 %v2166_v3, %v1205_v6 }
0x117d   :  { %v1207_v26 = vadd.f32 %v2166_v3, %v1206_v8 }
0x117f   :  { %v1211_v13 = vsel %vm1210_vm14, %v2166_v3, %v1207_v26 }
0x1180   :  { %v1216_v44 = vsel %vm1213_vm10, %v1215_v12, %v1211_v13  ;;  %vm3078_vm10 = vmmov %vm3077_vm5 }
0x1181   :  { %v1218_v14 = vmul.f32 2.0, %v1216_v44  ;;  %v1220_v27 = vmul.f32 %v1216_v44, %v2791_v11  ;;  %v2860_v11 = vld [vmem:[#allocation2 + $0x88] sm:$0xff] }
0x1182   :  { %1420 = vmatpush.msra.mxu0 %v2860_v11  ;;  %1555 = vmatpush.msra.mxu2 %v2860_v11 }
0x1183   :  { %v2042_v15 = vadd.f32 -1.0, %v1218_v14  ;;  %1693 = vmatpush.msrb.mxu3 %v2860_v11 }
0x1185   :  { %1222 = vrot.lane.b32.xlu2 %v2042_v15, %s2260_s17 }
0x11df   :  { %v1319_v47 = vpop.permute.xlu0 %1318  ;;  %v1223_v17 = vpop.permute.xlu2 %1222 }
0x11e0   :  { %v1321_v19 = vmul.f32 %v1319_v47, %v1312_v50  ;;  %v1225_v20 = vmul.f32 %v1223_v17, %v1216_v44 }
0x11e2   :  { %1323 = vrot.lane.b32.xlu2 %v1321_v19, %s2261_s18  ;;  %1227 = vrot.lane.b32.xlu1 %v1225_v20, %s2261_s18 }
0x123c   :  { %v1324_v24 = vpop.permute.xlu2 %1323 }
0x123d   :  { %v2840_v25 = vadd.f32 %v1324_v24, %v1316_v21 }
0x123f   :  { %2167 = vtanh.f32 %v2840_v25 }
0x1245   :  { %v2168_v61 = vpop.eup %2167 }
0x1246   :  { %1329 = vrot.lane.b32.xlu1 %v2168_v61, %s2260_s17 }
0x1254   :  { %v1228_v30 = vpop.permute.xlu1 %1227 }
0x1255   :  { %v2845_v5 = vadd.f32 %v1228_v30, %v1220_v27 }
0x1257   :  { %2169 = vtanh.f32 %v2845_v5 }
0x125d   :  { %v2170_v31 = vpop.eup %2169 }
0x125e   :  { %1233 = vrot.lane.b32.xlu0 %v2170_v31, %s2260_s17 }
0x12b8   :  { %v1330_v51 = vpop.permute.xlu1 %1329 }
0x12b9   :  { %v1332_v35 = vmul.f32 %v1330_v51, %v1312_v50  ;;  %v64_v51 = vld [vmem:[#allocation2 + $0xe0] sm:$0xff] }
0x12ba   :  { %1483 = vmatpush.msrb.mxu1 %v64_v51  ;;  %1621 = vmatpush.msrb.mxu0 %v64_v51 }
0x12bb   :  { %1334 = vrot.lane.b32.xlu2 %v1332_v35, %s2261_s18  ;;  %v62_v35 = vld [vmem:[#allocation2 + $0xd0] sm:$0xff] }
0x12d0   :  { %v1234_v53 = vpop.permute.xlu0 %1233 }
0x12d1   :  { %v1236_v36 = vmul.f32 %v1234_v53, %v1216_v44  ;;  %v61_v53 = vld [vmem:[#allocation2 + $0xc8] sm:$0xff] }
0x12d3   :  { %1338 = vrot.lane.b32.xlu0 %v1236_v36, %s2260_s17  ;;  %v60_v36 = vld [vmem:[#allocation2 + $0xc0] sm:$0xff] }
0x1315   :  { %v1335_v55 = vpop.permute.xlu2 %1334 }
0x1316   :  { %2049 = vmatmul.msk.f32.vlgmr.msra.gmra.mxu0 %vm177_vm13, %v1335_v55 }
0x1345   :  { %v1339_v38 = vpop.permute.xlu0 %1338 }
0x1346   :  { %v1341_v56 = vsel %vm177_vm13, %v1335_v55, %v1339_v38  ;;  %v59_v55 = vld [vmem:[#allocation2 + $0xb8] sm:$0xff]  ;;  %v58_v38 = vld [vmem:[#allocation2 + $0xb0] sm:$0xff] }
0x1347   :  { %2046 = vmatmul.msk.f32.vlgmr.msra.gmra.mxu3 %vm3076_vm11, %v1341_v56  ;;  %v57_v56 = vld [vmem:[#allocation2 + $0xa8] sm:$0xff] }
0x1393   :  { %v1422_v58 = vpop.f32.mrf.mxu0 }
0x1394   :  { %v1423_v59 = vadd.f32 %v1422_v58, %v68_v18 }
0x1396   :  { %v2050_v23 = vmul.f32 -1.442695, %v1423_v59 }
0x1398   :  { %2171 = vpow2.f32 %v2050_v23  ;;  %v2903_v23 = vperm.slane %v2877_v57, 4 }
0x139e   :  { %v2172_v62 = vpop.eup %2171 }
0x139f   :  { %v1428_v39 = vadd.f32 1.0, %v2172_v62 }
0x13a1   :  { %2173 = vrcp.f32 %v1428_v39  ;;  %v1440_v41 = vand.u32 2147483648, %v1428_v39  ;;  %v1438_v42 = vand.u32 2147483647, %v1428_v39  ;;  %vm1434_vm15 = vweird.f32 %v1428_v39 }
0x13a3   :  { %v1441_v43 = vor.u32 1.1754944e-38, %v1440_v41  ;;  %vm1439_vm0 = vcmp.eq.f32.partialorder %v1438_v42, 8.507059e+37 }
0x13a7   :  { %v2174_v40 = vpop.eup %2173 }
0x13a8   :  { %v1430_v0 = vmul.f32 %v2174_v40, %v1428_v39  ;;  %vm1435_vm12 = vweird.f32 %v2174_v40 }
0x13a9   :  { %vm1436_vm9 = vmor %vm1434_vm15, %vm1435_vm12 }
0x13aa   :  { %v1431_v1 = vsub.f32 1.0, %v1430_v0 }
0x13ac   :  { %v1432_v2 = vmul.f32 %v2174_v40, %v1431_v1 }
0x13ae   :  { %v1433_v9 = vadd.f32 %v2174_v40, %v1432_v2 }
0x13b0   :  { %v1437_v16 = vsel %vm1436_vm9, %v2174_v40, %v1433_v9 }
0x13b1   :  { %v1442_v28 = vsel %vm1439_vm0, %v1441_v43, %v1437_v16  ;;  %vm3079_vm0 = vmmov %vm3077_vm5 }
0x13b2   :  { %v1444_v45 = vmul.f32 2.0, %v1442_v28  ;;  %v1446_v15 = vmul.f32 %v1442_v28, %v2840_v25 }
0x13b4   :  { %v2051_v46 = vadd.f32 -1.0, %v1444_v45 }
0x13b6   :  { %1448 = vrot.lane.b32.xlu2 %v2051_v46, %s2260_s17 }
0x13ca   :  { %v1362_v48 = vpop.f32.mrf.mxu3 }
0x13cb   :  { %v1363_v49 = vadd.f32 %v1362_v48, %v2479_v32 }
0x13cd   :  { %v2047_v29 = vmul.f32 -1.442695, %v1363_v49 }
0x13cf   :  { %2175 = vpow2.f32 %v2047_v29 }
0x13d5   :  { %v2176_v37 = vpop.eup %2175 }
0x13d6   :  { %v1368_v50 = vadd.f32 1.0, %v2176_v37 }
0x13d8   :  { %2177 = vrcp.f32 %v1368_v50  ;;  %v1380_v63 = vand.u32 2147483648, %v1368_v50  ;;  %v1378_v4 = vand.u32 2147483647, %v1368_v50  ;;  %vm1374_vm2 = vweird.f32 %v1368_v50 }
0x13da   :  { %v1381_v7 = vor.u32 1.1754944e-38, %v1380_v63  ;;  %vm1379_vm4 = vcmp.eq.f32.partialorder %v1378_v4, 8.507059e+37  ;;  %v51_v4 = vld [vmem:[#allocation2 + $0x78] sm:$0xff] }
0x13de   :  { %v2178_v52 = vpop.eup %2177 }
0x13df   :  { %v1370_v54 = vmul.f32 %v2178_v52, %v1368_v50  ;;  %vm1375_vm1 = vweird.f32 %v2178_v52 }
0x13e0   :  { %vm1376_vm3 = vmor %vm1374_vm2, %vm1375_vm1 }
0x13e1   :  { %v1371_v60 = vsub.f32 1.0, %v1370_v54 }
0x13e3   :  { %v1372_v3 = vmul.f32 %v2178_v52, %v1371_v60 }
0x13e5   :  { %v1373_v6 = vadd.f32 %v2178_v52, %v1372_v3  ;;  %v52_v3 = vld [vmem:[#allocation2 + $0x80] sm:$0xff] }
0x13e6   :  { %1556 = vmatpush.msra.mxu2 %v52_v3  ;;  %1694 = vmatpush.msrb.mxu3 %v52_v3 }
0x13e7   :  { %v1377_v8 = vsel %vm1376_vm3, %v2178_v52, %v1373_v6  ;;  %v50_v6 = vld [vmem:[#allocation2 + $0x70] sm:$0xff] }
0x13e8   :  { %v1382_v10 = vsel %vm1379_vm4, %v1381_v7, %v1377_v8  ;;  %1557 = vmatpush.msra.mxu2 %v51_v4  ;;  %1695 = vmatpush.msrb.mxu3 %v51_v4 }
0x13e9   :  { %v1384_v32 = vmul.f32 2.0, %v1382_v10  ;;  %v1386_v20 = vmul.f32 %v1382_v10, %v2845_v5  ;;  %v63_v5 = vld [vmem:[#allocation2 + $0xd8] sm:$0xff] }
0x13ea   :  { %1484 = vmatpush.msrb.mxu1 %v63_v5  ;;  %1622 = vmatpush.msrb.mxu0 %v63_v5 }
0x13eb   :  { %v2048_v26 = vadd.f32 -1.0, %v1384_v32  ;;  %1558 = vmatpush.msra.mxu2 %v50_v6  ;;  %1696 = vmatpush.msrb.mxu3 %v50_v6 }
0x13ec   :  { %1485 = vmatpush.msrb.mxu1 %v62_v35  ;;  %1623 = vmatpush.msrb.mxu0 %v62_v35 }
0x13ed   :  { %1388 = vrot.lane.b32.xlu1 %v2048_v26, %s2260_s17 }
0x13ee   :  { %1486 = vmatpush.msrb.mxu1 %v61_v53  ;;  %1624 = vmatpush.msrb.mxu0 %v61_v53 }
0x13f0   :  { %1487 = vmatpush.msrb.mxu1 %v60_v36  ;;  %1625 = vmatpush.msrb.mxu0 %v60_v36 }
0x13f2   :  { %1488 = vmatpush.msrb.mxu1 %v59_v55  ;;  %1626 = vmatpush.msrb.mxu0 %v59_v55 }
0x13f4   :  { %1489 = vmatpush.msrb.mxu1 %v58_v38  ;;  %1627 = vmatpush.msrb.mxu0 %v58_v38 }
0x13f6   :  { %1490 = vmatpush.msrb.mxu1 %v57_v56  ;;  %1628 = vmatpush.msrb.mxu0 %v57_v56 }
0x13f8   :  { %1759 = vmatpush.msra.mxu1 %v64_v51  ;;  %1897 = vmatpush.msra.mxu0 %v64_v51 }
0x13fa   :  { %1760 = vmatpush.msra.mxu1 %v63_v5  ;;  %1898 = vmatpush.msra.mxu0 %v63_v5 }
0x13fc   :  { %1761 = vmatpush.msra.mxu1 %v62_v35  ;;  %1899 = vmatpush.msra.mxu0 %v62_v35 }
0x13fe   :  { %1762 = vmatpush.msra.mxu1 %v61_v53  ;;  %1900 = vmatpush.msra.mxu0 %v61_v53 }
0x1400   :  { %1763 = vmatpush.msra.mxu1 %v60_v36  ;;  %1901 = vmatpush.msra.mxu0 %v60_v36 }
0x1402   :  { %1764 = vmatpush.msra.mxu1 %v59_v55  ;;  %1902 = vmatpush.msra.mxu0 %v59_v55 }
0x1404   :  { %1765 = vmatpush.msra.mxu1 %v58_v38  ;;  %1903 = vmatpush.msra.mxu0 %v58_v38 }
0x1406   :  { %1766 = vmatpush.msra.mxu1 %v57_v56  ;;  %1904 = vmatpush.msra.mxu0 %v57_v56 }
0x1410   :  { %v1449_v12 = vpop.permute.xlu2 %1448 }
0x1411   :  { %v1451_v13 = vmul.f32 %v1449_v12, %v1442_v28 }
0x1413   :  { %1453 = vrot.lane.b32.xlu1 %v1451_v13, %s2261_s18 }
0x145f   :  { %v1389_v44 = vpop.permute.xlu1 %1388 }
0x1460   :  { %v1391_v14 = vmul.f32 %v1389_v44, %v1382_v10 }
0x1462   :  { %1393 = vrot.lane.b32.xlu0 %v1391_v14, %s2261_s18 }
0x1485   :  { %v1454_v47 = vpop.permute.xlu1 %1453 }
0x1486   :  { %v2886_v17 = vadd.f32 %v1454_v47, %v1446_v15 }
0x1488   :  { %2179 = vtanh.f32 %v2886_v17 }
0x148e   :  { %v2180_v19 = vpop.eup %2179 }
0x148f   :  { %1459 = vrot.lane.b32.xlu0 %v2180_v19, %s2260_s17 }
0x14d4   :  { %v1394_v21 = vpop.permute.xlu0 %1393 }
0x14d5   :  { %v2891_v24 = vadd.f32 %v1394_v21, %v1386_v20 }
0x14d7   :  { %2181 = vtanh.f32 %v2891_v24 }
0x14dd   :  { %v2182_v61 = vpop.eup %2181 }
0x14de   :  { %1399 = vrot.lane.b32.xlu2 %v2182_v61, %s2260_s17 }
0x1501   :  { %v1460_v27 = vpop.permute.xlu0 %1459 }
0x1502   :  { %v2895_v25 = vmul.f32 %v1460_v27, %v1442_v28 }
0x1504   :  { %1464 = vrot.lane.b32.xlu1 %v2895_v25, %s2261_s18 }
0x1538   :  { %v1400_v30 = vpop.permute.xlu2 %1399 }
0x1539   :  { %v1402_v31 = vmul.f32 %v1400_v30, %v1382_v10  ;;  %v49_v10 = vld [vmem:[#allocation2 + $0x68] sm:$0xff] }
0x153a   :  { %1559 = vmatpush.msra.mxu2 %v49_v10  ;;  %1697 = vmatpush.msrb.mxu3 %v49_v10 }
0x153b   :  { %1468 = vrot.lane.b32.xlu2 %v1402_v31, %s2260_s17 }
0x153c   :  { %1828 = vmatpush.msrb.mxu2 %v2849_v33  ;;  %v2926_v33 = vperm.slane %v2877_v57, 3 }
0x153e   :  { %1829 = vmatpush.msrb.mxu2 %v2851_v22 }
0x1540   :  { %1830 = vmatpush.msrb.mxu2 %v2855_v34 }
0x1542   :  { %1831 = vmatpush.msrb.mxu2 %v2860_v11 }
0x1544   :  { %1832 = vmatpush.msrb.mxu2 %v52_v3 }
0x1546   :  { %1833 = vmatpush.msrb.mxu2 %v51_v4 }
0x1548   :  { %1834 = vmatpush.msrb.mxu2 %v50_v6 }
0x154a   :  { %1835 = vmatpush.msrb.mxu2 %v49_v10 }
0x1576   :  { %v1465_v18 = vpop.permute.xlu1 %1464 }
0x1595   :  { %v1469_v58 = vpop.permute.xlu2 %1468 }
0x1596   :  { %v1471_v59 = vsel %vm177_vm13, %v1465_v18, %v1469_v58 }
0x1597   :  { %2052 = vmatmul.msk.f32.vlgmr.msrb.gmra.mxu1 %vm3077_vm5, %v1471_v59  ;;  %vm3080_vm5 = vmmov %vm3079_vm0 }
0x1614   :  { %v1492_v62 = vpop.f32.mrf.mxu1 }
0x1615   :  { %v1493_v39 = vadd.f32 %v1492_v62, %v2903_v23 }
0x1617   :  { %v2053_v40 = vmul.f32 -1.442695, %v1493_v39 }
0x1619   :  { %2183 = vpow2.f32 %v2053_v40 }
0x161f   :  { %v2184_v0 = vpop.eup %2183 }
0x1620   :  { %v1498_v1 = vadd.f32 1.0, %v2184_v0 }
0x1622   :  { %2185 = vrcp.f32 %v1498_v1  ;;  %v1510_v9 = vand.u32 2147483648, %v1498_v1  ;;  %v1508_v16 = vand.u32 2147483647, %v1498_v1  ;;  %vm1504_vm7 = vweird.f32 %v1498_v1 }
0x1624   :  { %v1511_v45 = vor.u32 1.1754944e-38, %v1510_v9  ;;  %vm1509_vm14 = vcmp.eq.f32.partialorder %v1508_v16, 8.507059e+37 }
0x1628   :  { %v2186_v41 = vpop.eup %2185 }
0x1629   :  { %v1500_v2 = vmul.f32 %v2186_v41, %v1498_v1  ;;  %vm1505_vm6 = vweird.f32 %v2186_v41 }
0x162a   :  { %vm1506_vm8 = vmor %vm1504_vm7, %vm1505_vm6 }
0x162b   :  { %v1501_v42 = vsub.f32 1.0, %v1500_v2 }
0x162d   :  { %v1502_v43 = vmul.f32 %v2186_v41, %v1501_v42 }
0x162f   :  { %v1503_v28 = vadd.f32 %v2186_v41, %v1502_v43 }
0x1631   :  { %v1507_v46 = vsel %vm1506_vm8, %v2186_v41, %v1503_v28 }
0x1632   :  { %v1512_v48 = vsel %vm1509_vm14, %v1511_v45, %v1507_v46 }
0x1633   :  { %v1514_v49 = vmul.f32 2.0, %v1512_v48  ;;  %v1516_v52 = vmul.f32 %v1512_v48, %v2891_v24 }
0x1635   :  { %v2054_v29 = vadd.f32 -1.0, %v1514_v49 }
0x1637   :  { %1518 = vrot.lane.b32.xlu0 %v2054_v29, %s2260_s17 }
0x16a9   :  { %v1519_v37 = vpop.permute.xlu0 %1518 }
0x16aa   :  { %v1521_v50 = vmul.f32 %v1519_v37, %v1512_v48 }
0x16ac   :  { %1523 = vrot.lane.b32.xlu1 %v1521_v50, %s2261_s18 }
0x16b4   :  { %1537 = vrot.lane.b32.xlu1 %v2895_v25, %s2260_s17 }
0x171e   :  { %v1524_v54 = vpop.permute.xlu1 %1523 }
0x171f   :  { %v2911_v60 = vadd.f32 %v1524_v54, %v1516_v52 }
0x1721   :  { %2187 = vtanh.f32 %v2911_v60 }
0x1726   :  { %v1538_v32 = vpop.permute.xlu1 %1537 }
0x1727   :  { %v2188_v63 = vpop.eup %2187 }
0x1728   :  { %1529 = vrot.lane.b32.xlu2 %v2188_v63, %s2260_s17 }
0x1782   :  { %v1530_v7 = vpop.permute.xlu2 %1529 }
0x1783   :  { %v1532_v8 = vmul.f32 %v1530_v7, %v1512_v48 }
0x1785   :  { %1534 = vrot.lane.b32.xlu0 %v1532_v8, %s2261_s18 }
0x17f7   :  { %v2920_v26 = vpop.permute.xlu0 %1534 }
0x17f8   :  { %v1540_v12 = vsel %vm177_vm13, %v2920_v26, %v1538_v32 }
0x17f9   :  { %2055 = vmatmul.msk.f32.vlgmr.msra.gmra.mxu2 %vm3078_vm10, %v1540_v12  ;;  %vm3081_vm10 = vmmov %vm3079_vm0 }
0x187c   :  { %v1561_v22 = vpop.f32.mrf.mxu2 }
0x187d   :  { %v1562_v34 = vadd.f32 %v1561_v22, %v2926_v33 }
0x187f   :  { %v2056_v13 = vmul.f32 -1.442695, %v1562_v34 }
0x1881   :  { %2189 = vpow2.f32 %v2056_v13 }
0x1887   :  { %v2190_v11 = vpop.eup %2189 }
0x1888   :  { %v1567_v44 = vadd.f32 1.0, %v2190_v11 }
0x188a   :  { %2191 = vrcp.f32 %v1567_v44  ;;  %v1579_v19 = vand.u32 2147483648, %v1567_v44  ;;  %v1577_v21 = vand.u32 2147483647, %v1567_v44  ;;  %vm1573_vm12 = vweird.f32 %v1567_v44 }
0x188c   :  { %v1580_v57 = vor.u32 1.1754944e-38, %v1579_v19  ;;  %vm1578_vm9 = vcmp.eq.f32.partialorder %v1577_v21, 8.507059e+37 }
0x1890   :  { %v2192_v14 = vpop.eup %2191 }
0x1891   :  { %v1569_v15 = vmul.f32 %v2192_v14, %v1567_v44  ;;  %vm1574_vm11 = vweird.f32 %v2192_v14 }
0x1892   :  { %vm1575_vm15 = vmor %vm1573_vm12, %vm1574_vm11 }
0x1893   :  { %v1570_v47 = vsub.f32 1.0, %v1569_v15 }
0x1895   :  { %v1571_v20 = vmul.f32 %v2192_v14, %v1570_v47 }
0x1897   :  { %v1572_v24 = vadd.f32 %v2192_v14, %v1571_v20 }
0x1899   :  { %v1576_v61 = vsel %vm1575_vm15, %v2192_v14, %v1572_v24 }
0x189a   :  { %v1581_v27 = vsel %vm1578_vm9, %v1580_v57, %v1576_v61 }
0x189b   :  { %v1583_v25 = vmul.f32 2.0, %v1581_v27  ;;  %v1585_v5 = vmul.f32 %v1581_v27, %v2886_v17 }
0x189d   :  { %v2057_v30 = vadd.f32 -1.0, %v1583_v25 }
0x189f   :  { %1587 = vrot.lane.b32.xlu2 %v2057_v30, %s2260_s17 }
0x18f9   :  { %v1588_v31 = vpop.permute.xlu2 %1587 }
0x18fa   :  { %v1590_v51 = vmul.f32 %v1588_v31, %v1581_v27 }
0x18fc   :  { %1592 = vrot.lane.b32.xlu0 %v1590_v51, %s2261_s18 }
0x1904   :  { %1606 = vrot.lane.b32.xlu0 %v1532_v8, %s2260_s17 }
0x196e   :  { %v1593_v35 = vpop.permute.xlu0 %1592 }
0x196f   :  { %v2933_v53 = vadd.f32 %v1593_v35, %v1585_v5 }
0x1971   :  { %2193 = vtanh.f32 %v2933_v53 }
0x1976   :  { %v1607_v56 = vpop.permute.xlu0 %1606 }
0x1977   :  { %v2194_v36 = vpop.eup %2193 }
0x1978   :  { %1598 = vrot.lane.b32.xlu1 %v2194_v36, %s2260_s17 }
0x19ea   :  { %v1599_v55 = vpop.permute.xlu1 %1598 }
0x19eb   :  { %v1601_v38 = vmul.f32 %v1599_v55, %v1581_v27 }
0x19ed   :  { %1603 = vrot.lane.b32.xlu2 %v1601_v38, %s2261_s18 }
0x1a47   :  { %v1604_v18 = vpop.permute.xlu2 %1603 }
0x1a48   :  { %v1609_v58 = vsel %vm177_vm13, %v1604_v18, %v1607_v56 }
0x1a49   :  { %2058 = vmatmul.msk.f32.vlgmr.msrb.gmra.mxu0 %vm3079_vm0, %v1609_v58 }
0x1ac6   :  { %v1630_v59 = vpop.f32.mrf.mxu0 }
0x1ac7   :  { %v1631_v17 = vadd.f32 %v1630_v59, %v2903_v23 }
0x1ac9   :  { %v2059_v62 = vmul.f32 -1.442695, %v1631_v17 }
0x1acb   :  { %2195 = vpow2.f32 %v2059_v62 }
0x1ad1   :  { %v2196_v39 = vpop.eup %2195 }
0x1ad2   :  { %v1636_v40 = vadd.f32 1.0, %v2196_v39 }
0x1ad4   :  { %2197 = vrcp.f32 %v1636_v40  ;;  %v1648_v2 = vand.u32 2147483648, %v1636_v40  ;;  %v1646_v9 = vand.u32 2147483647, %v1636_v40  ;;  %vm1642_vm2 = vweird.f32 %v1636_v40 }
0x1ad6   :  { %v1649_v16 = vor.u32 1.1754944e-38, %v1648_v2  ;;  %vm1647_vm4 = vcmp.eq.f32.partialorder %v1646_v9, 8.507059e+37 }
0x1ada   :  { %v2198_v0 = vpop.eup %2197 }
0x1adb   :  { %v1638_v1 = vmul.f32 %v2198_v0, %v1636_v40  ;;  %vm1643_vm1 = vweird.f32 %v2198_v0 }
0x1adc   :  { %vm1644_vm3 = vmor %vm1642_vm2, %vm1643_vm1 }
0x1add   :  { %v1639_v41 = vsub.f32 1.0, %v1638_v1 }
0x1adf   :  { %v1640_v42 = vmul.f32 %v2198_v0, %v1639_v41 }
0x1ae1   :  { %v1641_v43 = vadd.f32 %v2198_v0, %v1640_v42 }
0x1ae3   :  { %v1645_v28 = vsel %vm1644_vm3, %v2198_v0, %v1641_v43 }
0x1ae4   :  { %v1650_v45 = vsel %vm1647_vm4, %v1649_v16, %v1645_v28 }
0x1ae5   :  { %v1652_v46 = vmul.f32 2.0, %v1650_v45  ;;  %v1654_v37 = vmul.f32 %v1650_v45, %v2911_v60 }
0x1ae7   :  { %v2060_v48 = vadd.f32 -1.0, %v1652_v46 }
0x1ae9   :  { %1656 = vrot.lane.b32.xlu1 %v2060_v48, %s2260_s17 }
0x1b5b   :  { %v1657_v49 = vpop.permute.xlu1 %1656 }
0x1b5c   :  { %v1659_v29 = vmul.f32 %v1657_v49, %v1650_v45 }
0x1b5e   :  { %1661 = vrot.lane.b32.xlu2 %v1659_v29, %s2261_s18 }
0x1b66   :  { %1675 = vrot.lane.b32.xlu2 %v1601_v38, %s2260_s17 }
0x1bb8   :  { %v1662_v50 = vpop.permute.xlu2 %1661 }
0x1bb9   :  { %v2945_v52 = vadd.f32 %v1662_v50, %v1654_v37 }
0x1bbb   :  { %2199 = vtanh.f32 %v2945_v52 }
0x1bc0   :  { %v1676_v4 = vpop.permute.xlu2 %1675 }
0x1bc1   :  { %v2200_v54 = vpop.eup %2199 }
0x1bc2   :  { %1667 = vrot.lane.b32.xlu0 %v2200_v54, %s2260_s17 }
0x1c34   :  { %v1668_v63 = vpop.permute.xlu0 %1667 }
0x1c35   :  { %v1670_v3 = vmul.f32 %v1668_v63, %v1650_v45 }
0x1c37   :  { %1672 = vrot.lane.b32.xlu1 %v1670_v3, %s2261_s18 }
0x1ca9   :  { %v1673_v6 = vpop.permute.xlu1 %1672 }
0x1caa   :  { %v1678_v7 = vsel %vm177_vm13, %v1673_v6, %v1676_v4 }
0x1cab   :  { %2061 = vmatmul.msk.f32.vlgmr.msrb.gmra.mxu3 %vm3080_vm5, %v1678_v7  ;;  %vm3082_vm5 = vmmov %vm3079_vm0 }
0x1d2e   :  { %v1699_v8 = vpop.f32.mrf.mxu3 }
0x1d2f   :  { %v1700_v60 = vadd.f32 %v1699_v8, %v2926_v33 }
0x1d31   :  { %v2062_v10 = vmul.f32 -1.442695, %v1700_v60 }
0x1d33   :  { %2201 = vpow2.f32 %v2062_v10 }
0x1d39   :  { %v2202_v32 = vpop.eup %2201 }
0x1d3a   :  { %v1705_v12 = vadd.f32 1.0, %v2202_v32 }
0x1d3c   :  { %2203 = vrcp.f32 %v1705_v12  ;;  %v1717_v11 = vand.u32 2147483648, %v1705_v12  ;;  %v1715_v14 = vand.u32 2147483647, %v1705_v12  ;;  %vm1711_vm7 = vweird.f32 %v1705_v12 }
0x1d3e   :  { %v1718_v47 = vor.u32 1.1754944e-38, %v1717_v11  ;;  %vm1716_vm14 = vcmp.eq.f32.partialorder %v1715_v14, 8.507059e+37 }
0x1d42   :  { %v2204_v22 = vpop.eup %2203 }
0x1d43   :  { %v1707_v34 = vmul.f32 %v2204_v22, %v1705_v12  ;;  %vm1712_vm6 = vweird.f32 %v2204_v22 }
0x1d44   :  { %vm1713_vm8 = vmor %vm1711_vm7, %vm1712_vm6 }
0x1d45   :  { %v1708_v13 = vsub.f32 1.0, %v1707_v34 }
0x1d47   :  { %v1709_v44 = vmul.f32 %v2204_v22, %v1708_v13 }
0x1d49   :  { %v1710_v15 = vadd.f32 %v2204_v22, %v1709_v44 }
0x1d4b   :  { %v1714_v19 = vsel %vm1713_vm8, %v2204_v22, %v1710_v15 }
0x1d4c   :  { %v1719_v20 = vsel %vm1716_vm14, %v1718_v47, %v1714_v19 }
0x1d4d   :  { %v1721_v21 = vmul.f32 2.0, %v1719_v20  ;;  %v1723_v27 = vmul.f32 %v1719_v20, %v2933_v53 }
0x1d4f   :  { %v2063_v24 = vadd.f32 -1.0, %v1721_v21 }
0x1d51   :  { %1725 = vrot.lane.b32.xlu0 %v2063_v24, %s2260_s17 }
0x1dc3   :  { %v1726_v57 = vpop.permute.xlu0 %1725 }
0x1dc4   :  { %v1728_v61 = vmul.f32 %v1726_v57, %v1719_v20 }
0x1dc6   :  { %1730 = vrot.lane.b32.xlu1 %v1728_v61, %s2261_s18 }
0x1dce   :  { %1744 = vrot.lane.b32.xlu1 %v1670_v3, %s2260_s17 }
0x1e38   :  { %v1731_v25 = vpop.permute.xlu1 %1730 }
0x1e39   :  { %v2957_v30 = vadd.f32 %v1731_v25, %v1723_v27 }
0x1e3b   :  { %2205 = vtanh.f32 %v2957_v30 }
0x1e40   :  { %v2962_v35 = vpop.permute.xlu1 %1744 }
0x1e41   :  { %v2206_v31 = vpop.eup %2205 }
0x1e42   :  { %1736 = vrot.lane.b32.xlu2 %v2206_v31, %s2260_s17 }
0x1e9c   :  { %v1737_v51 = vpop.permute.xlu2 %1736 }
0x1e9d   :  { %v1739_v5 = vmul.f32 %v1737_v51, %v1719_v20 }
0x1e9f   :  { %1741 = vrot.lane.b32.xlu0 %v1739_v5, %s2261_s18 }
0x1f11   :  { %v1742_v36 = vpop.permute.xlu0 %1741 }
0x1f12   :  { %v1747_v55 = vsel %vm177_vm13, %v1742_v36, %v2962_v35 }
0x1f13   :  { %2064 = vmatmul.msk.f32.vlgmr.msra.gmra.mxu1 %vm3081_vm10, %v1747_v55  ;;  %vm1952_vm10 = vcmask 785408  }
0x1f90   :  { %v1768_v53 = vpop.f32.mrf.mxu1 }
0x1f91   :  { %v1769_v38 = vadd.f32 %v1768_v53, %v2903_v23 }
0x1f93   :  { %v2065_v56 = vmul.f32 -1.442695, %v1769_v38 }
0x1f95   :  { %2207 = vpow2.f32 %v2065_v56 }
0x1f9b   :  { %v2208_v18 = vpop.eup %2207 }
0x1f9c   :  { %v1774_v58 = vadd.f32 1.0, %v2208_v18 }
0x1f9e   :  { %2209 = vrcp.f32 %v1774_v58  ;;  %v1786_v39 = vand.u32 2147483648, %v1774_v58  ;;  %v1784_v0 = vand.u32 2147483647, %v1774_v58  ;;  %vm1780_vm12 = vweird.f32 %v1774_v58 }
0x1fa0   :  { %v1787_v41 = vor.u32 1.1754944e-38, %v1786_v39  ;;  %vm1785_vm9 = vcmp.eq.f32.partialorder %v1784_v0, 8.507059e+37 }
0x1fa4   :  { %v2210_v59 = vpop.eup %2209 }
0x1fa5   :  { %v1776_v17 = vmul.f32 %v2210_v59, %v1774_v58  ;;  %vm1781_vm11 = vweird.f32 %v2210_v59 }
0x1fa6   :  { %vm1782_vm15 = vmor %vm1780_vm12, %vm1781_vm11  ;;  %vm1994_vm12 = vcmask 130048  }
0x1fa7   :  { %v1777_v62 = vsub.f32 1.0, %v1776_v17  ;;  %vm3083_vm11 = vmmov %vm3079_vm0 }
0x1fa9   :  { %v1778_v40 = vmul.f32 %v2210_v59, %v1777_v62 }
0x1fab   :  { %v1779_v1 = vadd.f32 %v2210_v59, %v1778_v40 }
0x1fad   :  { %v1783_v2 = vsel %vm1782_vm15, %v2210_v59, %v1779_v1 }
0x1fae   :  { %v1788_v42 = vsel %vm1785_vm9, %v1787_v41, %v1783_v2  ;;  %v1969_v2 = vld [vmem:[%s3059_s3 + $0x78] sm:$0xff] }
0x1faf   :  { %v1790_v9 = vmul.f32 2.0, %v1788_v42  ;;  %v1792_v45 = vmul.f32 %v1788_v42, %v2945_v52  ;;  %1974 = vmatpush.msra.mxu3 %v1969_v2 }
0x1fb1   :  { %v2066_v43 = vadd.f32 -1.0, %v1790_v9  ;;  %v1967_v9 = vld [vmem:[%s3059_s3 + $0x68] sm:$0xff] }
0x1fb3   :  { %1794 = vrot.lane.b32.xlu2 %v2066_v43, %s2260_s17  ;;  %v1966_v43 = vld [vmem:[%s3059_s3 + $0x60] sm:$0xff] }
0x200d   :  { %v1795_v16 = vpop.permute.xlu2 %1794 }
0x200e   :  { %v1797_v28 = vmul.f32 %v1795_v16, %v1788_v42  ;;  %v1965_v16 = vld [vmem:[%s3059_s3 + $0x58] sm:$0xff] }
0x2010   :  { %1799 = vrot.lane.b32.xlu0 %v1797_v28, %s2261_s18  ;;  %v1964_v28 = vld [vmem:[%s3059_s3 + $0x50] sm:$0xff] }
0x2018   :  { %1813 = vrot.lane.b32.xlu0 %v1739_v5, %s2260_s17 }
0x2082   :  { %v1800_v46 = vpop.permute.xlu0 %1799 }
0x2083   :  { %v2972_v48 = vadd.f32 %v1800_v46, %v1792_v45  ;;  %v1963_v45 = vld [vmem:[%s3059_s3 + $0x48] sm:$0xff]  ;;  %v1962_v46 = vld [vmem:[%s3059_s3 + $0x40] sm:$0xff] }
0x2085   :  { %2211 = vtanh.f32 %v2972_v48 }
0x208a   :  { %v1814_v50 = vpop.permute.xlu0 %1813 }
0x208b   :  { %v2212_v49 = vpop.eup %2211 }
0x208c   :  { %1805 = vrot.lane.b32.xlu1 %v2212_v49, %s2260_s17  ;;  %v1961_v49 = vld [vmem:[%s3059_s3 + $0x38] sm:$0xff] }
0x20fe   :  { %v1806_v29 = vpop.permute.xlu1 %1805 }
0x20ff   :  { %v2976_v37 = vmul.f32 %v1806_v29, %v1788_v42  ;;  %v1968_v42 = vld [vmem:[%s3059_s3 + $0x70] sm:$0xff] }
0x2100   :  { %1975 = vmatpush.msra.mxu3 %v1968_v42  ;;  %v1960_v29 = vld [vmem:[%s3059_s3 + $0x30] sm:$0xff] }
0x2101   :  { %1810 = vrot.lane.b32.xlu2 %v2976_v37, %s2261_s18 }
0x2102   :  { %1976 = vmatpush.msra.mxu3 %v1967_v9 }
0x2104   :  { %1977 = vmatpush.msra.mxu3 %v1966_v43 }
0x2106   :  { %1978 = vmatpush.msra.mxu3 %v1965_v16 }
0x2108   :  { %1979 = vmatpush.msra.mxu3 %v1964_v28 }
0x210a   :  { %1980 = vmatpush.msra.mxu3 %v1963_v45 }
0x210c   :  { %1981 = vmatpush.msra.mxu3 %v1962_v46 }
0x210e   :  { %1982 = vmatpush.msra.mxu3 %v1961_v49 }
0x2110   :  { %1983 = vmatpush.msra.mxu3 %v1960_v29 }
0x215b   :  { %v1811_v54 = vpop.permute.xlu2 %1810 }
0x215c   :  { %v1816_v63 = vsel %vm177_vm13, %v1811_v54, %v1814_v50  ;;  %v1958_v50 = vld [vmem:[%s3059_s3 + $0x20] sm:$0xff] }
0x215d   :  { %2067 = vmatmul.msk.f32.vlgmr.msrb.gmra.mxu2 %vm3079_vm0, %v1816_v63 }
0x21e0   :  { %v1837_v52 = vpop.f32.mrf.mxu2 }
0x21e1   :  { %v1838_v3 = vadd.f32 %v1837_v52, %v2926_v33  ;;  %v1957_v52 = vld [vmem:[%s3059_s3 + $0x18] sm:$0xff] }
0x21e3   :  { %v2068_v4 = vmul.f32 -1.442695, %v1838_v3 }
0x21e5   :  { %2213 = vpow2.f32 %v2068_v4  ;;  %v1956_v4 = vld [vmem:[%s3059_s3 + $0x10] sm:$0xff] }
0x21eb   :  { %v2214_v6 = vpop.eup %2213 }
0x21ec   :  { %v1843_v7 = vadd.f32 1.0, %v2214_v6 }
0x21ee   :  { %2215 = vrcp.f32 %v1843_v7  ;;  %v1855_v32 = vand.u32 2147483648, %v1843_v7  ;;  %v1853_v22 = vand.u32 2147483647, %v1843_v7  ;;  %vm1849_vm2 = vweird.f32 %v1843_v7 }
0x21f0   :  { %v1856_v13 = vor.u32 1.1754944e-38, %v1855_v32  ;;  %vm1854_vm4 = vcmp.eq.f32.partialorder %v1853_v22, 8.507059e+37 }
0x21f4   :  { %v2216_v8 = vpop.eup %2215 }
0x21f5   :  { %v1845_v60 = vmul.f32 %v2216_v8, %v1843_v7  ;;  %vm1850_vm1 = vweird.f32 %v2216_v8  ;;  %v1954_v7 = vld [vmem:[%s3059_s3] sm:$0xff] }
0x21f6   :  { %vm1851_vm3 = vmor %vm1849_vm2, %vm1850_vm1 }
0x21f7   :  { %v1846_v10 = vsub.f32 1.0, %v1845_v60 }
0x21f9   :  { %v1847_v12 = vmul.f32 %v2216_v8, %v1846_v10  ;;  %v1950_v10 = vsel %vm177_vm13, %v2920_v26, %v2962_v35 }
0x21fb   :  { %v1848_v34 = vadd.f32 %v2216_v8, %v1847_v12 }
0x21fd   :  { %v1852_v11 = vsel %vm1851_vm3, %v2216_v8, %v1848_v34  ;;  %v2080_v34 = vld [vmem:[%s3060_s4] ss:$0 sm:$0xff] }
0x21fe   :  { %v1857_v44 = vsel %vm1854_vm4, %v1856_v13, %v1852_v11 }
0x21ff   :  { %v1859_v33 = vmul.f32 2.0, %v1857_v44  ;;  %v1861_v19 = vmul.f32 %v1857_v44, %v2957_v30 }
0x2201   :  { %v2069_v14 = vadd.f32 -1.0, %v1859_v33 }
0x2203   :  { %1863 = vrot.lane.b32.xlu1 %v2069_v14, %s2260_s17 }
0x2275   :  { %v1864_v15 = vpop.permute.xlu1 %1863 }
0x2276   :  { %v1866_v47 = vmul.f32 %v1864_v15, %v1857_v44 }
0x2278   :  { %1868 = vrot.lane.b32.xlu2 %v1866_v47, %s2261_s18 }
0x2280   :  { %1882 = vrot.lane.b32.xlu2 %v2976_v37, %s2260_s17 }
0x22d2   :  { %v1869_v20 = vpop.permute.xlu2 %1868 }
0x22d3   :  { %v1871_v21 = vadd.f32 %v1869_v20, %v1861_v19 }
0x22d5   :  { %2217 = vtanh.f32 %v1871_v21 }
0x22da   :  { %v1883_v27 = vpop.permute.xlu2 %1882 }
0x22db   :  { %v2218_v24 = vpop.eup %2217 }
0x22dc   :  { %1874 = vrot.lane.b32.xlu0 %v2218_v24, %s2260_s17 }
0x234e   :  { %v1875_v57 = vpop.permute.xlu0 %1874 }
0x234f   :  { %v1877_v61 = vmul.f32 %v1875_v57, %v1857_v44 }
0x2351   :  { %1879 = vrot.lane.b32.xlu1 %v1877_v61, %s2261_s18 }
0x23c3   :  { %v1880_v25 = vpop.permute.xlu1 %1879 }
0x23c4   :  { %v1885_v31 = vsel %vm177_vm13, %v1880_v25, %v1883_v27 }
0x23c5   :  { %2070 = vmatmul.msk.f32.vlgmr.msra.gmra.mxu0 %vm3082_vm5, %v1885_v31 }
0x2442   :  { %v1906_v51 = vpop.f32.mrf.mxu0 }
0x2443   :  { %v1907_v5 = vadd.f32 %v1906_v51, %v2903_v23 }
0x2445   :  { %v2071_v30 = vmul.f32 -1.442695, %v1907_v5 }
0x2447   :  { %2219 = vpow2.f32 %v2071_v30 }
0x244d   :  { %v2220_v36 = vpop.eup %2219 }
0x244e   :  { %v1912_v55 = vadd.f32 1.0, %v2220_v36 }
0x2450   :  { %2221 = vrcp.f32 %v1912_v55  ;;  %v1924_v18 = vand.u32 2147483648, %v1912_v55  ;;  %v1922_v59 = vand.u32 2147483647, %v1912_v55  ;;  %vm1918_vm7 = vweird.f32 %v1912_v55 }
0x2452   :  { %v1925_v62 = vor.u32 1.1754944e-38, %v1924_v18  ;;  %vm1923_vm14 = vcmp.eq.f32.partialorder %v1922_v59, 8.507059e+37 }
0x2456   :  { %v2222_v53 = vpop.eup %2221 }
0x2457   :  { %v1914_v38 = vmul.f32 %v2222_v53, %v1912_v55  ;;  %vm1919_vm6 = vweird.f32 %v2222_v53 }
0x2458   :  { %vm1920_vm8 = vmor %vm1918_vm7, %vm1919_vm6 }
0x2459   :  { %v1915_v56 = vsub.f32 1.0, %v1914_v38 }
0x245b   :  { %v1916_v58 = vmul.f32 %v2222_v53, %v1915_v56 }
0x245d   :  { %v1917_v17 = vadd.f32 %v2222_v53, %v1916_v58 }
0x245f   :  { %v1921_v39 = vsel %vm1920_vm8, %v2222_v53, %v1917_v17 }
0x2460   :  { %v1926_v40 = vsel %vm1923_vm14, %v1925_v62, %v1921_v39 }
0x2461   :  { %v1928_v23 = vmul.f32 2.0, %v1926_v40  ;;  %v1930_v54 = vmul.f32 %v1926_v40, %v2972_v48  ;;  %v1955_v48 = vld [vmem:[%s3059_s3 + $0x8] sm:$0xff] }
0x2463   :  { %v2072_v0 = vadd.f32 -1.0, %v1928_v23 }
0x2465   :  { %1932 = vrot.lane.b32.xlu0 %v2072_v0, %s2260_s17 }
0x246d   :  { %1947 = vrot.lane.b32.xlu0 %v2976_v37, %s2263_s2  ;;  %v1959_v37 = vld [vmem:[%s3059_s3 + $0x28] sm:$0xff] }
0x246e   :  { %1984 = vmatpush.msra.mxu3 %v1959_v37 }
0x2470   :  { %1985 = vmatpush.msra.mxu3 %v1958_v50 }
0x2472   :  { %1986 = vmatpush.msra.mxu3 %v1957_v52 }
0x2474   :  { %1987 = vmatpush.msra.mxu3 %v1956_v4 }
0x2476   :  { %1988 = vmatpush.msra.mxu3 %v1955_v48 }
0x2478   :  { %1989 = vmatpush.msra.mxu3 %v1954_v7 }
0x24d7   :  { %v1933_v1 = vpop.permute.xlu0 %1932 }
0x24d8   :  { %v1935_v41 = vmul.f32 %v1933_v1, %v1926_v40 }
0x24da   :  { %1937 = vrot.lane.b32.xlu1 %v1935_v41, %s2261_s18 }
0x24df   :  { %v1948_v8 = vpop.permute.xlu0 %1947 }
0x24e0   :  { %v1951_v12 = vsel %vm3083_vm11, %v1950_v10, %v1948_v8 }
0x254c   :  { %v1938_v63 = vpop.permute.xlu1 %1937 }
0x254d   :  { %v1940_v3 = vadd.f32 %v1938_v63, %v1930_v54 }
0x254f   :  { %2223 = vtanh.f32 %v1940_v3 }
0x2555   :  { %v2224_v6 = vpop.eup %2223 }
0x2556   :  { %1943 = vrot.lane.b32.xlu2 %v2224_v6, %s2260_s17 }
0x25b0   :  { %v1944_v60 = vpop.permute.xlu2 %1943 }
0x25b1   :  { %v1946_v32 = vmul.f32 %v1944_v60, %v1926_v40 }
0x25b3   :  { %v1953_v22 = vsel %vm1952_vm10, %v1951_v12, %v1946_v32 }
0x25b4   :  { %1990 = vmatmul.f32.vlgmr.msra.gmra.mxu3 %v1953_v22 }
0x2637   :  { %v1991_v13 = vpop.f32.mrf.mxu3 }
0x2638   :  { %v1992_v11 = vadd.f32 %v2080_v34, %v1991_v13 }
0x263a   :  { %1995 = vst.msk [vmem:[%s3061_s5] sm:$0xff] %vm1994_vm12, %v1992_v11 }
0x263b   :  { %2000 = vsyncpa [#allocation3], 1 }

</bundles_post_ra>
